<compile_context>
chip_gen: v5e
topology: v5e:2x2
jax: 0.10.0
libtpu: 0.0.40
codegen_flags: <defaults>
</compile_context>

<pallas_src>
import functools

import numpy as np

import jax
import jax.numpy as jnp
from jax.experimental import pallas as pl
from jax.experimental.pallas import tpu as pltpu


# ----------------------------------------------------------------------------
# Constant (trace-time) matrix builders — plain numpy, embedded as constants.
# ----------------------------------------------------------------------------

def gaussian_window_np(window_size: int, sigma: float) -> np.ndarray:
    """Matches torch `create_window` (1-D normalized Gaussian)."""
    coords = np.arange(window_size, dtype=np.float32) - (window_size // 2)
    g = np.exp(-(coords ** 2) / (2.0 * sigma ** 2))
    return (g / g.sum()).astype(np.float32)


def conv_band_matrix_np(length: int, g: np.ndarray) -> np.ndarray:
    """Band matrix M (length, length-ws+1) with M[v+k, v] = g[k].

    (x @ M)[h, v] == sum_k g[k] * x[h, v + k]  -> valid 1-D conv along lanes.
    """
    ws = g.shape[0]
    out_len = length - ws + 1
    m = np.zeros((length, out_len), np.float32)
    for k in range(ws):
        m[np.arange(out_len) + k, np.arange(out_len)] = g[k]
    return m


def pool_matrices_np(H: int, W: int):
    """Matrices so that 2x2 stride-2 average pool == Ph @ x @ Pw (each 0.5)."""
    Ph = ((np.arange(H)[None, :] // 2) == np.arange(H // 2)[:, None]).astype(np.float32) * 0.5
    Pw = ((np.arange(W)[:, None] // 2) == np.arange(W // 2)[None, :]).astype(np.float32) * 0.5
    return Ph, Pw


# ----------------------------------------------------------------------------
# Fused Pallas kernel: PSNR partials + all MS-SSIM levels for one (n, c) plane.
# ----------------------------------------------------------------------------

def _fused_msssim_psnr_kernel(x_ref, y_ref, *refs, c1, c2, levels):
    """One grid step = one (image n, channel c) plane.

    x_ref, y_ref : (H, W) f32 planes (VMEM)
    refs         : [gw_0, gh_0, ..., gw_{L-1}, gh_{L-1},       # blur matrices
                    pw_0, ph_0, ..., pw_{L-2}, ph_{L-2},       # pool matrices
                    vals_ref (1, levels), sse_ref (1, 1)]      # outputs
    """
    n_blur = 2 * levels
    n_pool = 2 * (levels - 1)
    blur_refs = refs[:n_blur]
    pool_refs = refs[n_blur:n_blur + n_pool]
    vals_ref, sse_ref = refs[n_blur + n_pool:]

    x = x_ref[...]                       # (H, W)
    y = y_ref[...]

    # ---- PSNR partial (fused: inputs already resident in VMEM) -------------
    d = x - y
    sse_ref[...] = jnp.sum(d * d, axis=(0, 1), keepdims=True)        # (1, 1)

    # ---- MS-SSIM levels (statically unrolled; pyramid stays in VMEM) -------
    cur_x, cur_y = x, y
    for lvl in range(levels):
        gw = blur_refs[2 * lvl][...]          # (Wl, Wol)
        gh = blur_refs[2 * lvl + 1][...]      # (Hol, Hl)
        Hl = cur_x.shape[0]
        Wol = gw.shape[1]
        Hol = gh.shape[0]
        inv_count = 1.0 / float(Hol * Wol)    # mean over (Hol, Wol)

        # (1) One horizontal blur matmul for all 5 quantities (sublane stack).
        stacked = jnp.concatenate(
            [cur_x, cur_y, cur_x * cur_x, cur_y * cur_y, cur_x * cur_y],
            axis=0)                                                     # (5*Hl, Wl)
        t = jnp.dot(stacked, gw, preferred_element_type=jnp.float32)   # (5*Hl, Wol)

        # (2) Re-lay the 5 blocks along the lane axis so the vertical pass is
        #     a single matmul with a lane-dense (5*Wol wide) output.
        tcat = jnp.concatenate(
            [t[i * Hl:(i + 1) * Hl, :] for i in range(5)], axis=1)     # (Hl, 5*Wol)

        # (3) One vertical blur matmul for all 5 quantities.
        u = jnp.dot(gh, tcat, preferred_element_type=jnp.float32)      # (Hol, 5*Wol)

        mu1 = u[:, 0 * Wol:1 * Wol]
        mu2 = u[:, 1 * Wol:2 * Wol]
        e_x2 = u[:, 2 * Wol:3 * Wol]
        e_y2 = u[:, 3 * Wol:4 * Wol]
        e_xy = u[:, 4 * Wol:5 * Wol]

        mu1_sq = mu1 * mu1
        mu2_sq = mu2 * mu2
        mu1_mu2 = mu1 * mu2
        sigma1_sq = e_x2 - mu1_sq
        sigma2_sq = e_y2 - mu2_sq
        sigma12 = e_xy - mu1_mu2

        cs_map = (2.0 * sigma12 + c2) / (sigma1_sq + sigma2_sq + c2)
        cs_map = jnp.maximum(cs_map, 0.0)                               # F.relu

        if lvl < levels - 1:
            val = jnp.sum(cs_map, axis=(0, 1), keepdims=True) * inv_count
        else:
            ssim_map = (2.0 * mu1_mu2 + c1) / (mu1_sq + mu2_sq + c1) * cs_map
            val = jnp.sum(ssim_map, axis=(0, 1), keepdims=True) * inv_count

        # Direct static-slice store (replaces the old one-hot accumulate).
        vals_ref[:, lvl:lvl + 1] = val

        # 2x2 / stride-2 average pool feeding the next level (VMEM-resident).
        # Horizontal pass fused over {x, y} (aligned sublane stack); vertical
        # pass kept as two small matmuls on aligned sublane slices.
        if lvl < levels - 1:
            pw = pool_refs[2 * lvl][...]        # (Wl, Wl//2)
            ph = pool_refs[2 * lvl + 1][...]    # (Hl//2, Hl)
            xy = jnp.concatenate([cur_x, cur_y], axis=0)                # (2*Hl, Wl)
            hw = jnp.dot(xy, pw, preferred_element_type=jnp.float32)    # (2*Hl, Wl//2)
            cur_x = jnp.dot(ph, hw[:Hl, :], preferred_element_type=jnp.float32)
            cur_y = jnp.dot(ph, hw[Hl:, :], preferred_element_type=jnp.float32)


# ----------------------------------------------------------------------------
# Python wrapper
# ----------------------------------------------------------------------------

class EvalMatrixPallas:
    """Pallas port of `eval_matrix.forward` (PSNR and MSSSIM metrics)."""

    def __init__(self, window_size=11, window_sigma=1.5, data_range=1.0,
                 levels=4, channel=3, eps=1e-8):
        assert window_size % 2 == 1, "Window size must be odd."
        self.window_size = int(window_size)
        self.data_range = float(data_range)
        self.eps = float(eps)
        self.levels = int(levels)
        self.channel = int(channel)
        self.window = gaussian_window_np(window_size, window_sigma)
        w = np.array([0.0448, 0.2856, 0.3001, 0.2363, 0.1333], np.float32)[:levels]
        self.weights = (w / w.sum()).astype(np.float32)
        # Whole forward (single fused pallas_call + tiny combine epilogue) is
        # one jitted program -> one dispatch.
        self._forward = jax.jit(self._forward_impl)

    # -- per-channel constant matrices for every pyramid level (trace time) --
    def _build_mats(self, H, W):
        ws = self.window_size
        blur, pool = [], []
        h, w = H, W
        for lvl in range(self.levels):
            assert h >= ws and w >= ws, "image too small for this many levels"
            gw = conv_band_matrix_np(w, self.window)             # (Wl, Wol)
            gh = conv_band_matrix_np(h, self.window).T           # (Hol, Hl)
            blur += [gw, gh]
            if lvl < self.levels - 1:
                assert h % 2 == 0 and w % 2 == 0   # even dims => ceil_mode no-op
                ph, pw = pool_matrices_np(h, w)                  # (Hl//2, Hl), (Wl, Wl//2)
                pool += [pw, ph]
                h, w = h // 2, w // 2
        return blur + pool

    def _forward_impl(self, x, y):
        N, C, H, W = x.shape
        assert C == self.channel
        levels = self.levels
        c1 = (0.01 * self.data_range) ** 2
        c2 = (0.03 * self.data_range) ** 2

        xf = x.astype(jnp.float32)
        yf = y.astype(jnp.float32)
        mats = self._build_mats(H, W)

        kernel = functools.partial(_fused_msssim_psnr_kernel,
                                   c1=float(c1), c2=float(c2), levels=levels)

        plane_spec = pl.BlockSpec((None, None, H, W), lambda n, c: (n, c, 0, 0))
        in_specs = [plane_spec, plane_spec]
        for m in mats:
            # Constant matrices: block index is grid-invariant, so the pipeline
            # only fetches them once.  After dropping the block-diag form they
            # total < 150 KiB, so default double-buffering is negligible.
            in_specs.append(pl.BlockSpec(tuple(m.shape), lambda n, c: (0, 0)))

        out_shape = (jax.ShapeDtypeStruct((N, C, 1, levels), jnp.float32),
                     jax.ShapeDtypeStruct((N, C, 1, 1), jnp.float32))
        out_specs = (pl.BlockSpec((None, None, 1, levels), lambda n, c: (n, c, 0, 0)),
                     pl.BlockSpec((None, None, 1, 1), lambda n, c: (n, c, 0, 0)))

        vals, sse = pl.pallas_call(
            kernel,
            grid=(N, C),
            in_specs=in_specs,
            out_specs=out_specs,
            out_shape=out_shape,
            compiler_params=pltpu.CompilerParams(
                dimension_semantics=("parallel", "parallel"),   # N*C steps, both TCs on v7x
                vmem_limit_bytes=32 * 1024 * 1024),
        )(xf, yf, *mats)

        # ---- tiny scalar epilogue (fused by XLA inside the same jit) -------
        mse = jnp.sum(sse) / float(N * C * H * W)
        psnr = 10.0 * jnp.log10(1.0 / mse)             # matches torch reference

        per_image = jnp.mean(vals[:, :, 0, :], axis=1)          # (N, levels) channel mean
        v = jnp.maximum(per_image.T, self.eps)                  # (levels, N), clamp_min
        wts = jnp.asarray(self.weights)[:, None]
        # mirrors the torch reference combine expression exactly
        ms = jnp.prod(v[:-1] ** wts[:-1] * v[-1:] ** wts[-1:], axis=0)   # (N,)
        # eval_matrix.msssim: 1 - (1 - ms_ssim).mean()
        msssim = 1.0 - jnp.mean(1.0 - ms)
        return {
            "PSNR": psnr,
            "MSSSIM": msssim,
            # TODO(synk): "LPIPS" omitted — needs pretrained LPIPS network weights.
        }

    def __call__(self, x, y):
        return self._forward(x, y)


# ----------------------------------------------------------------------------
# Main
# ----------------------------------------------------------------------------

if __name__ == "__main__":
    key = jax.random.PRNGKey(0)
    kx, ky = jax.random.split(key)
    # 4 MS-SSIM levels with an 11-tap valid window need H, W >= 11 * 2**3
    N, C, H, W = 2, 3, 96, 96
    x = jax.random.uniform(kx, (N, C, H, W), dtype=jnp.float32)
    noise = 0.05 * jax.random.normal(ky, (N, C, H, W), dtype=jnp.float32)
    y = jnp.clip(x + noise, 0.0, 1.0)

    eval_matrix = EvalMatrixPallas(data_range=1.0, levels=4, channel=3)
    metrics = eval_matrix(x, y)
    jax.block_until_ready(metrics)
    print("KERNEL_OK")
</pallas_src>

<mosaic_0001>
module attributes {stable_mosaic.version = 11 : i64} {
  func.func @_fused_msssim_psnr_kernel(%arg0: i32, %arg1: i32, %arg2: memref<1x1x96x96xf32, #tpu.memory_space<vmem>>, %arg3: memref<1x1x96x96xf32, #tpu.memory_space<vmem>>, %arg4: memref<96x86xf32, #tpu.memory_space<vmem>>, %arg5: memref<86x96xf32, #tpu.memory_space<vmem>>, %arg6: memref<48x38xf32, #tpu.memory_space<vmem>>, %arg7: memref<38x48xf32, #tpu.memory_space<vmem>>, %arg8: memref<24x14xf32, #tpu.memory_space<vmem>>, %arg9: memref<14x24xf32, #tpu.memory_space<vmem>>, %arg10: memref<12x2xf32, #tpu.memory_space<vmem>>, %arg11: memref<2x12xf32, #tpu.memory_space<vmem>>, %arg12: memref<96x48xf32, #tpu.memory_space<vmem>>, %arg13: memref<48x96xf32, #tpu.memory_space<vmem>>, %arg14: memref<48x24xf32, #tpu.memory_space<vmem>>, %arg15: memref<24x48xf32, #tpu.memory_space<vmem>>, %arg16: memref<24x12xf32, #tpu.memory_space<vmem>>, %arg17: memref<12x24xf32, #tpu.memory_space<vmem>>, %arg18: memref<1x1x1x4xf32, #tpu.memory_space<vmem>>, %arg19: memref<1x1x1x1xf32, #tpu.memory_space<vmem>>) attributes {dimension_semantics = [#tpu.dimension_semantics<parallel>, #tpu.dimension_semantics<parallel>], iteration_bounds = array<i64: 2, 3>, scalar_prefetch = 0 : i64, scratch_operands = 0 : i64, tpu.core_type = #tpu.core_type<tc>, window_params = [{transform_indices = @transform_0, window_bounds = array<i64: 1, 1, 96, 96>}, {transform_indices = @transform_1, window_bounds = array<i64: 1, 1, 96, 96>}, {pipeline_mode = #tpu.pipeline_mode<synchronous>, transform_indices = @transform_2, window_bounds = array<i64: 96, 86>}, {pipeline_mode = #tpu.pipeline_mode<synchronous>, transform_indices = @transform_3, window_bounds = array<i64: 86, 96>}, {pipeline_mode = #tpu.pipeline_mode<synchronous>, transform_indices = @transform_4, window_bounds = array<i64: 48, 38>}, {pipeline_mode = #tpu.pipeline_mode<synchronous>, transform_indices = @transform_5, window_bounds = array<i64: 38, 48>}, {pipeline_mode = #tpu.pipeline_mode<synchronous>, transform_indices = @transform_6, window_bounds = array<i64: 24, 14>}, {pipeline_mode = #tpu.pipeline_mode<synchronous>, transform_indices = @transform_7, window_bounds = array<i64: 14, 24>}, {pipeline_mode = #tpu.pipeline_mode<synchronous>, transform_indices = @transform_8, window_bounds = array<i64: 12, 2>}, {pipeline_mode = #tpu.pipeline_mode<synchronous>, transform_indices = @transform_9, window_bounds = array<i64: 2, 12>}, {pipeline_mode = #tpu.pipeline_mode<synchronous>, transform_indices = @transform_10, window_bounds = array<i64: 96, 48>}, {pipeline_mode = #tpu.pipeline_mode<synchronous>, transform_indices = @transform_11, window_bounds = array<i64: 48, 96>}, {pipeline_mode = #tpu.pipeline_mode<synchronous>, transform_indices = @transform_12, window_bounds = array<i64: 48, 24>}, {pipeline_mode = #tpu.pipeline_mode<synchronous>, transform_indices = @transform_13, window_bounds = array<i64: 24, 48>}, {pipeline_mode = #tpu.pipeline_mode<synchronous>, transform_indices = @transform_14, window_bounds = array<i64: 24, 12>}, {pipeline_mode = #tpu.pipeline_mode<synchronous>, transform_indices = @transform_15, window_bounds = array<i64: 12, 24>}, {transform_indices = @transform_16, window_bounds = array<i64: 1, 1, 1, 4>}, {transform_indices = @transform_17, window_bounds = array<i64: 1, 1, 1, 1>}]} {
    %c0 = arith.constant 0 : index
    %c0_0 = arith.constant 0 : index
    %c0_1 = arith.constant 0 : index
    %c0_2 = arith.constant 0 : index
    %0 = vector.load %arg2[%c0, %c0_0, %c0_1, %c0_2] : memref<1x1x96x96xf32, #tpu.memory_space<vmem>>, vector<1x1x96x96xf32>
    %1 = vector.shape_cast %0 : vector<1x1x96x96xf32> to vector<96x96xf32>
    %c0_3 = arith.constant 0 : index
    %c0_4 = arith.constant 0 : index
    %c0_5 = arith.constant 0 : index
    %c0_6 = arith.constant 0 : index
    %2 = vector.load %arg3[%c0_3, %c0_4, %c0_5, %c0_6] : memref<1x1x96x96xf32, #tpu.memory_space<vmem>>, vector<1x1x96x96xf32>
    %3 = vector.shape_cast %2 : vector<1x1x96x96xf32> to vector<96x96xf32>
    %4 = arith.subf %1, %3 : vector<96x96xf32>
    %5 = arith.mulf %4, %4 : vector<96x96xf32>
    %6 = vector.shape_cast %5 : vector<96x96xf32> to vector<1x96x96xf32>
    %cst = arith.constant dense<0.000000e+00> : vector<1xf32>
    %7 = vector.multi_reduction <add>, %6, %cst [1, 2] : vector<1x96x96xf32> to vector<1xf32>
    %8 = vector.shape_cast %7 : vector<1xf32> to vector<1x1x1xf32>
    %9 = vector.extract %8[0, 0, 0] : f32 from vector<1x1x1xf32>
    %10 = vector.broadcast %9 : f32 to vector<1x1xf32>
    %c0_7 = arith.constant 0 : index
    %c0_8 = arith.constant 0 : index
    %c0_9 = arith.constant 0 : index
    %c0_10 = arith.constant 0 : index
    %11 = vector.load %arg19[%c0_7, %c0_8, %c0_9, %c0_10] : memref<1x1x1x1xf32, #tpu.memory_space<vmem>>, vector<1x1x1x1xf32>
    %12 = vector.shape_cast %11 : vector<1x1x1x1xf32> to vector<1x1xf32>
    %13 = vector.shape_cast %10 : vector<1x1xf32> to vector<1x1x1x1xf32>
    tpu.vector_store %arg19[%c0_7, %c0_8, %c0_9, %c0_10], %13 {strides = array<i32>} : memref<1x1x1x1xf32, #tpu.memory_space<vmem>>, vector<1x1x1x1xf32>,
    %c0_11 = arith.constant 0 : index
    %c0_12 = arith.constant 0 : index
    %14 = vector.load %arg4[%c0_11, %c0_12] : memref<96x86xf32, #tpu.memory_space<vmem>>, vector<96x86xf32>
    %c0_13 = arith.constant 0 : index
    %c0_14 = arith.constant 0 : index
    %15 = vector.load %arg5[%c0_13, %c0_14] : memref<86x96xf32, #tpu.memory_space<vmem>>, vector<86x96xf32>
    %16 = arith.mulf %1, %1 : vector<96x96xf32>
    %17 = arith.mulf %3, %3 : vector<96x96xf32>
    %18 = arith.mulf %1, %3 : vector<96x96xf32>
    %19 = tpu.concatenate %1, %3, %16, %17, %18 in 0 : vector<96x96xf32>, vector<96x96xf32>, vector<96x96xf32>, vector<96x96xf32>, vector<96x96xf32> -> vector<480x96xf32>
    %cst_15 = arith.constant dense<0.000000e+00> : vector<480x86xf32>
    %20 = tpu.matmul %19, %14, %cst_15 {dimension_numbers = #tpu.dot_dimension_numbers<[1], [0], [0], [1], [0, 0, 1, 1], [], []>} : vector<480x96xf32>, vector<96x86xf32>, vector<480x86xf32> -> vector<480x86xf32>
    %21 = vector.extract_strided_slice %20 {offsets = [0, 0], sizes = [96, 86], strides = [1, 1]} : vector<480x86xf32> to vector<96x86xf32>
    %22 = vector.extract_strided_slice %20 {offsets = [96, 0], sizes = [96, 86], strides = [1, 1]} : vector<480x86xf32> to vector<96x86xf32>
    %23 = vector.extract_strided_slice %20 {offsets = [192, 0], sizes = [96, 86], strides = [1, 1]} : vector<480x86xf32> to vector<96x86xf32>
    %24 = vector.extract_strided_slice %20 {offsets = [288, 0], sizes = [96, 86], strides = [1, 1]} : vector<480x86xf32> to vector<96x86xf32>
    %25 = vector.extract_strided_slice %20 {offsets = [384, 0], sizes = [96, 86], strides = [1, 1]} : vector<480x86xf32> to vector<96x86xf32>
    %26 = tpu.concatenate %21, %22, %23, %24, %25 in 1 : vector<96x86xf32>, vector<96x86xf32>, vector<96x86xf32>, vector<96x86xf32>, vector<96x86xf32> -> vector<96x430xf32>
    %cst_16 = arith.constant dense<0.000000e+00> : vector<86x430xf32>
    %27 = tpu.matmul %15, %26, %cst_16 {dimension_numbers = #tpu.dot_dimension_numbers<[1], [0], [0], [1], [0, 0, 1, 1], [], []>} : vector<86x96xf32>, vector<96x430xf32>, vector<86x430xf32> -> vector<86x430xf32>
    %28 = vector.extract_strided_slice %27 {offsets = [0, 0], sizes = [86, 86], strides = [1, 1]} : vector<86x430xf32> to vector<86x86xf32>
    %29 = vector.extract_strided_slice %27 {offsets = [0, 86], sizes = [86, 86], strides = [1, 1]} : vector<86x430xf32> to vector<86x86xf32>
    %30 = vector.extract_strided_slice %27 {offsets = [0, 172], sizes = [86, 86], strides = [1, 1]} : vector<86x430xf32> to vector<86x86xf32>
    %31 = vector.extract_strided_slice %27 {offsets = [0, 258], sizes = [86, 86], strides = [1, 1]} : vector<86x430xf32> to vector<86x86xf32>
    %32 = vector.extract_strided_slice %27 {offsets = [0, 344], sizes = [86, 86], strides = [1, 1]} : vector<86x430xf32> to vector<86x86xf32>
    %33 = arith.mulf %28, %28 : vector<86x86xf32>
    %34 = arith.mulf %29, %29 : vector<86x86xf32>
    %35 = arith.mulf %28, %29 : vector<86x86xf32>
    %36 = arith.subf %30, %33 : vector<86x86xf32>
    %37 = arith.subf %31, %34 : vector<86x86xf32>
    %38 = arith.subf %32, %35 : vector<86x86xf32>
    %cst_17 = arith.constant 2.000000e+00 : f32
    %39 = vector.broadcast %cst_17 : f32 to vector<86x86xf32>
    %40 = arith.mulf %39, %38 : vector<86x86xf32>
    %cst_18 = arith.constant 8.99999984E-4 : f32
    %41 = vector.broadcast %cst_18 : f32 to vector<86x86xf32>
    %42 = arith.addf %40, %41 : vector<86x86xf32>
    %43 = arith.addf %36, %37 : vector<86x86xf32>
    %cst_19 = arith.constant 8.99999984E-4 : f32
    %44 = vector.broadcast %cst_19 : f32 to vector<86x86xf32>
    %45 = arith.addf %43, %44 : vector<86x86xf32>
    %46 = arith.divf %42, %45 : vector<86x86xf32>
    %cst_20 = arith.constant 0.000000e+00 : f32
    %47 = vector.broadcast %cst_20 : f32 to vector<86x86xf32>
    %48 = arith.maximumf %46, %47 : vector<86x86xf32>
    %49 = vector.shape_cast %48 : vector<86x86xf32> to vector<1x86x86xf32>
    %cst_21 = arith.constant dense<0.000000e+00> : vector<1xf32>
    %50 = vector.multi_reduction <add>, %49, %cst_21 [1, 2] : vector<1x86x86xf32> to vector<1xf32>
    %51 = vector.shape_cast %50 : vector<1xf32> to vector<1x1x1xf32>
    %52 = vector.extract %51[0, 0, 0] : f32 from vector<1x1x1xf32>
    %53 = vector.broadcast %52 : f32 to vector<1x1xf32>
    %cst_22 = arith.constant 1.35208218E-4 : f32
    %54 = vector.broadcast %cst_22 : f32 to vector<1x1xf32>
    %55 = arith.mulf %53, %54 : vector<1x1xf32>
    %c0_23 = arith.constant 0 : index
    %c0_24 = arith.constant 0 : index
    %c0_25 = arith.constant 0 : index
    %c0_26 = arith.constant 0 : index
    %56 = vector.load %arg18[%c0_23, %c0_24, %c0_25, %c0_26] : memref<1x1x1x4xf32, #tpu.memory_space<vmem>>, vector<1x1x1x1xf32>
    %57 = vector.shape_cast %56 : vector<1x1x1x1xf32> to vector<1x1xf32>
    %58 = vector.shape_cast %55 : vector<1x1xf32> to vector<1x1x1x1xf32>
    tpu.vector_store %arg18[%c0_23, %c0_24, %c0_25, %c0_26], %58 {strides = array<i32>} : memref<1x1x1x4xf32, #tpu.memory_space<vmem>>, vector<1x1x1x1xf32>,
    %c0_27 = arith.constant 0 : index
    %c0_28 = arith.constant 0 : index
    %59 = vector.load %arg12[%c0_27, %c0_28] : memref<96x48xf32, #tpu.memory_space<vmem>>, vector<96x48xf32>
    %c0_29 = arith.constant 0 : index
    %c0_30 = arith.constant 0 : index
    %60 = vector.load %arg13[%c0_29, %c0_30] : memref<48x96xf32, #tpu.memory_space<vmem>>, vector<48x96xf32>
    %61 = tpu.concatenate %1, %3 in 0 : vector<96x96xf32>, vector<96x96xf32> -> vector<192x96xf32>
    %cst_31 = arith.constant dense<0.000000e+00> : vector<192x48xf32>
    %62 = tpu.matmul %61, %59, %cst_31 {dimension_numbers = #tpu.dot_dimension_numbers<[1], [0], [0], [1], [0, 0, 1, 1], [], []>} : vector<192x96xf32>, vector<96x48xf32>, vector<192x48xf32> -> vector<192x48xf32>
    %63 = vector.extract_strided_slice %62 {offsets = [0, 0], sizes = [96, 48], strides = [1, 1]} : vector<192x48xf32> to vector<96x48xf32>
    %cst_32 = arith.constant dense<0.000000e+00> : vector<48x48xf32>
    %64 = tpu.matmul %60, %63, %cst_32 {dimension_numbers = #tpu.dot_dimension_numbers<[1], [0], [0], [1], [0, 0, 1, 1], [], []>} : vector<48x96xf32>, vector<96x48xf32>, vector<48x48xf32> -> vector<48x48xf32>
    %65 = vector.extract_strided_slice %62 {offsets = [96, 0], sizes = [96, 48], strides = [1, 1]} : vector<192x48xf32> to vector<96x48xf32>
    %cst_33 = arith.constant dense<0.000000e+00> : vector<48x48xf32>
    %66 = tpu.matmul %60, %65, %cst_33 {dimension_numbers = #tpu.dot_dimension_numbers<[1], [0], [0], [1], [0, 0, 1, 1], [], []>} : vector<48x96xf32>, vector<96x48xf32>, vector<48x48xf32> -> vector<48x48xf32>
    %c0_34 = arith.constant 0 : index
    %c0_35 = arith.constant 0 : index
    %67 = vector.load %arg6[%c0_34, %c0_35] : memref<48x38xf32, #tpu.memory_space<vmem>>, vector<48x38xf32>
    %c0_36 = arith.constant 0 : index
    %c0_37 = arith.constant 0 : index
    %68 = vector.load %arg7[%c0_36, %c0_37] : memref<38x48xf32, #tpu.memory_space<vmem>>, vector<38x48xf32>
    %69 = arith.mulf %64, %64 : vector<48x48xf32>
    %70 = arith.mulf %66, %66 : vector<48x48xf32>
    %71 = arith.mulf %64, %66 : vector<48x48xf32>
    %72 = tpu.concatenate %64, %66, %69, %70, %71 in 0 : vector<48x48xf32>, vector<48x48xf32>, vector<48x48xf32>, vector<48x48xf32>, vector<48x48xf32> -> vector<240x48xf32>
    %cst_38 = arith.constant dense<0.000000e+00> : vector<240x38xf32>
    %73 = tpu.matmul %72, %67, %cst_38 {dimension_numbers = #tpu.dot_dimension_numbers<[1], [0], [0], [1], [0, 0, 1, 1], [], []>} : vector<240x48xf32>, vector<48x38xf32>, vector<240x38xf32> -> vector<240x38xf32>
    %74 = vector.extract_strided_slice %73 {offsets = [0, 0], sizes = [48, 38], strides = [1, 1]} : vector<240x38xf32> to vector<48x38xf32>
    %75 = vector.extract_strided_slice %73 {offsets = [48, 0], sizes = [48, 38], strides = [1, 1]} : vector<240x38xf32> to vector<48x38xf32>
    %76 = vector.extract_strided_slice %73 {offsets = [96, 0], sizes = [48, 38], strides = [1, 1]} : vector<240x38xf32> to vector<48x38xf32>
    %77 = vector.extract_strided_slice %73 {offsets = [144, 0], sizes = [48, 38], strides = [1, 1]} : vector<240x38xf32> to vector<48x38xf32>
    %78 = vector.extract_strided_slice %73 {offsets = [192, 0], sizes = [48, 38], strides = [1, 1]} : vector<240x38xf32> to vector<48x38xf32>
    %79 = tpu.concatenate %74, %75, %76, %77, %78 in 1 : vector<48x38xf32>, vector<48x38xf32>, vector<48x38xf32>, vector<48x38xf32>, vector<48x38xf32> -> vector<48x190xf32>
    %cst_39 = arith.constant dense<0.000000e+00> : vector<38x190xf32>
    %80 = tpu.matmul %68, %79, %cst_39 {dimension_numbers = #tpu.dot_dimension_numbers<[1], [0], [0], [1], [0, 0, 1, 1], [], []>} : vector<38x48xf32>, vector<48x190xf32>, vector<38x190xf32> -> vector<38x190xf32>
    %81 = vector.extract_strided_slice %80 {offsets = [0, 0], sizes = [38, 38], strides = [1, 1]} : vector<38x190xf32> to vector<38x38xf32>
    %82 = vector.extract_strided_slice %80 {offsets = [0, 38], sizes = [38, 38], strides = [1, 1]} : vector<38x190xf32> to vector<38x38xf32>
    %83 = vector.extract_strided_slice %80 {offsets = [0, 76], sizes = [38, 38], strides = [1, 1]} : vector<38x190xf32> to vector<38x38xf32>
    %84 = vector.extract_strided_slice %80 {offsets = [0, 114], sizes = [38, 38], strides = [1, 1]} : vector<38x190xf32> to vector<38x38xf32>
    %85 = vector.extract_strided_slice %80 {offsets = [0, 152], sizes = [38, 38], strides = [1, 1]} : vector<38x190xf32> to vector<38x38xf32>
    %86 = arith.mulf %81, %81 : vector<38x38xf32>
    %87 = arith.mulf %82, %82 : vector<38x38xf32>
    %88 = arith.mulf %81, %82 : vector<38x38xf32>
    %89 = arith.subf %83, %86 : vector<38x38xf32>
    %90 = arith.subf %84, %87 : vector<38x38xf32>
    %91 = arith.subf %85, %88 : vector<38x38xf32>
    %cst_40 = arith.constant 2.000000e+00 : f32
    %92 = vector.broadcast %cst_40 : f32 to vector<38x38xf32>
    %93 = arith.mulf %92, %91 : vector<38x38xf32>
    %cst_41 = arith.constant 8.99999984E-4 : f32
    %94 = vector.broadcast %cst_41 : f32 to vector<38x38xf32>
    %95 = arith.addf %93, %94 : vector<38x38xf32>
    %96 = arith.addf %89, %90 : vector<38x38xf32>
    %cst_42 = arith.constant 8.99999984E-4 : f32
    %97 = vector.broadcast %cst_42 : f32 to vector<38x38xf32>
    %98 = arith.addf %96, %97 : vector<38x38xf32>
    %99 = arith.divf %95, %98 : vector<38x38xf32>
    %cst_43 = arith.constant 0.000000e+00 : f32
    %100 = vector.broadcast %cst_43 : f32 to vector<38x38xf32>
    %101 = arith.maximumf %99, %100 : vector<38x38xf32>
    %102 = vector.shape_cast %101 : vector<38x38xf32> to vector<1x38x38xf32>
    %cst_44 = arith.constant dense<0.000000e+00> : vector<1xf32>
    %103 = vector.multi_reduction <add>, %102, %cst_44 [1, 2] : vector<1x38x38xf32> to vector<1xf32>
    %104 = vector.shape_cast %103 : vector<1xf32> to vector<1x1x1xf32>
    %105 = vector.extract %104[0, 0, 0] : f32 from vector<1x1x1xf32>
    %106 = vector.broadcast %105 : f32 to vector<1x1xf32>
    %cst_45 = arith.constant 6.92520756E-4 : f32
    %107 = vector.broadcast %cst_45 : f32 to vector<1x1xf32>
    %108 = arith.mulf %106, %107 : vector<1x1xf32>
    %c0_46 = arith.constant 0 : index
    %c0_47 = arith.constant 0 : index
    %c0_48 = arith.constant 0 : index
    %c1 = arith.constant 1 : index
    %109 = vector.load %arg18[%c0_46, %c0_47, %c0_48, %c1] : memref<1x1x1x4xf32, #tpu.memory_space<vmem>>, vector<1x1x1x1xf32>
    %110 = vector.shape_cast %109 : vector<1x1x1x1xf32> to vector<1x1xf32>
    %111 = vector.shape_cast %108 : vector<1x1xf32> to vector<1x1x1x1xf32>
    tpu.vector_store %arg18[%c0_46, %c0_47, %c0_48, %c1], %111 {strides = array<i32>} : memref<1x1x1x4xf32, #tpu.memory_space<vmem>>, vector<1x1x1x1xf32>,
    %c0_49 = arith.constant 0 : index
    %c0_50 = arith.constant 0 : index
    %112 = vector.load %arg14[%c0_49, %c0_50] : memref<48x24xf32, #tpu.memory_space<vmem>>, vector<48x24xf32>
    %c0_51 = arith.constant 0 : index
    %c0_52 = arith.constant 0 : index
    %113 = vector.load %arg15[%c0_51, %c0_52] : memref<24x48xf32, #tpu.memory_space<vmem>>, vector<24x48xf32>
    %114 = tpu.concatenate %64, %66 in 0 : vector<48x48xf32>, vector<48x48xf32> -> vector<96x48xf32>
    %cst_53 = arith.constant dense<0.000000e+00> : vector<96x24xf32>
    %115 = tpu.matmul %114, %112, %cst_53 {dimension_numbers = #tpu.dot_dimension_numbers<[1], [0], [0], [1], [0, 0, 1, 1], [], []>} : vector<96x48xf32>, vector<48x24xf32>, vector<96x24xf32> -> vector<96x24xf32>
    %116 = vector.extract_strided_slice %115 {offsets = [0, 0], sizes = [48, 24], strides = [1, 1]} : vector<96x24xf32> to vector<48x24xf32>
    %cst_54 = arith.constant dense<0.000000e+00> : vector<24x24xf32>
    %117 = tpu.matmul %113, %116, %cst_54 {dimension_numbers = #tpu.dot_dimension_numbers<[1], [0], [0], [1], [0, 0, 1, 1], [], []>} : vector<24x48xf32>, vector<48x24xf32>, vector<24x24xf32> -> vector<24x24xf32>
    %118 = vector.extract_strided_slice %115 {offsets = [48, 0], sizes = [48, 24], strides = [1, 1]} : vector<96x24xf32> to vector<48x24xf32>
    %cst_55 = arith.constant dense<0.000000e+00> : vector<24x24xf32>
    %119 = tpu.matmul %113, %118, %cst_55 {dimension_numbers = #tpu.dot_dimension_numbers<[1], [0], [0], [1], [0, 0, 1, 1], [], []>} : vector<24x48xf32>, vector<48x24xf32>, vector<24x24xf32> -> vector<24x24xf32>
    %c0_56 = arith.constant 0 : index
    %c0_57 = arith.constant 0 : index
    %120 = vector.load %arg8[%c0_56, %c0_57] : memref<24x14xf32, #tpu.memory_space<vmem>>, vector<24x14xf32>
    %c0_58 = arith.constant 0 : index
    %c0_59 = arith.constant 0 : index
    %121 = vector.load %arg9[%c0_58, %c0_59] : memref<14x24xf32, #tpu.memory_space<vmem>>, vector<14x24xf32>
    %122 = arith.mulf %117, %117 : vector<24x24xf32>
    %123 = arith.mulf %119, %119 : vector<24x24xf32>
    %124 = arith.mulf %117, %119 : vector<24x24xf32>
    %125 = tpu.concatenate %117, %119, %122, %123, %124 in 0 : vector<24x24xf32>, vector<24x24xf32>, vector<24x24xf32>, vector<24x24xf32>, vector<24x24xf32> -> vector<120x24xf32>
    %cst_60 = arith.constant dense<0.000000e+00> : vector<120x14xf32>
    %126 = tpu.matmul %125, %120, %cst_60 {dimension_numbers = #tpu.dot_dimension_numbers<[1], [0], [0], [1], [0, 0, 1, 1], [], []>} : vector<120x24xf32>, vector<24x14xf32>, vector<120x14xf32> -> vector<120x14xf32>
    %127 = vector.extract_strided_slice %126 {offsets = [0, 0], sizes = [24, 14], strides = [1, 1]} : vector<120x14xf32> to vector<24x14xf32>
    %128 = vector.extract_strided_slice %126 {offsets = [24, 0], sizes = [24, 14], strides = [1, 1]} : vector<120x14xf32> to vector<24x14xf32>
    %129 = vector.extract_strided_slice %126 {offsets = [48, 0], sizes = [24, 14], strides = [1, 1]} : vector<120x14xf32> to vector<24x14xf32>
    %130 = vector.extract_strided_slice %126 {offsets = [72, 0], sizes = [24, 14], strides = [1, 1]} : vector<120x14xf32> to vector<24x14xf32>
    %131 = vector.extract_strided_slice %126 {offsets = [96, 0], sizes = [24, 14], strides = [1, 1]} : vector<120x14xf32> to vector<24x14xf32>
    %132 = tpu.concatenate %127, %128, %129, %130, %131 in 1 : vector<24x14xf32>, vector<24x14xf32>, vector<24x14xf32>, vector<24x14xf32>, vector<24x14xf32> -> vector<24x70xf32>
    %cst_61 = arith.constant dense<0.000000e+00> : vector<14x70xf32>
    %133 = tpu.matmul %121, %132, %cst_61 {dimension_numbers = #tpu.dot_dimension_numbers<[1], [0], [0], [1], [0, 0, 1, 1], [], []>} : vector<14x24xf32>, vector<24x70xf32>, vector<14x70xf32> -> vector<14x70xf32>
    %134 = vector.extract_strided_slice %133 {offsets = [0, 0], sizes = [14, 14], strides = [1, 1]} : vector<14x70xf32> to vector<14x14xf32>
    %135 = vector.extract_strided_slice %133 {offsets = [0, 14], sizes = [14, 14], strides = [1, 1]} : vector<14x70xf32> to vector<14x14xf32>
    %136 = vector.extract_strided_slice %133 {offsets = [0, 28], sizes = [14, 14], strides = [1, 1]} : vector<14x70xf32> to vector<14x14xf32>
    %137 = vector.extract_strided_slice %133 {offsets = [0, 42], sizes = [14, 14], strides = [1, 1]} : vector<14x70xf32> to vector<14x14xf32>
    %138 = vector.extract_strided_slice %133 {offsets = [0, 56], sizes = [14, 14], strides = [1, 1]} : vector<14x70xf32> to vector<14x14xf32>
    %139 = arith.mulf %134, %134 : vector<14x14xf32>
    %140 = arith.mulf %135, %135 : vector<14x14xf32>
    %141 = arith.mulf %134, %135 : vector<14x14xf32>
    %142 = arith.subf %136, %139 : vector<14x14xf32>
    %143 = arith.subf %137, %140 : vector<14x14xf32>
    %144 = arith.subf %138, %141 : vector<14x14xf32>
    %cst_62 = arith.constant 2.000000e+00 : f32
    %145 = vector.broadcast %cst_62 : f32 to vector<14x14xf32>
    %146 = arith.mulf %145, %144 : vector<14x14xf32>
    %cst_63 = arith.constant 8.99999984E-4 : f32
    %147 = vector.broadcast %cst_63 : f32 to vector<14x14xf32>
    %148 = arith.addf %146, %147 : vector<14x14xf32>
    %149 = arith.addf %142, %143 : vector<14x14xf32>
    %cst_64 = arith.constant 8.99999984E-4 : f32
    %150 = vector.broadcast %cst_64 : f32 to vector<14x14xf32>
    %151 = arith.addf %149, %150 : vector<14x14xf32>
    %152 = arith.divf %148, %151 : vector<14x14xf32>
    %cst_65 = arith.constant 0.000000e+00 : f32
    %153 = vector.broadcast %cst_65 : f32 to vector<14x14xf32>
    %154 = arith.maximumf %152, %153 : vector<14x14xf32>
    %155 = vector.shape_cast %154 : vector<14x14xf32> to vector<1x14x14xf32>
    %cst_66 = arith.constant dense<0.000000e+00> : vector<1xf32>
    %156 = vector.multi_reduction <add>, %155, %cst_66 [1, 2] : vector<1x14x14xf32> to vector<1xf32>
    %157 = vector.shape_cast %156 : vector<1xf32> to vector<1x1x1xf32>
    %158 = vector.extract %157[0, 0, 0] : f32 from vector<1x1x1xf32>
    %159 = vector.broadcast %158 : f32 to vector<1x1xf32>
    %cst_67 = arith.constant 0.00510204071 : f32
    %160 = vector.broadcast %cst_67 : f32 to vector<1x1xf32>
    %161 = arith.mulf %159, %160 : vector<1x1xf32>
    %c0_68 = arith.constant 0 : index
    %c0_69 = arith.constant 0 : index
    %c0_70 = arith.constant 0 : index
    %c2 = arith.constant 2 : index
    %162 = vector.load %arg18[%c0_68, %c0_69, %c0_70, %c2] : memref<1x1x1x4xf32, #tpu.memory_space<vmem>>, vector<1x1x1x1xf32>
    %163 = vector.shape_cast %162 : vector<1x1x1x1xf32> to vector<1x1xf32>
    %164 = vector.shape_cast %161 : vector<1x1xf32> to vector<1x1x1x1xf32>
    tpu.vector_store %arg18[%c0_68, %c0_69, %c0_70, %c2], %164 {strides = array<i32>} : memref<1x1x1x4xf32, #tpu.memory_space<vmem>>, vector<1x1x1x1xf32>,
    %c0_71 = arith.constant 0 : index
    %c0_72 = arith.constant 0 : index
    %165 = vector.load %arg16[%c0_71, %c0_72] : memref<24x12xf32, #tpu.memory_space<vmem>>, vector<24x12xf32>
    %c0_73 = arith.constant 0 : index
    %c0_74 = arith.constant 0 : index
    %166 = vector.load %arg17[%c0_73, %c0_74] : memref<12x24xf32, #tpu.memory_space<vmem>>, vector<12x24xf32>
    %167 = tpu.concatenate %117, %119 in 0 : vector<24x24xf32>, vector<24x24xf32> -> vector<48x24xf32>
    %cst_75 = arith.constant dense<0.000000e+00> : vector<48x12xf32>
    %168 = tpu.matmul %167, %165, %cst_75 {dimension_numbers = #tpu.dot_dimension_numbers<[1], [0], [0], [1], [0, 0, 1, 1], [], []>} : vector<48x24xf32>, vector<24x12xf32>, vector<48x12xf32> -> vector<48x12xf32>
    %169 = vector.extract_strided_slice %168 {offsets = [0, 0], sizes = [24, 12], strides = [1, 1]} : vector<48x12xf32> to vector<24x12xf32>
    %cst_76 = arith.constant dense<0.000000e+00> : vector<12x12xf32>
    %170 = tpu.matmul %166, %169, %cst_76 {dimension_numbers = #tpu.dot_dimension_numbers<[1], [0], [0], [1], [0, 0, 1, 1], [], []>} : vector<12x24xf32>, vector<24x12xf32>, vector<12x12xf32> -> vector<12x12xf32>
    %171 = vector.extract_strided_slice %168 {offsets = [24, 0], sizes = [24, 12], strides = [1, 1]} : vector<48x12xf32> to vector<24x12xf32>
    %cst_77 = arith.constant dense<0.000000e+00> : vector<12x12xf32>
    %172 = tpu.matmul %166, %171, %cst_77 {dimension_numbers = #tpu.dot_dimension_numbers<[1], [0], [0], [1], [0, 0, 1, 1], [], []>} : vector<12x24xf32>, vector<24x12xf32>, vector<12x12xf32> -> vector<12x12xf32>
    %c0_78 = arith.constant 0 : index
    %c0_79 = arith.constant 0 : index
    %173 = vector.load %arg10[%c0_78, %c0_79] : memref<12x2xf32, #tpu.memory_space<vmem>>, vector<12x2xf32>
    %c0_80 = arith.constant 0 : index
    %c0_81 = arith.constant 0 : index
    %174 = vector.load %arg11[%c0_80, %c0_81] : memref<2x12xf32, #tpu.memory_space<vmem>>, vector<2x12xf32>
    %175 = arith.mulf %170, %170 : vector<12x12xf32>
    %176 = arith.mulf %172, %172 : vector<12x12xf32>
    %177 = arith.mulf %170, %172 : vector<12x12xf32>
    %178 = tpu.concatenate %170, %172, %175, %176, %177 in 0 : vector<12x12xf32>, vector<12x12xf32>, vector<12x12xf32>, vector<12x12xf32>, vector<12x12xf32> -> vector<60x12xf32>
    %cst_82 = arith.constant dense<0.000000e+00> : vector<60x2xf32>
    %179 = tpu.matmul %178, %173, %cst_82 {dimension_numbers = #tpu.dot_dimension_numbers<[1], [0], [0], [1], [0, 0, 1, 1], [], []>} : vector<60x12xf32>, vector<12x2xf32>, vector<60x2xf32> -> vector<60x2xf32>
    %180 = vector.extract_strided_slice %179 {offsets = [0, 0], sizes = [12, 2], strides = [1, 1]} : vector<60x2xf32> to vector<12x2xf32>
    %181 = vector.extract_strided_slice %179 {offsets = [12, 0], sizes = [12, 2], strides = [1, 1]} : vector<60x2xf32> to vector<12x2xf32>
    %182 = vector.extract_strided_slice %179 {offsets = [24, 0], sizes = [12, 2], strides = [1, 1]} : vector<60x2xf32> to vector<12x2xf32>
    %183 = vector.extract_strided_slice %179 {offsets = [36, 0], sizes = [12, 2], strides = [1, 1]} : vector<60x2xf32> to vector<12x2xf32>
    %184 = vector.extract_strided_slice %179 {offsets = [48, 0], sizes = [12, 2], strides = [1, 1]} : vector<60x2xf32> to vector<12x2xf32>
    %185 = tpu.concatenate %180, %181, %182, %183, %184 in 1 : vector<12x2xf32>, vector<12x2xf32>, vector<12x2xf32>, vector<12x2xf32>, vector<12x2xf32> -> vector<12x10xf32>
    %cst_83 = arith.constant dense<0.000000e+00> : vector<2x10xf32>
    %186 = tpu.matmul %174, %185, %cst_83 {dimension_numbers = #tpu.dot_dimension_numbers<[1], [0], [0], [1], [0, 0, 1, 1], [], []>} : vector<2x12xf32>, vector<12x10xf32>, vector<2x10xf32> -> vector<2x10xf32>
    %187 = vector.extract_strided_slice %186 {offsets = [0, 0], sizes = [2, 2], strides = [1, 1]} : vector<2x10xf32> to vector<2x2xf32>
    %188 = vector.extract_strided_slice %186 {offsets = [0, 2], sizes = [2, 2], strides = [1, 1]} : vector<2x10xf32> to vector<2x2xf32>
    %189 = vector.extract_strided_slice %186 {offsets = [0, 4], sizes = [2, 2], strides = [1, 1]} : vector<2x10xf32> to vector<2x2xf32>
    %190 = vector.extract_strided_slice %186 {offsets = [0, 6], sizes = [2, 2], strides = [1, 1]} : vector<2x10xf32> to vector<2x2xf32>
    %191 = vector.extract_strided_slice %186 {offsets = [0, 8], sizes = [2, 2], strides = [1, 1]} : vector<2x10xf32> to vector<2x2xf32>
    %192 = arith.mulf %187, %187 : vector<2x2xf32>
    %193 = arith.mulf %188, %188 : vector<2x2xf32>
    %194 = arith.mulf %187, %188 : vector<2x2xf32>
    %195 = arith.subf %189, %192 : vector<2x2xf32>
    %196 = arith.subf %190, %193 : vector<2x2xf32>
    %197 = arith.subf %191, %194 : vector<2x2xf32>
    %cst_84 = arith.constant 2.000000e+00 : f32
    %198 = vector.broadcast %cst_84 : f32 to vector<2x2xf32>
    %199 = arith.mulf %198, %197 : vector<2x2xf32>
    %cst_85 = arith.constant 8.99999984E-4 : f32
    %200 = vector.broadcast %cst_85 : f32 to vector<2x2xf32>
    %201 = arith.addf %199, %200 : vector<2x2xf32>
    %202 = arith.addf %195, %196 : vector<2x2xf32>
    %cst_86 = arith.constant 8.99999984E-4 : f32
    %203 = vector.broadcast %cst_86 : f32 to vector<2x2xf32>
    %204 = arith.addf %202, %203 : vector<2x2xf32>
    %205 = arith.divf %201, %204 : vector<2x2xf32>
    %cst_87 = arith.constant 0.000000e+00 : f32
    %206 = vector.broadcast %cst_87 : f32 to vector<2x2xf32>
    %207 = arith.maximumf %205, %206 : vector<2x2xf32>
    %cst_88 = arith.constant 2.000000e+00 : f32
    %208 = vector.broadcast %cst_88 : f32 to vector<2x2xf32>
    %209 = arith.mulf %208, %194 : vector<2x2xf32>
    %cst_89 = arith.constant 9.99999974E-5 : f32
    %210 = vector.broadcast %cst_89 : f32 to vector<2x2xf32>
    %211 = arith.addf %209, %210 : vector<2x2xf32>
    %212 = arith.addf %192, %193 : vector<2x2xf32>
    %cst_90 = arith.constant 9.99999974E-5 : f32
    %213 = vector.broadcast %cst_90 : f32 to vector<2x2xf32>
    %214 = arith.addf %212, %213 : vector<2x2xf32>
    %215 = arith.divf %211, %214 : vector<2x2xf32>
    %216 = arith.mulf %215, %207 : vector<2x2xf32>
    %217 = vector.shape_cast %216 : vector<2x2xf32> to vector<1x2x2xf32>
    %cst_91 = arith.constant dense<0.000000e+00> : vector<1xf32>
    %218 = vector.multi_reduction <add>, %217, %cst_91 [1, 2] : vector<1x2x2xf32> to vector<1xf32>
    %219 = vector.shape_cast %218 : vector<1xf32> to vector<1x1x1xf32>
    %220 = vector.extract %219[0, 0, 0] : f32 from vector<1x1x1xf32>
    %221 = vector.broadcast %220 : f32 to vector<1x1xf32>
    %cst_92 = arith.constant 2.500000e-01 : f32
    %222 = vector.broadcast %cst_92 : f32 to vector<1x1xf32>
    %223 = arith.mulf %221, %222 : vector<1x1xf32>
    %c0_93 = arith.constant 0 : index
    %c0_94 = arith.constant 0 : index
    %c0_95 = arith.constant 0 : index
    %c3 = arith.constant 3 : index
    %224 = vector.load %arg18[%c0_93, %c0_94, %c0_95, %c3] : memref<1x1x1x4xf32, #tpu.memory_space<vmem>>, vector<1x1x1x1xf32>
    %225 = vector.shape_cast %224 : vector<1x1x1x1xf32> to vector<1x1xf32>
    %226 = vector.shape_cast %223 : vector<1x1xf32> to vector<1x1x1x1xf32>
    tpu.vector_store %arg18[%c0_93, %c0_94, %c0_95, %c3], %226 {strides = array<i32>} : memref<1x1x1x4xf32, #tpu.memory_space<vmem>>, vector<1x1x1x1xf32>,
    return
  }
  func.func @transform_0(%arg0: i32, %arg1: i32) -> (i32, i32, i32, i32) {
    %c0_i32 = arith.constant 0 : i32
    %c0_i32_0 = arith.constant 0 : i32
    %c0_i32_1 = arith.constant 0 : i32
    return %arg0, %arg1, %c0_i32, %c0_i32_0 : i32, i32, i32, i32
  }
  func.func @transform_1(%arg0: i32, %arg1: i32) -> (i32, i32, i32, i32) {
    %c0_i32 = arith.constant 0 : i32
    %c0_i32_0 = arith.constant 0 : i32
    %c0_i32_1 = arith.constant 0 : i32
    return %arg0, %arg1, %c0_i32, %c0_i32_0 : i32, i32, i32, i32
  }
  func.func @transform_2(%arg0: i32, %arg1: i32) -> (i32, i32) {
    %c0_i32 = arith.constant 0 : i32
    %c0_i32_0 = arith.constant 0 : i32
    %c0_i32_1 = arith.constant 0 : i32
    return %c0_i32, %c0_i32_0 : i32, i32
  }
  func.func @transform_3(%arg0: i32, %arg1: i32) -> (i32, i32) {
    %c0_i32 = arith.constant 0 : i32
    %c0_i32_0 = arith.constant 0 : i32
    %c0_i32_1 = arith.constant 0 : i32
    return %c0_i32, %c0_i32_0 : i32, i32
  }
  func.func @transform_4(%arg0: i32, %arg1: i32) -> (i32, i32) {
    %c0_i32 = arith.constant 0 : i32
    %c0_i32_0 = arith.constant 0 : i32
    %c0_i32_1 = arith.constant 0 : i32
    return %c0_i32, %c0_i32_0 : i32, i32
  }
  func.func @transform_5(%arg0: i32, %arg1: i32) -> (i32, i32) {
    %c0_i32 = arith.constant 0 : i32
    %c0_i32_0 = arith.constant 0 : i32
    %c0_i32_1 = arith.constant 0 : i32
    return %c0_i32, %c0_i32_0 : i32, i32
  }
  func.func @transform_6(%arg0: i32, %arg1: i32) -> (i32, i32) {
    %c0_i32 = arith.constant 0 : i32
    %c0_i32_0 = arith.constant 0 : i32
    %c0_i32_1 = arith.constant 0 : i32
    return %c0_i32, %c0_i32_0 : i32, i32
  }
  func.func @transform_7(%arg0: i32, %arg1: i32) -> (i32, i32) {
    %c0_i32 = arith.constant 0 : i32
    %c0_i32_0 = arith.constant 0 : i32
    %c0_i32_1 = arith.constant 0 : i32
    return %c0_i32, %c0_i32_0 : i32, i32
  }
  func.func @transform_8(%arg0: i32, %arg1: i32) -> (i32, i32) {
    %c0_i32 = arith.constant 0 : i32
    %c0_i32_0 = arith.constant 0 : i32
    %c0_i32_1 = arith.constant 0 : i32
    return %c0_i32, %c0_i32_0 : i32, i32
  }
  func.func @transform_9(%arg0: i32, %arg1: i32) -> (i32, i32) {
    %c0_i32 = arith.constant 0 : i32
    %c0_i32_0 = arith.constant 0 : i32
    %c0_i32_1 = arith.constant 0 : i32
    return %c0_i32, %c0_i32_0 : i32, i32
  }
  func.func @transform_10(%arg0: i32, %arg1: i32) -> (i32, i32) {
    %c0_i32 = arith.constant 0 : i32
    %c0_i32_0 = arith.constant 0 : i32
    %c0_i32_1 = arith.constant 0 : i32
    return %c0_i32, %c0_i32_0 : i32, i32
  }
  func.func @transform_11(%arg0: i32, %arg1: i32) -> (i32, i32) {
    %c0_i32 = arith.constant 0 : i32
    %c0_i32_0 = arith.constant 0 : i32
    %c0_i32_1 = arith.constant 0 : i32
    return %c0_i32, %c0_i32_0 : i32, i32
  }
  func.func @transform_12(%arg0: i32, %arg1: i32) -> (i32, i32) {
    %c0_i32 = arith.constant 0 : i32
    %c0_i32_0 = arith.constant 0 : i32
    %c0_i32_1 = arith.constant 0 : i32
    return %c0_i32, %c0_i32_0 : i32, i32
  }
  func.func @transform_13(%arg0: i32, %arg1: i32) -> (i32, i32) {
    %c0_i32 = arith.constant 0 : i32
    %c0_i32_0 = arith.constant 0 : i32
    %c0_i32_1 = arith.constant 0 : i32
    return %c0_i32, %c0_i32_0 : i32, i32
  }
  func.func @transform_14(%arg0: i32, %arg1: i32) -> (i32, i32) {
    %c0_i32 = arith.constant 0 : i32
    %c0_i32_0 = arith.constant 0 : i32
    %c0_i32_1 = arith.constant 0 : i32
    return %c0_i32, %c0_i32_0 : i32, i32
  }
  func.func @transform_15(%arg0: i32, %arg1: i32) -> (i32, i32) {
    %c0_i32 = arith.constant 0 : i32
    %c0_i32_0 = arith.constant 0 : i32
    %c0_i32_1 = arith.constant 0 : i32
    return %c0_i32, %c0_i32_0 : i32, i32
  }
  func.func @transform_16(%arg0: i32, %arg1: i32) -> (i32, i32, i32, i32) {
    %c0_i32 = arith.constant 0 : i32
    %c0_i32_0 = arith.constant 0 : i32
    %c0_i32_1 = arith.constant 0 : i32
    return %arg0, %arg1, %c0_i32, %c0_i32_0 : i32, i32, i32, i32
  }
  func.func @transform_17(%arg0: i32, %arg1: i32) -> (i32, i32, i32, i32) {
    %c0_i32 = arith.constant 0 : i32
    %c0_i32_0 = arith.constant 0 : i32
    %c0_i32_1 = arith.constant 0 : i32
    return %arg0, %arg1, %c0_i32, %c0_i32_0 : i32, i32, i32, i32
  }
}

</mosaic_0001>

<bundles_post_ra>
// kernel: _forward_impl.1
= control target key start
LH: loop header
LB: loop body
LE: loop exit
PB: predicated region body
PF: predicated region fallthrough
CT: control target
= control target key end

     0   :  { %s9104_s0 = inlined_call_operand.hbm [shape: f32[2,3,96,96], index: 0, kind: input, shape index: {}]   ;;  %s9105_s1 = inlined_call_operand.hbm [shape: f32[2,3,96,96], index: 1, kind: input, shape index: {}]   ;;  %s9106_s2 = inlined_call_operand.hbm [shape: f32[96,86], index: 2, kind: input, shape index: {}]   ;;  %s9107_s3 = inlined_call_operand.hbm [shape: f32[86,96], index: 3, kind: input, shape index: {}]   ;;  %s9108_s4 = inlined_call_operand.hbm [shape: f32[48,38], index: 4, kind: input, shape index: {}]   ;;  %s9109_s5 = inlined_call_operand.hbm [shape: f32[38,48], index: 5, kind: input, shape index: {}]   ;;  %s9110_s6 = inlined_call_operand.hbm [shape: f32[24,14], index: 6, kind: input, shape index: {}]   ;;  %s9111_s7 = inlined_call_operand.hbm [shape: f32[14,24], index: 7, kind: input, shape index: {}]   ;;  %s9112_s8 = inlined_call_operand.hbm [shape: f32[12,2], index: 8, kind: input, shape index: {}]   ;;  %s9113_s9 = inlined_call_operand.vmem [shape: f32[2,12], index: 9, kind: input, shape index: {}]   ;;  %s9114_s10 = inlined_call_operand.hbm [shape: f32[96,48], index: 10, kind: input, shape index: {}]   ;;  %s9115_s11 = inlined_call_operand.hbm [shape: f32[48,96], index: 11, kind: input, shape index: {}]   ;;  %s9116_s12 = inlined_call_operand.hbm [shape: f32[48,24], index: 12, kind: input, shape index: {}]   ;;  %s9117_s13 = inlined_call_operand.hbm [shape: f32[24,48], index: 13, kind: input, shape index: {}]   ;;  %s9118_s14 = inlined_call_operand.hbm [shape: f32[24,12], index: 14, kind: input, shape index: {}]   ;;  %s9119_s15 = inlined_call_operand.vmem [shape: f32[12,24], index: 15, kind: input, shape index: {}]   ;;  %s9120_s16 = inlined_call_operand.vmem [shape: f32[2,3,1,4], index: 16, kind: output, shape index: {0}]   ;;  %s9121_s17 = inlined_call_operand.vmem [shape: f32[2,3,1,1], index: 17, kind: output, shape index: {1}]  }
   0x1   :  { %9177 = sst [smem:[#allocation68_spill]] %s9104_s0 }
   0x2   :  { %9178 = sst [smem:[#allocation69_spill]] %s9105_s1 }
   0x3   :  { %9179 = sst [smem:[#allocation70_spill]] %s9106_s2 }
   0x4   :  { %9180 = sst [smem:[#allocation71_spill]] %s9107_s3 }
   0x5   :  { %9181 = sst [smem:[#allocation72_spill]] %s9108_s4 }
   0x6   :  { %9182 = sst [smem:[#allocation73_spill]] %s9109_s5 }
   0x7   :  { %9183 = sst [smem:[#allocation74_spill]] %s9110_s6 }
   0x8   :  { %9184 = sst [smem:[#allocation75_spill]] %s9111_s7 }
   0x9   :  { %9185 = sst [smem:[#allocation76_spill]] %s9112_s8 }
   0xa   :  { %9186 = sst [smem:[#allocation77_spill]] %s9113_s9 }
   0xb   :  { %9187 = sst [smem:[#allocation78_spill]] %s9114_s10 }
   0xc   :  { %9188 = sst [smem:[#allocation79_spill]] %s9115_s11 }
   0xd   :  { %9189 = sst [smem:[#allocation80_spill]] %s9116_s12 }
   0xe   :  { %9190 = sst [smem:[#allocation81_spill]] %s9119_s15 }
   0xf   :  { %9191 = sst [smem:[#allocation82_spill]] %s9120_s16 }
  0x10   :  { %9192 = sst [smem:[#allocation83_spill]] %s9121_s17 }
  0x11   :  { %23 = vsyncpa [#allocation3], 0 }
  0x12   :  { %25 = vsyncpa [#allocation3 + $0x1], 0 }
  0x13   :  { %26 = vsyncpa [#allocation5], 0 }
  0x14   :  { %28 = vsyncpa [#allocation5 + $0x1], 0 }
  0x15   :  { %29 = vsyncpa [#allocation8], 0 }
  0x16   :  { %30 = vsyncpa [#allocation11], 0 }
  0x17   :  { %31 = vsyncpa [#allocation14], 0 }
  0x18   :  { %32 = vsyncpa [#allocation17], 0 }
  0x19   :  { %33 = vsyncpa [#allocation20], 0 }
  0x1a   :  { %34 = vsyncpa [#allocation23], 0  ;;  %s6305_s24 = smov 0   ;;  %s6307_s25 = smov 0  }
  0x1b   :  { %s6309_s26 = smov 0   ;;  %s6311_s27 = smov 0  }
  0x1c   :  { %s6313_s28 = smov 0   ;;  %s6315_s29 = smov 0  }
  0x1d   :  { %s6317_s0 = smov 0   ;;  %s6319_s30 = smov 0  }
  0x1e LB: > { %9193 = sst [smem:[#allocation33_spill]] %s6162_s27  ;;  %s9122_s18 = sadd.s32 4294967295, %s6178_s30   ;;  %s6178_s30 = sphi %s6319_s30, %s40_s30   ;;  %s6174_s0 = sphi %s6317_s0, %s9393_s0   ;;  %s6170_s29 = sphi %s6315_s29, %s9392_s29   ;;  %s6166_s28 = sphi %s6313_s28, %s9391_s28   ;;  %s6162_s27 = sphi %s6311_s27, %s9390_s27   ;;  %s6158_s26 = sphi %s6309_s26, %s9389_s26   ;;  %s6154_s25 = sphi %s6307_s25, %s9388_s25   ;;  %s6150_s24 = sphi %s6305_s24, %s9387_s24  }
  0x1f   : > { %9194 = sst [smem:[#allocation34_spill]] %s6166_s28  ;;  %p4857_p0 = scmp.ge.s32.totalorder %s6178_s30, 1 }
  0x20   : > { %p6349_p1 = scmp.eq.s32.totalorder %s9122_s18, 0  ;;  %p463_p2 = scmp.lt.s32.totalorder %s6178_s30, 7 }
  0x21   : > { %s9197_s2 = sld [smem:[#allocation70_spill]]  ;;  %s6180_s23 = smov [#allocation6]  }
  0x22   : > { %s9195_s19 = scalar_select %p6349_p1, 1, 0 }
  0x23   : > { %p6357_p3 = pnand %p4857_p0, %p463_p2  ;;  %s476_s16 = sshll.u32 %s6180_s23, 4  ;;  %s477_s16 = int_to_ptr.vmem [resolvable:$true] %s476_s16 }
  0x24   : > { %9196 = sst [smem:[#allocation35_spill]] %s9195_s19  ;;  %s9129_s20 = smov 128  }
  0x25   : > { %s9198_s22 = scalar_select %p6357_p3, 1, 0 }
  0x26   : > { %p5206_p4 = pneg %p6357_p3  ;;  %s9201_s3 = sld [smem:[#allocation71_spill]] }
  0x27   : > { %s474_s21 = sshll.u32 %s9197_s2, 4  ;;  %9199 = sst [smem:[#allocation36_spill]] %s9198_s22  ;;  %s475_s21 = int_to_ptr.hbm [resolvable:$true] %s474_s21 }
  0x28   : > { %p6365_p5 = pnand %p5206_p4, %p6349_p1  ;;  %s9131_s2 = smov 8  }
  0x29   : > { %s6183_s23 = smov [#allocation7]   ;;  %s9202_s5 = sld [smem:[#allocation73_spill]] }
  0x2a   : > { %5209 = dma.hbm_to_vmem [thread:$0]  (!%p6365_p5), %s475_s21, 1536, %s477_s16, [#allocation5], %s9129_s20, %s9129_s20, %s9131_s2  }
  0x2b   : > { %s490_s27 = sshll.u32 %s6183_s23, 4  ;;  %s9203_s7 = sld [smem:[#allocation75_spill]]  ;;  %s491_s27 = int_to_ptr.vmem [resolvable:$true] %s490_s27 }
  0x2c   : > { %s488_s1 = sshll.u32 %s9201_s3, 4  ;;  %s6184_s19 = smov [#allocation10]   ;;  %s489_s1 = int_to_ptr.hbm [resolvable:$true] %s488_s1 }
  0x2d   : > { %5212 = dma.hbm_to_vmem [thread:$0]  (!%p6365_p5), %s489_s1, 1408, %s491_s27, [#allocation8], %s9129_s20, %s9129_s20, %s9131_s2  }
  0x2e   : > { %s518_s16 = sshll.u32 %s6184_s19, 4  ;;  %s6185_s15 = smov [#allocation13]   ;;  %s519_s16 = int_to_ptr.vmem [resolvable:$true] %s518_s16 }
  0x2f   : > { %s516_s22 = sshll.u32 %s9202_s5, 4  ;;  %s546_s28 = sshll.u32 %s6185_s15, 4  ;;  %s517_s22 = int_to_ptr.hbm [resolvable:$true] %s516_s22  ;;  %s547_s28 = int_to_ptr.vmem [resolvable:$true] %s546_s28 }
  0x30   : > { %5218 = dma.hbm_to_vmem [thread:$0]  (!%p6365_p5), %s517_s22, 640, %s519_s16, [#allocation11], %s9129_s20, %s9129_s20, %s9131_s2  }
  0x31   : > { %s544_s3 = sshll.u32 %s9203_s7, 4  ;;  %s9204_s10 = sld [smem:[#allocation78_spill]]  ;;  %s545_s3 = int_to_ptr.hbm [resolvable:$true] %s544_s3 }
  0x32   : > { %5224 = dma.hbm_to_vmem [thread:$0]  (!%p6365_p5), %s545_s3, 256, %s547_s28, [#allocation14], %s9129_s20, %s9129_s20, %s9131_s2  }
  0x33   : > { %s9205_s12 = sld [smem:[#allocation80_spill]]  ;;  %s6186_s17 = smov [#allocation16]  }
  0x34   : > { %s577_s22 = sshll.u32 %s6186_s17, 4  ;;  %s6187_s16 = smov [#allocation19]   ;;  %s578_s22 = int_to_ptr.vmem [resolvable:$true] %s577_s22 }
  0x35   : > { %s605_s15 = sshll.u32 %s6187_s16, 4  ;;  %s9206_s4 = sld [smem:[#allocation72_spill]]  ;;  %s606_s15 = int_to_ptr.vmem [resolvable:$true] %s605_s15 }
  0x36   : > { %s9207_s6 = sld [smem:[#allocation74_spill]]  ;;  %s6188_s17 = smov [#allocation9]  }
  0x37   : > { %s575_s27 = sshll.u32 %s9204_s10, 4  ;;  %s9208_s8 = sld [smem:[#allocation76_spill]]  ;;  %s576_s27 = int_to_ptr.hbm [resolvable:$true] %s575_s27 }
  0x38   : > { %5230 = dma.hbm_to_vmem [thread:$0]  (!%p6365_p5), %s576_s27, 1536, %s578_s22, [#allocation17], %s9129_s20, %s9129_s20, %s9131_s2  }
  0x39   : > { %s603_s9 = sshll.u32 %s9205_s12, 4  ;;  %s504_s27 = sshll.u32 %s6188_s17, 4  ;;  %s604_s9 = int_to_ptr.hbm [resolvable:$true] %s603_s9  ;;  %s505_s27 = int_to_ptr.vmem [resolvable:$true] %s504_s27 }
  0x3a   : > { %5236 = dma.hbm_to_vmem [thread:$0]  (!%p6365_p5), %s604_s9, 768, %s606_s15, [#allocation20], %s9129_s20, %s9129_s20, %s9131_s2  }
  0x3b   : > { %s502_s3 = sshll.u32 %s9206_s4, 4  ;;  %s6189_s22 = smov [#allocation12]   ;;  %s503_s3 = int_to_ptr.hbm [resolvable:$true] %s502_s3 }
  0x3c   : > { %s530_s1 = sshll.u32 %s9207_s6, 4  ;;  %s532_s16 = sshll.u32 %s6189_s22, 4  ;;  %s531_s1 = int_to_ptr.hbm [resolvable:$true] %s530_s1  ;;  %s533_s16 = int_to_ptr.vmem [resolvable:$true] %s532_s16 }
  0x3d   : > { %5215 = dma.hbm_to_vmem [thread:$0]  (!%p6365_p5), %s503_s3, 768, %s505_s27, [#allocation8], %s9129_s20, %s9129_s20, %s9131_s2  }
  0x3e   : > { %s558_s9 = sshll.u32 %s9208_s8, 4  ;;  %s9209_s11 = sld [smem:[#allocation79_spill]]  ;;  %s559_s9 = int_to_ptr.hbm [resolvable:$true] %s558_s9 }
  0x3f   : > { %5221 = dma.hbm_to_vmem [thread:$0]  (!%p6365_p5), %s531_s1, 384, %s533_s16, [#allocation11], %s9129_s20, %s9129_s20, %s9131_s2  }
  0x40   : > { %s6190_s17 = smov [#allocation15]   ;;  %s6191_s27 = smov [#allocation18]  }
  0x41   : > { %s560_s3 = sshll.u32 %s6190_s17, 4  ;;  %s591_s22 = sshll.u32 %s6191_s27, 4  ;;  %s561_s3 = int_to_ptr.vmem [resolvable:$true] %s560_s3  ;;  %s592_s22 = int_to_ptr.vmem [resolvable:$true] %s591_s22 }
  0x42   : > { %5227 = dma.hbm_to_vmem [thread:$0]  (!%p6365_p5), %s559_s9, 256, %s561_s3, [#allocation14], %s9129_s20, %s9129_s20, %s9131_s2  }
  0x43   : > { %s617_s16 = sshll.u32 %s9117_s13, 4  ;;  %s631_s15 = sshll.u32 %s9118_s14, 4  ;;  %s618_s16 = int_to_ptr.hbm [resolvable:$true] %s617_s16  ;;  %s632_s15 = int_to_ptr.hbm [resolvable:$true] %s631_s15 }
  0x44   : > { %s589_s19 = sshll.u32 %s9209_s11, 4  ;;  %s6192_s28 = smov [#allocation21]   ;;  %s590_s19 = int_to_ptr.hbm [resolvable:$true] %s589_s19 }
  0x45   : > { %5233 = dma.hbm_to_vmem [thread:$0]  (!%p6365_p5), %s590_s19, 768, %s592_s22, [#allocation17], %s9129_s20, %s9129_s20, %s9131_s2  }
  0x46   : > { %s619_s17 = sshll.u32 %s6192_s28, 4  ;;  %s6193_s3 = smov [#allocation22]   ;;  %s620_s17 = int_to_ptr.vmem [resolvable:$true] %s619_s17 }
  0x47   : > { %5239 = dma.hbm_to_vmem [thread:$0]  (!%p6365_p5), %s618_s16, 384, %s620_s17, [#allocation20], %s9129_s20, %s9129_s20, %s9131_s2  }
  0x48   : > { %s633_s19 = sshll.u32 %s6193_s3, 4  ;;  %s49_s22 = sadd.s32 1, %s6170_s29  ;;  %s634_s19 = int_to_ptr.vmem [resolvable:$true] %s633_s19 }
  0x49   : > { %5242 = dma.hbm_to_vmem [thread:$0]  (!%p6365_p5), %s632_s15, 384, %s634_s19, [#allocation23], %s9129_s20, %s9129_s20, %s9131_s2  }
  0x4a   : > { %s52_s21 = sadd.s32 1, %s6174_s0  ;;  %p50_p6 = scmp.ge.s32.totalorder %s49_s22, 3 }
  0x4b   : > { %s61_s1 = sadd.s32 1, %s6158_s26  ;;  %p68_p7 = scmp.ne.s32.totalorder %s6158_s26, %s6154_s25 }
  0x4c   : > { %p69_p8 = scmp.eq.s32.totalorder %s6178_s30, 0  ;;  %s9395_s22 = smov (%p50_p6, %s49_s22), 0 }
  0x4d   : > { %s9397_s21 = smov (!%p50_p6, %s52_s21), %s6174_s0  ;;  %s57_s16 = ssub.s32 %s6170_s29, %s9395_s22 }
  0x4e   : > { %p6473_p9 = por %p69_p8, %p68_p7  ;;  %p54_p10 = scmp.ge.s32.totalorder %s9397_s21, 2 }
  0x4f   : > { %p74_p11 = scmp.ne.s32.totalorder %s6154_s25, %s6150_s24  ;;  %p5262_p12 = scmp.lt.s32.totalorder %s6178_s30, 6 }
  0x50   : > { %s650_s23 = sand.u32 1, %s6158_s26   ;;  %s9399_s21 = smov (%p54_p10, %s9397_s21), 0 }
  0x51   : > { %p6485_p13 = por %p6349_p1, %p74_p11  ;;  %s56_s15 = ssub.s32 %s6174_s0, %s9399_s21 }
  0x52   : > { %s5136_s28 = smul.u32 96, %s650_s23  ;;  %s58_s17 = sor.u32 %s57_s16, %s56_s15 }
  0x53   : > { %s5137_s3 = smul.u32 12, %s6170_s29  ;;  %p59_p0 = scmp.eq.s32.totalorder %s58_s17, 0 }
  0x54   : > { %s5138_s19 = smul.u32 36, %s6174_s0  ;;  %s654_s24 = scalar_lea.vmem [#allocation2], %s5136_s28 }
  0x55   : > { %s664_s20 = sshll.u32 %s654_s24, 4  ;;  %p6500_p2 = pnand %p5262_p12, %p6473_p9  ;;  %s665_s20 = int_to_ptr.vmem [resolvable:$true] %s664_s20 }
  0x56   : > { %s6494_s2 = scalar_select %p59_p0, %s6158_s26, %s61_s1  }
  0x57   : > { %s659_s4 = sadd.s32 %s5138_s19, %s5137_s3  ;;  %s9214_s16 = sld [smem:[#allocation68_spill]] }
  0x58   : > { %s4871_s5 = sshll.u32 %s659_s4, 3  ;;  %s9215_s24 = sld [smem:[#allocation69_spill]] }
  0x59   : > { %s651_s4 = scalar_lea.sflag [#allocation3], %s650_s23  ;;  %s9216_s18 = smov 8  }
  0x5a   : > { %s9217_s19 = smov 128   ;;  %s674_s11 = sand.u32 1, %s6178_s30  }
  0x5b   : > { %s678_s12 = scalar_lea.vmem [#allocation4], %s5136_s28  ;;  %s675_s7 = scalar_lea.sflag [#allocation5], %s674_s11 }
  0x5c   : > { %s688_s6 = sshll.u32 %s678_s12, 4  ;;  %s689_s6 = int_to_ptr.vmem [resolvable:$true] %s688_s6 }
  0x5d   : > { %s661_s15 = scalar_lea.hbm %s9214_s16, %s4871_s5  ;;  %700 = sbr.rel (%p6357_p3) target bundleno = 3970 (0xf82), region = 84 }
  0x5e   : > { %s685_s1 = scalar_lea.hbm %s9215_s24, %s4871_s5  ;;  %s662_s10 = sshll.u32 %s661_s15, 4  ;;  %s663_s10 = int_to_ptr.hbm [resolvable:$true] %s662_s10 }
  0x5f   : > { %s686_s3 = sshll.u32 %s685_s1, 4  ;;  %s687_s3 = int_to_ptr.hbm [resolvable:$true] %s686_s3 }
  0x60   : > { %5246 = dma.hbm_to_vmem [thread:$0]  (!%p6500_p2), %s663_s10, 1536, %s665_s20, %s651_s4, %s9217_s19, %s9217_s19, %s9216_s18  }
  0x61   : > { %5249 = dma.hbm_to_vmem [thread:$0]  (!%p6500_p2), %s687_s3, 1536, %s689_s6, %s675_s7, %s9217_s19, %s9217_s19, %s9216_s18  }
  0x62   : > { %s702_s8 = sand.u32 1, %s6154_s25  }
  0x63   : > { %s5142_s23 = smul.u32 96, %s702_s8  ;;  %s703_s16 = scalar_lea.sflag [#allocation3], %s702_s8 }
  0x65   : > { %s6524_s10 = scalar_lea.vmem [#allocation2], %s5142_s23 }
  0x66   : > { %6113 = dma.done.wait (%p6485_p13), %s703_s16, 1536  }
  0x67   : > { %6115 = vsyncadd (%p6485_p13), %s703_s16, 4294965760  ;;  %s9219_s11 = sadd.s32 4294967295, %s6178_s30   ;;  %s6532_s28 = scalar_lea.vmem [#allocation4], %s5142_s23 }
  0x68   : > { %s712_s12 = sand.u32 1, %s9219_s11  }
  0x69   : > { %s713_s20 = scalar_lea.sflag [#allocation5], %s712_s12 }
  0x6a   : > { %6117 = dma.done.wait (%p6485_p13), %s713_s20, 1536  }
  0x6b   : > { %6119 = vsyncadd (%p6485_p13), %s713_s20, 4294965760 }
  0x6c   : > { %6121 = dma.done.wait (%p6349_p1), [#allocation5], 1536  }
  0x6d   : > { %6123 = vsyncadd (%p6349_p1), [#allocation5], 4294965760 }
  0x6e   : > { %6125 = dma.done.wait (%p6349_p1), [#allocation8], 2176  }
  0x6f   : > { %6127 = vsyncadd (%p6349_p1), [#allocation8], 4294965120 }
  0x70   : > { %6129 = dma.done.wait (%p6349_p1), [#allocation11], 1024  }
  0x71   : > { %6131 = vsyncadd (%p6349_p1), [#allocation11], 4294966272 }
  0x72   : > { %6133 = dma.done.wait (%p6349_p1), [#allocation14], 512  }
  0x73   : > { %6135 = vsyncadd (%p6349_p1), [#allocation14], 4294966784 }
  0x74   : > { %6137 = dma.done.wait (%p6349_p1), [#allocation17], 2304  }
  0x75   : > { %6139 = vsyncadd (%p6349_p1), [#allocation17], 4294964992 }
  0x76   : > { %6141 = dma.done.wait (%p6349_p1), [#allocation20], 1152  }
  0x77   : > { %6143 = vsyncadd (%p6349_p1), [#allocation20], 4294966144 }
  0x78   : > { %6145 = dma.done.wait (%p6349_p1), [#allocation23], 384  }
  0x79   : > { %6147 = vsyncadd (%p6349_p1), [#allocation23], 4294966912  ;;  %v951_v0 = vld [vmem:[#allocation6 + $0x58] sm:$0xff]  ;;  %v950_v1 = vld [vmem:[#allocation6 + $0x50] sm:$0xff]  ;;  %vm904_vm0 = vcmask 785408   ;;  %s6194_s9 = smov 86  }
  0x7a   : > { %1183 = vmatpush.msra.mxu0 %v951_v0  ;;  %v949_v2 = vld [vmem:[#allocation6 + $0x48] sm:$0xff]  ;;  %v948_v3 = vld [vmem:[#allocation6 + $0x40] sm:$0xff]  ;;  %v947_v4 = vld [vmem:[#allocation6 + $0x38] sm:$0xff]  ;;  %s6195_s15 = smov 44   ;;  %vm1568_vm1 = vcmask 703488   ;;  %s6196_s17 = smov 2  }
  0x7b   : > { %v946_v5 = vld [vmem:[#allocation6 + $0x30] sm:$0xff]  ;;  %v945_v6 = vld [vmem:[#allocation6 + $0x28] sm:$0xff]  ;;  %v944_v7 = vld [vmem:[#allocation6 + $0x20] sm:$0xff]  ;;  %vm1581_vm2 = vcmask 359424   ;;  %s6197_s24 = smov 88   ;;  %vm1594_vm3 = vcmask 15360  }
  0x7c   : > { %1184 = vmatpush.msra.mxu0 %v950_v1  ;;  %v943_v8 = vld [vmem:[#allocation6 + $0x18] sm:$0xff]  ;;  %v942_v9 = vld [vmem:[#allocation6 + $0x10] sm:$0xff]  ;;  %v941_v10 = vld [vmem:[#allocation6 + $0x8] sm:$0xff]  ;;  %vm1607_vm4 = vcmask 719872   ;;  %vm3103_vm5 = vcmask 392192   ;;  %s6198_s1 = smov 38  }
  0x7d   : > { %v940_v11 = vld [vmem:[#allocation6] sm:$0xff]  ;;  %v6572_v13 = vld [vmem:[%s6524_s10 + $0x8] sm:$0xff]  ;;  %v6577_v14 = vld [vmem:[%s6524_s10 + $0x10] sm:$0xff]  ;;  %s6199_s3 = smov 76   ;;  %s6200_s4 = smov 114   ;;  %vm3397_vm6 = vcmask 310272  }
  0x7e   : > { %1185 = vmatpush.msra.mxu0 %v949_v2  ;;  %v6567_v12 = vld [vmem:[%s6524_s10] sm:$0xff]  ;;  %v6582_v15 = vld [vmem:[%s6524_s10 + $0x18] sm:$0xff]  ;;  %v6592_v17 = vld [vmem:[%s6524_s10 + $0x28] sm:$0xff]  ;;  %v964_v46 = vmul.f32 %v6572_v13, %v6572_v13  ;;  %v965_v48 = vmul.f32 %v6577_v14, %v6577_v14  ;;  %s6201_s18 = smov 24   ;;  %vm3404_vm7 = vcmask 621568   ;;  %vm3411_vm8 = vcmask 932864  }
  0x7f   : > { %v6587_v16 = vld [vmem:[%s6524_s10 + $0x20] sm:$0xff]  ;;  %v6597_v18 = vld [vmem:[%s6524_s10 + $0x30] sm:$0xff]  ;;  %v6602_v19 = vld [vmem:[%s6524_s10 + $0x38] sm:$0xff]  ;;  %v963_v44 = vmul.f32 %v6567_v12, %v6567_v12  ;;  %v966_v50 = vmul.f32 %v6582_v15, %v6582_v15  ;;  %v968_v54 = vmul.f32 %v6592_v17, %v6592_v17  ;;  %vm3418_vm9 = vcmask 195584   ;;  %s6202_s19 = smov 14   ;;  %s6203_s6 = smov 28  }
  0x80   : > { %1186 = vmatpush.msra.mxu0 %v948_v3  ;;  %v6607_v20 = vld [vmem:[%s6524_s10 + $0x40] sm:$0xff]  ;;  %v6612_v21 = vld [vmem:[%s6524_s10 + $0x48] sm:$0xff]  ;;  %v6617_v22 = vld [vmem:[%s6524_s10 + $0x50] sm:$0xff]  ;;  %v967_v52 = vmul.f32 %v6587_v16, %v6587_v16  ;;  %v969_v56 = vmul.f32 %v6597_v18, %v6597_v18  ;;  %v970_v58 = vmul.f32 %v6602_v19, %v6602_v19  ;;  %s6204_s7 = smov 42   ;;  %s6205_s5 = smov 56   ;;  %vm4089_vm10 = vcmask 228352  }
  0x81   : > { %v6622_v23 = vld [vmem:[%s6524_s10 + $0x58] sm:$0xff]  ;;  %v6627_v24 = vld [vmem:[%s6532_s28] sm:$0xff]  ;;  %v6632_v25 = vld [vmem:[%s6532_s28 + $0x8] sm:$0xff]  ;;  %v971_v61 = vmul.f32 %v6607_v20, %v6607_v20  ;;  %v972_v0 = vmul.f32 %v6612_v21, %v6612_v21  ;;  %v973_v2 = vmul.f32 %v6617_v22, %v6617_v22  ;;  %vm4085_vm11 = vcmask 113664   ;;  %s9274_s16 = sld [smem:[#allocation81_spill]]  ;;  %s6206_s12 = smov 4  }
  0x82   : > { %1187 = vmatpush.msra.mxu0 %v947_v4  ;;  %v6637_v26 = vld [vmem:[%s6532_s28 + $0x10] sm:$0xff]  ;;  %v6642_v27 = vld [vmem:[%s6532_s28 + $0x18] sm:$0xff]  ;;  %v6649_v29 = vld [vmem:[%s6532_s28 + $0x20] sm:$0xff]  ;;  %v974_v4 = vmul.f32 %v6622_v23, %v6622_v23  ;;  %vm1941_vm12 = vcmask 343040   ;;  %vm4096_vm13 = vcmask 457728   ;;  %vm4345_vm14 = vcmask 1043456  }
  0x83   : > { %v6656_v31 = vld [vmem:[%s6532_s28 + $0x28] sm:$0xff]  ;;  %v6663_v33 = vld [vmem:[%s6532_s28 + $0x30] sm:$0xff]  ;;  %v6670_v35 = vld [vmem:[%s6532_s28 + $0x38] sm:$0xff]  ;;  %vm4358_vm15 = vcmask 97280   ;;  %s9275_s20 = sld [smem:[#allocation34_spill]] }
  0x84   : > { %1188 = vmatpush.msra.mxu0 %v946_v5  ;;  %v6677_v37 = vld [vmem:[%s6532_s28 + $0x40] sm:$0xff]  ;;  %v6684_v39 = vld [vmem:[%s6532_s28 + $0x48] sm:$0xff]  ;;  %v6691_v41 = vld [vmem:[%s6532_s28 + $0x50] sm:$0xff]  ;;  %s9276_s27 = sld [smem:[#allocation33_spill]] }
  0x85   : > { %v6698_v43 = vld [vmem:[%s6532_s28 + $0x58] sm:$0xff]  ;;  %s9277_s23 = sld [smem:[#allocation83_spill]] }
  0x86   : > { %1189 = vmatpush.msra.mxu0 %v945_v6 }
  0x88   : > { %1190 = vmatpush.msra.mxu0 %v944_v7  ;;  %v975_v7 = vmul.f32 %v6627_v24, %v6627_v24 }
  0x89   : > { %p842_p1 = scmp.lt.s32.totalorder %s9275_s20, 1 }
  0x8a   : > { %1191 = vmatpush.msra.mxu0 %v943_v8  ;;  %p844_p3 = scmp.lt.s32.totalorder %s9276_s27, 2 }
  0x8b   : > { %s9401_s20 = smov (!%p842_p1, %s9275_s20), 1 }
  0x8c   : > { %1192 = vmatpush.msra.mxu0 %v942_v9  ;;  %s9403_s27 = smov (!%p844_p3, %s9276_s27), 2 }
  0x8e   : > { %1193 = vmatpush.msra.mxu0 %v941_v10  ;;  %v976_v10 = vmul.f32 %v6632_v25, %v6632_v25 }
  0x90   : > { %1194 = vmatpush.msra.mxu0 %v940_v11 }
  0x91   : > { %4886 = vmatmul.msk.f32.vlgmr.msra.gmra.mxu0 %vm904_vm0, %v6567_v12 }
  0x99   : > { %4887 = vmatmul.msk.f32.gmra.mxu0 %vm904_vm0, %v6572_v13 }
  0xa1   : > { %4888 = vmatmul.msk.f32.gmra.mxu0 %vm904_vm0, %v6577_v14 }
  0xa9   : > { %4889 = vmatmul.msk.f32.gmra.mxu0 %vm904_vm0, %v6582_v15 }
  0xb1   : > { %4890 = vmatmul.msk.f32.gmra.mxu0 %vm904_vm0, %v6587_v16 }
  0xb9   : > { %4891 = vmatmul.msk.f32.gmra.mxu0 %vm904_vm0, %v6592_v17 }
  0xc1   : > { %4892 = vmatmul.msk.f32.gmra.mxu0 %vm904_vm0, %v6597_v18 }
  0xc9   : > { %4893 = vmatmul.msk.f32.gmra.mxu0 %vm904_vm0, %v6602_v19 }
  0xd1   : > { %4894 = vmatmul.msk.f32.gmra.mxu0 %vm904_vm0, %v6607_v20 }
  0xd9   : > { %4895 = vmatmul.msk.f32.gmra.mxu0 %vm904_vm0, %v6612_v21 }
  0xe1   : > { %4896 = vmatmul.msk.f32.gmra.mxu0 %vm904_vm0, %v6617_v22 }
  0xe9   : > { %4897 = vmatmul.msk.f32.gmra.mxu0 %vm904_vm0, %v6622_v23 }
  0xf1   : > { %4898 = vmatmul.msk.f32.gmra.mxu0 %vm904_vm0, %v6627_v24 }
  0xf9   : > { %4899 = vmatmul.msk.f32.gmra.mxu0 %vm904_vm0, %v6632_v25 }
 0x101   : > { %4900 = vmatmul.msk.f32.gmra.mxu0 %vm904_vm0, %v6637_v26 }
 0x109   : > { %4901 = vmatmul.msk.f32.gmra.mxu0 %vm904_vm0, %v6642_v27 }
 0x10e   : > { %v6646_v28 = vpop.f32.mrf.mxu0 }
 0x111   : > { %4902 = vmatmul.msk.f32.gmra.mxu0 %vm904_vm0, %v6649_v29 }
 0x116   : > { %v6653_v30 = vpop.f32.mrf.mxu0 }
 0x119   : > { %4903 = vmatmul.msk.f32.gmra.mxu0 %vm904_vm0, %v6656_v31 }
 0x11e   : > { %v6660_v32 = vpop.f32.mrf.mxu0 }
 0x121   : > { %4904 = vmatmul.msk.f32.gmra.mxu0 %vm904_vm0, %v6663_v33 }
 0x126   : > { %v6667_v34 = vpop.f32.mrf.mxu0 }
 0x129   : > { %4905 = vmatmul.msk.f32.gmra.mxu0 %vm904_vm0, %v6670_v35 }
 0x12e   : > { %v6674_v36 = vpop.f32.mrf.mxu0 }
 0x131   : > { %4906 = vmatmul.msk.f32.gmra.mxu0 %vm904_vm0, %v6677_v37 }
 0x136   : > { %v6681_v38 = vpop.f32.mrf.mxu0 }
 0x139   : > { %4907 = vmatmul.msk.f32.gmra.mxu0 %vm904_vm0, %v6684_v39 }
 0x13e   : > { %v6688_v40 = vpop.f32.mrf.mxu0 }
 0x141   : > { %4908 = vmatmul.msk.f32.gmra.mxu0 %vm904_vm0, %v6691_v41 }
 0x146   : > { %v6695_v42 = vpop.f32.mrf.mxu0 }
 0x149   : > { %4909 = vmatmul.msk.f32.gmra.mxu0 %vm904_vm0, %v6698_v43 }
 0x14e   : > { %v6704_v45 = vpop.f32.mrf.mxu0 }
 0x151   : > { %4910 = vmatmul.msk.f32.gmra.mxu0 %vm904_vm0, %v963_v44  ;;  %v977_v44 = vmul.f32 %v6637_v26, %v6637_v26 }
 0x156   : > { %v6709_v47 = vpop.f32.mrf.mxu0 }
 0x159   : > { %4911 = vmatmul.msk.f32.gmra.mxu0 %vm904_vm0, %v964_v46 }
 0x15e   : > { %v6714_v49 = vpop.f32.mrf.mxu0 }
 0x161   : > { %4912 = vmatmul.msk.f32.gmra.mxu0 %vm904_vm0, %v965_v48  ;;  %v978_v48 = vmul.f32 %v6642_v27, %v6642_v27 }
 0x166   : > { %v6719_v51 = vpop.f32.mrf.mxu0 }
 0x169   : > { %4913 = vmatmul.msk.f32.gmra.mxu0 %vm904_vm0, %v966_v50 }
 0x16e   : > { %v1232_v53 = vpop.f32.mrf.mxu0 }
 0x171   : > { %4914 = vmatmul.msk.f32.gmra.mxu0 %vm904_vm0, %v967_v52 }
 0x176   : > { %v1235_v55 = vpop.f32.mrf.mxu0 }
 0x177   : > { %v5399_v63 = vpack.i.bf16 %v1232_v53, %v1235_v55  ;;  %v979_v53 = vmul.f32 %v6649_v29, %v6649_v29 }
 0x179   : > { %4915 = vmatmul.msk.f32.gmra.mxu0 %vm904_vm0, %v968_v54 }
 0x17e   : > { %v1238_v57 = vpop.f32.mrf.mxu0 }
 0x181   : > { %4916 = vmatmul.msk.f32.gmra.mxu0 %vm904_vm0, %v969_v56  ;;  %v980_v56 = vmul.f32 %v6656_v31, %v6656_v31 }
 0x186   : > { %v1241_v59 = vpop.f32.mrf.mxu0 }
 0x187   : > { %v5394_v60 = vpack.i.bf16 %v1238_v57, %v1241_v59 }
 0x189   : > { %5395 = vrot.lane.b32.xlu2 %v5394_v60, %s6194_s9  ;;  %4917 = vmatmul.msk.f32.gmra.mxu0 %vm904_vm0, %v970_v58  ;;  %v981_v58 = vmul.f32 %v6663_v33, %v6663_v33  ;;  %v982_v60 = vmul.f32 %v6670_v35, %v6670_v35 }
 0x18e   : > { %v1244_v62 = vpop.f32.mrf.mxu0 }
 0x191   : > { %5400 = vrot.lane.b32.xlu2 %v5399_v63, %s6194_s9  ;;  %4918 = vmatmul.msk.f32.gmra.mxu0 %vm904_vm0, %v971_v61 }
 0x196   : > { %v1247_v1 = vpop.f32.mrf.mxu0 }
 0x197   : > { %v5389_v9 = vpack.i.bf16 %v1244_v62, %v1247_v1  ;;  %v983_v62 = vmul.f32 %v6677_v37, %v6677_v37 }
 0x199   : > { %4919 = vmatmul.msk.f32.gmra.mxu0 %vm904_vm0, %v972_v0  ;;  %v984_v0 = vmul.f32 %v6684_v39, %v6684_v39 }
 0x19e   : > { %v1250_v3 = vpop.f32.mrf.mxu0 }
 0x1a1   : > { %4920 = vmatmul.msk.f32.gmra.mxu0 %vm904_vm0, %v973_v2  ;;  %v985_v2 = vmul.f32 %v6691_v41, %v6691_v41 }
 0x1a6   : > { %v1253_v5 = vpop.f32.mrf.mxu0 }
 0x1a7   : > { %v5384_v6 = vpack.i.bf16 %v1250_v3, %v1253_v5 }
 0x1a9   : > { %5385 = vrot.lane.b32.xlu1 %v5384_v6, %s6194_s9  ;;  %4921 = vmatmul.msk.f32.gmra.mxu0 %vm904_vm0, %v974_v4  ;;  %v986_v4 = vmul.f32 %v6698_v43, %v6698_v43 }
 0x1ae   : > { %v1256_v8 = vpop.f32.mrf.mxu0 }
 0x1b1   : > { %5390 = vrot.lane.b32.xlu1 %v5389_v9, %s6194_s9  ;;  %4922 = vmatmul.msk.f32.gmra.mxu0 %vm904_vm0, %v975_v7  ;;  %v987_v7 = vmul.f32 %v6627_v24, %v6567_v12 }
 0x1b6   : > { %v1259_v11 = vpop.f32.mrf.mxu0 }
 0x1b7   : > { %v5379_v55 = vpack.i.bf16 %v1256_v8, %v1259_v11 }
 0x1b9   : > { %4923 = vmatmul.msk.f32.gmra.mxu0 %vm904_vm0, %v976_v10  ;;  %v988_v10 = vmul.f32 %v6632_v25, %v6572_v13 }
 0x1be   : > { %v1262_v46 = vpop.f32.mrf.mxu0 }
 0x1c1   : > { %4924 = vmatmul.msk.f32.gmra.mxu0 %vm904_vm0, %v977_v44 }
 0x1c6   : > { %v1265_v50 = vpop.f32.mrf.mxu0 }
 0x1c7   : > { %v5374_v52 = vpack.i.bf16 %v1262_v46, %v1265_v50  ;;  %v989_v46 = vmul.f32 %v6637_v26, %v6577_v14 }
 0x1c9   : > { %5375 = vrot.lane.b32.xlu0 %v5374_v52, %s6194_s9  ;;  %4925 = vmatmul.msk.f32.gmra.mxu0 %vm904_vm0, %v978_v48  ;;  %v990_v52 = vmul.f32 %v6642_v27, %v6582_v15 }
 0x1ce   : > { %v1268_v54 = vpop.f32.mrf.mxu0 }
 0x1d1   : > { %5380 = vrot.lane.b32.xlu0 %v5379_v55, %s6194_s9  ;;  %4926 = vmatmul.msk.f32.gmra.mxu0 %vm904_vm0, %v979_v53  ;;  %v991_v55 = vmul.f32 %v6649_v29, %v6587_v16  ;;  %s6208_s9 = smov 8  }
 0x1d6   : > { %v1271_v57 = vpop.f32.mrf.mxu0 }
 0x1d7   : > { %v5429_v9 = vpack.i.bf16 %v1268_v54, %v1271_v57 }
 0x1d9   : > { %4927 = vmatmul.msk.f32.gmra.mxu0 %vm904_vm0, %v980_v56 }
 0x1de   : > { %v1274_v59 = vpop.f32.mrf.mxu0 }
 0x1e1   : > { %4928 = vmatmul.msk.f32.gmra.mxu0 %vm904_vm0, %v981_v58  ;;  %v992_v58 = vmul.f32 %v6656_v31, %v6592_v17 }
 0x1e6   : > { %v1277_v61 = vpop.f32.mrf.mxu0 }
 0x1e7   : > { %v5424_v50 = vpack.i.bf16 %v1274_v59, %v1277_v61 }
 0x1e9   : > { %4929 = vmatmul.msk.f32.gmra.mxu0 %vm904_vm0, %v982_v60 }
 0x1ee   : > { %v1280_v63 = vpop.f32.mrf.mxu0 }
 0x1f1   : > { %4930 = vmatmul.msk.f32.gmra.mxu0 %vm904_vm0, %v983_v62 }
 0x1f6   : > { %v1283_v1 = vpop.f32.mrf.mxu0 }
 0x1f7   : > { %v5419_v57 = vpack.i.bf16 %v1280_v63, %v1283_v1  ;;  %v993_v1 = vmul.f32 %v6663_v33, %v6597_v18 }
 0x1f9   : > { %4931 = vmatmul.msk.f32.gmra.mxu0 %vm904_vm0, %v984_v0 }
 0x1fe   : > { %v1286_v3 = vpop.f32.mrf.mxu0 }
 0x201   : > { %4932 = vmatmul.msk.f32.gmra.mxu0 %vm904_vm0, %v985_v2 }
 0x206   : > { %v1289_v5 = vpop.f32.mrf.mxu0 }
 0x207   : > { %v5414_v6 = vpack.i.bf16 %v1286_v3, %v1289_v5 }
 0x209   : > { %4933 = vmatmul.msk.f32.gmra.mxu0 %vm904_vm0, %v986_v4  ;;  %5415 = vrot.lane.b32.xlu2 %v5414_v6, %s6195_s15 }
 0x20e   : > { %v1292_v8 = vpop.f32.mrf.mxu0 }
 0x211   : > { %4934 = vmatmul.msk.f32.gmra.mxu0 %vm904_vm0, %v987_v7  ;;  %5430 = vrot.lane.b32.xlu2 %v5429_v9, %s6195_s15 }
 0x216   : > { %v1295_v11 = vpop.f32.mrf.mxu0 }
 0x217   : > { %v5409_v44 = vpack.i.bf16 %v1292_v8, %v1295_v11  ;;  %v6841_v8 = vpop.permute.xlu2 %5395 }
 0x219   : > { %4935 = vmatmul.msk.f32.gmra.mxu0 %vm904_vm0, %v988_v10  ;;  %5410 = vrot.lane.b32.xlu1 %v5409_v44, %s6195_s15  ;;  %v6964_v44 = vld [vmem:[#allocation7 + $0x8] sm:$0xff] }
 0x21b   : > { %v6822_v0 = vpop.permute.xlu1 %5385 }
 0x21c   : > { %v5387_v9 = vunpack.i.l.bf16 %v6822_v0 }
 0x21e   : > { %v1298_v48 = vpop.f32.mrf.mxu0 }
 0x221   : > { %4936 = vmatmul.msk.f32.gmra.mxu0 %vm904_vm0, %v989_v46  ;;  %5425 = vrot.lane.b32.xlu1 %v5424_v50, %s6195_s15  ;;  %v5388_v46 = vunpack.i.h.bf16 %v6822_v0 }
 0x223   : > { %v6852_v11 = vpop.permute.xlu1 %5390 }
 0x224   : > { %v5392_v50 = vunpack.i.l.bf16 %v6852_v11 }
 0x226   : > { %v1301_v53 = vpop.f32.mrf.mxu0 }
 0x227   : > { %v5404_v54 = vpack.i.bf16 %v1298_v48, %v1301_v53  ;;  %v995_v53 = vmul.f32 %v6677_v37, %v6607_v20 }
 0x229   : > { %4937 = vmatmul.msk.f32.gmra.mxu0 %vm904_vm0, %v990_v52  ;;  %5405 = vrot.lane.b32.xlu0 %v5404_v54, %s6195_s15  ;;  %v5393_v52 = vunpack.i.h.bf16 %v6852_v11  ;;  %v9136_v54 = vunpack.i.l.bf16 %v6841_v8 }
 0x22e   : > { %v6807_v56 = vpop.f32.mrf.mxu0 }
 0x231   : > { %4938 = vmatmul.msk.f32.gmra.mxu0 %vm904_vm0, %v991_v55  ;;  %5420 = vrot.lane.b32.xlu0 %v5419_v57, %s6195_s15  ;;  %v6881_v57 = vpop.permute.xlu2 %5400 }
 0x236   : > { %v6813_v59 = vpop.f32.mrf.mxu0 }
 0x239   : > { %4939 = vmatmul.msk.f32.gmra.mxu0 %vm904_vm0, %v992_v58  ;;  %v9135_v58 = vunpack.i.h.bf16 %v6841_v8 }
 0x23b   : > { %v6818_v61 = vpop.permute.xlu0 %5375 }
 0x23c   : > { %v5378_v62 = vunpack.i.h.bf16 %v6818_v61  ;;  %v5377_v63 = vunpack.i.l.bf16 %v6818_v61 }
 0x23e   : > { %v6826_v2 = vpop.f32.mrf.mxu0  ;;  %v1580_v3 = vsel %vm1568_vm1, %v6719_v51, %v5377_v63  ;;  %v1579_v4 = vsel %vm1568_vm1, %v6714_v49, %v5378_v62  ;;  %v994_v51 = vmul.f32 %v6670_v35, %v6602_v19 }
 0x23f   : > { %1657 = vmatpush.msra.mxu1 %v1580_v3  ;;  %5124 = vmatpush.msra.mxu2 %v1580_v3  ;;  %v9133_v3 = vunpack.i.h.bf16 %v6881_v57 }
 0x241   : > { %4940 = vmatmul.msk.f32.gmra.mxu0 %vm904_vm0, %v993_v1  ;;  %1658 = vmatpush.msra.mxu1 %v1579_v4  ;;  %v9134_v1 = vunpack.i.l.bf16 %v6881_v57 }
 0x242   : > { %5125 = vmatpush.msra.mxu2 %v1579_v4  ;;  %v996_v4 = vmul.f32 %v6684_v39, %v6612_v21 }
 0x243   : > { %v6837_v5 = vpop.permute.xlu0 %5380 }
 0x244   : > { %v5383_v6 = vunpack.i.h.bf16 %v6837_v5  ;;  %v5382_v7 = vunpack.i.l.bf16 %v6837_v5 }
 0x246   : > { %v6846_v10 = vpop.f32.mrf.mxu0  ;;  %v1578_v49 = vsel %vm1568_vm1, %v6709_v47, %v5382_v7  ;;  %v1577_v48 = vsel %vm1568_vm1, %v6704_v45, %v5383_v6  ;;  %v1576_v47 = vsel %vm1568_vm1, %v6695_v42, %v5387_v9  ;;  %v1575_v45 = vsel %vm1568_vm1, %v6688_v40, %v5388_v46 }
 0x247   : > { %1659 = vmatpush.msra.mxu1 %v1578_v49  ;;  %5126 = vmatpush.msra.mxu2 %v1578_v49  ;;  %v1574_v42 = vsel %vm1568_vm1, %v6681_v38, %v5392_v50  ;;  %v1573_v40 = vsel %vm1568_vm1, %v6674_v36, %v5393_v52  ;;  %v1572_v38 = vsel %vm1568_vm1, %v6667_v34, %v9136_v54 }
 0x248   : > { %v1571_v36 = vsel %vm1568_vm1, %v6660_v32, %v9135_v58  ;;  %v1570_v34 = vsel %vm1568_vm1, %v6653_v30, %v9134_v1  ;;  %v1569_v32 = vsel %vm1568_vm1, %v6646_v28, %v9133_v3  ;;  %v998_v30 = vmul.f32 %v6698_v43, %v6622_v23 }
 0x249   : > { %4941 = vmatmul.msk.f32.gmra.mxu0 %vm904_vm0, %v994_v51  ;;  %1660 = vmatpush.msra.mxu1 %v1577_v48 }
 0x24a   : > { %5127 = vmatpush.msra.mxu2 %v1577_v48  ;;  %v997_v48 = vmul.f32 %v6691_v41, %v6617_v22 }
 0x24b   : > { %1661 = vmatpush.msra.mxu1 %v1576_v47 }
 0x24c   : > { %5128 = vmatpush.msra.mxu2 %v1576_v47 }
 0x24d   : > { %1662 = vmatpush.msra.mxu1 %v1575_v45 }
 0x24e   : > { %5129 = vmatpush.msra.mxu2 %v1575_v45  ;;  %v6875_v55 = vpop.f32.mrf.mxu0 }
 0x24f   : > { %1663 = vmatpush.msra.mxu1 %v1574_v42 }
 0x250   : > { %5130 = vmatpush.msra.mxu2 %v1574_v42 }
 0x251   : > { %4942 = vmatmul.msk.f32.gmra.mxu0 %vm904_vm0, %v995_v53  ;;  %1664 = vmatpush.msra.mxu1 %v1573_v40 }
 0x252   : > { %5131 = vmatpush.msra.mxu2 %v1573_v40 }
 0x253   : > { %1665 = vmatpush.msra.mxu1 %v1572_v38 }
 0x254   : > { %5132 = vmatpush.msra.mxu2 %v1572_v38 }
 0x255   : > { %1666 = vmatpush.msra.mxu1 %v1571_v36 }
 0x256   : > { %5133 = vmatpush.msra.mxu2 %v1571_v36  ;;  %v6901_v51 = vpop.f32.mrf.mxu0  ;;  %v6927_v36 = vld [vmem:[#allocation7 + $0x40] sm:$0xff] }
 0x257   : > { %1667 = vmatpush.msra.mxu1 %v1570_v34 }
 0x258   : > { %5134 = vmatpush.msra.mxu2 %v1570_v34  ;;  %v6931_v34 = vld [vmem:[#allocation7 + $0x48] sm:$0xff] }
 0x259   : > { %4943 = vmatmul.msk.f32.gmra.mxu0 %vm904_vm0, %v996_v4  ;;  %1668 = vmatpush.msra.mxu1 %v1569_v32 }
 0x25a   : > { %5135 = vmatpush.msra.mxu2 %v1569_v32 }
 0x25b   : > { %4954 = vmatmul.msk.f32.vlgmr.msra.gmra.mxu2 %vm904_vm0, %v6927_v36 }
 0x25e   : > { %v6916_v47 = vpop.f32.mrf.mxu0 }
 0x261   : > { %4944 = vmatmul.msk.f32.gmra.mxu0 %vm904_vm0, %v997_v48 }
 0x263   : > { %4955 = vmatmul.msk.f32.gmra.mxu2 %vm904_vm0, %v6931_v34  ;;  %v6966_v3 = vpop.permute.xlu2 %5415 }
 0x264   : > { %v9139_v54 = vunpack.i.l.bf16 %v6966_v3 }
 0x266   : > { %v6921_v45 = vpop.f32.mrf.mxu0 }
 0x269   : > { %4945 = vmatmul.msk.f32.gmra.mxu0 %vm904_vm0, %v998_v30  ;;  %v6938_v30 = vld [vmem:[#allocation7 + $0x50] sm:$0x3f] }
 0x26b   : > { %4956 = vmatmul.msk.f32.gmra.mxu2 %vm904_vm0, %v6938_v30 }
 0x26e   : > { %v1328_v28 = vpop.f32.mrf.mxu0 }
 0x276   : > { %v1331_v42 = vpop.f32.mrf.mxu0 }
 0x277   : > { %v5434_v40 = vpack.i.bf16 %v1328_v28, %v1331_v42  ;;  %v6944_v42 = vld [vmem:[#allocation7] sm:$0xff] }
 0x278   : > { %4946 = vmatmul.msk.f32.vlgmr.msra.gmra.mxu1 %vm904_vm0, %v6944_v42 }
 0x279   : > { %5435 = vrot.lane.b32.xlu2 %v5434_v40, %s6196_s17 }
 0x27e   : > { %v1334_v38 = vpop.f32.mrf.mxu0 }
 0x280   : > { %4947 = vmatmul.msk.f32.gmra.mxu1 %vm904_vm0, %v6964_v44 }
 0x286   : > { %v1337_v4 = vpop.f32.mrf.mxu0 }
 0x287   : > { %v5439_v32 = vpack.i.bf16 %v1334_v38, %v1337_v4 }
 0x289   : > { %5440 = vrot.lane.b32.xlu0 %v5439_v32, %s6196_s17 }
 0x28b   : > { %v6950_v38 = vpop.permute.xlu1 %5410 }
 0x28c   : > { %v9138_v53 = vunpack.i.l.bf16 %v6950_v38  ;;  %v9140_v1 = vunpack.i.h.bf16 %v6950_v38 }
 0x28e   : > { %v6936_v48 = vpop.f32.mrf.mxu0  ;;  %v1590_v61 = vsel %vm1581_vm2, %v5383_v6, %v9140_v1 }
 0x296   : > { %v6942_v28 = vpop.f32.mrf.mxu0 }
 0x29b   : > { %v6952_v4 = vpop.permute.xlu0 %5405 }
 0x29c   : > { %v5408_v32 = vunpack.i.h.bf16 %v6952_v4  ;;  %v9137_v60 = vunpack.i.l.bf16 %v6952_v4 }
 0x29e   : > { %v6957_v49 = vpop.f32.mrf.mxu0  ;;  %v1593_v40 = vsel %vm1581_vm2, %v5377_v63, %v9137_v60  ;;  %v1592_v58 = vsel %vm1581_vm2, %v5378_v62, %v5408_v32  ;;  %v1591_v63 = vsel %vm1581_vm2, %v5382_v7, %v9138_v53  ;;  %v9144_v60 = vunpack.i.h.bf16 %v6966_v3  ;;  %v7000_v53 = vpop.permute.xlu1 %5425 }
 0x29f   : > { %1707 = vmatpush.msrb.mxu2 %v1593_v40  ;;  %v1589_v7 = vsel %vm1581_vm2, %v5387_v9, %v9139_v54  ;;  %v9143_v9 = vunpack.i.l.bf16 %v7000_v53  ;;  %v7018_v54 = vpop.permute.xlu2 %5430  ;;  %v9147_v1 = vunpack.i.h.bf16 %v7000_v53 }
 0x2a0   : > { %v9145_v11 = vunpack.i.h.bf16 %v7018_v54 }
 0x2a1   : > { %1708 = vmatpush.msrb.mxu2 %v1592_v58 }
 0x2a3   : > { %v6982_v40 = vpop.permute.xlu0 %5420  ;;  %1709 = vmatpush.msrb.mxu2 %v1591_v63  ;;  %v6998_v63 = vld [vmem:[#allocation7 + $0x10] sm:$0xff] }
 0x2a4   : > { %v9141_v62 = vunpack.i.l.bf16 %v6982_v40  ;;  %4948 = vmatmul.msk.f32.gmra.mxu1 %vm904_vm0, %v6998_v63  ;;  %v9142_v6 = vunpack.i.h.bf16 %v6982_v40 }
 0x2a5   : > { %1710 = vmatpush.msrb.mxu2 %v1590_v61  ;;  %v1588_v61 = vsel %vm1581_vm2, %v5388_v46, %v9144_v60  ;;  %v9146_v46 = vunpack.i.l.bf16 %v7018_v54 }
 0x2a6   : > { %v6991_v58 = vpop.f32.mrf.mxu0  ;;  %v1586_v0 = vsel %vm1581_vm2, %v5393_v52, %v9142_v6  ;;  %v9222_v52 = vunpack.i.h.bf16 %v6841_v8  ;;  %v9223_v6 = vunpack.i.l.bf16 %v6881_v57 }
 0x2a7   : > { %v5479_v5 = vpack.i.bf16 %v6957_v49, %v6991_v58  ;;  %1711 = vmatpush.msrb.mxu2 %v1589_v7  ;;  %v1587_v7 = vsel %vm1581_vm2, %v5392_v50, %v9141_v62  ;;  %v9221_v50 = vunpack.i.l.bf16 %v6841_v8  ;;  %v7056_v8 = vld [vmem:[#allocation7 + $0x20] sm:$0xff]  ;;  %v9229_v49 = vpack.i.bf16 %v6807_v56, %v6813_v59 }
 0x2a9   : > { %1712 = vmatpush.msrb.mxu2 %v1588_v61  ;;  %v1585_v62 = vsel %vm1581_vm2, %v9221_v50, %v9143_v9  ;;  %v1583_v50 = vsel %vm1581_vm2, %v9223_v6, %v9146_v46  ;;  %v9226_v46 = vpack.i.bf16 %v6936_v48, %v6942_v28  ;;  %v2883_v48 = vld [vmem:[#allocation16 + $0x20] sm:$0xff] }
 0x2ab   : > { %1713 = vmatpush.msrb.mxu2 %v1587_v7  ;;  %v7034_v7 = vld [vmem:[#allocation7 + $0x18] sm:$0xff] }
 0x2ac   : > { %4949 = vmatmul.msk.f32.gmra.mxu1 %vm904_vm0, %v7034_v7 }
 0x2ad   : > { %1714 = vmatpush.msrb.mxu2 %v1586_v0  ;;  %v1584_v0 = vsel %vm1581_vm2, %v9222_v52, %v9147_v1  ;;  %v2888_v1 = vld [vmem:[#allocation16 + $0x48] sm:$0xff] }
 0x2ae   : > { %v7027_v61 = vpop.f32.mrf.mxu0 }
 0x2af   : > { %1715 = vmatpush.msrb.mxu2 %v1585_v62  ;;  %v9224_v62 = vunpack.i.h.bf16 %v6881_v57 }
 0x2b1   : > { %1716 = vmatpush.msrb.mxu2 %v1584_v0  ;;  %v1582_v9 = vsel %vm1581_vm2, %v9224_v62, %v9145_v11  ;;  %v7063_v0 = vld [vmem:[#allocation7 + $0x28] sm:$0xff]  ;;  %v9225_v62 = vpack.i.bf16 %v6826_v2, %v6846_v10  ;;  %v2889_v11 = vld [vmem:[#allocation16 + $0x50] sm:$0xff] }
 0x2b2   : > { %v2887_v2 = vld [vmem:[#allocation16 + $0x40] sm:$0xff] }
 0x2b3   : > { %1717 = vmatpush.msrb.mxu2 %v1583_v50 }
 0x2b4   : > { %4950 = vmatmul.msk.f32.gmra.mxu1 %vm904_vm0, %v7056_v8 }
 0x2b5   : > { %1718 = vmatpush.msrb.mxu2 %v1582_v9  ;;  %v7069_v9 = vld [vmem:[#allocation7 + $0x30] sm:$0xff] }
 0x2b6   : > { %v1355_v60 = vpop.f32.mrf.mxu0  ;;  %4957 = vmatmul.msk.f32.vlgmr.msrb.gmra.mxu2 %vm904_vm0, %v6944_v42 }
 0x2b7   : > { %v5469_v52 = vpack.i.bf16 %v7027_v61, %v1355_v60  ;;  %v7076_v61 = vld [vmem:[#allocation7 + $0x38] sm:$0xff] }
 0x2bc   : > { %4951 = vmatmul.msk.f32.gmra.mxu1 %vm904_vm0, %v7063_v0 }
 0x2be   : > { %v1358_v6 = vpop.f32.mrf.mxu0  ;;  %4958 = vmatmul.msk.f32.gmra.mxu2 %vm904_vm0, %v6964_v44 }
 0x2c4   : > { %4952 = vmatmul.msk.f32.gmra.mxu1 %vm904_vm0, %v7069_v9 }
 0x2c6   : > { %v1361_v57 = vpop.f32.mrf.mxu0  ;;  %4959 = vmatmul.msk.f32.gmra.mxu2 %vm904_vm0, %v6998_v63 }
 0x2c7   : > { %v5459_v50 = vpack.i.bf16 %v1358_v6, %v1361_v57  ;;  %v2890_v57 = vld [vmem:[#allocation16 + $0x58] sm:$0xff] }
 0x2c8   : > { %2901 = vmatpush.msra.mxu2 %v2890_v57  ;;  %v2884_v57 = vld [vmem:[#allocation16 + $0x28] sm:$0xff] }
 0x2c9   : > { %5460 = vrot.lane.b32.xlu2 %v5459_v50, %s6197_s24 }
 0x2ca   : > { %2902 = vmatpush.msra.mxu2 %v2889_v11  ;;  %v2879_v11 = vld [vmem:[#allocation16] sm:$0xff] }
 0x2cc   : > { %4953 = vmatmul.msk.f32.gmra.mxu1 %vm904_vm0, %v7076_v61  ;;  %2903 = vmatpush.msra.mxu2 %v2888_v1 }
 0x2ce   : > { %v1364_v60 = vpop.f32.mrf.mxu0  ;;  %4960 = vmatmul.msk.f32.gmra.mxu2 %vm904_vm0, %v7034_v7 }
 0x2cf   : > { %2904 = vmatpush.msra.mxu2 %v2887_v2 }
 0x2d1   : > { %5475 = vrot.lane.b32.xlu2 %v9225_v62, %s6196_s17  ;;  %v2886_v62 = vld [vmem:[#allocation16 + $0x38] sm:$0xff] }
 0x2d2   : > { %2905 = vmatpush.msra.mxu2 %v2886_v62  ;;  %v9230_v62 = vunpack.i.l.bf16 %v6952_v4  ;;  %v9232_v4 = vunpack.i.h.bf16 %v6950_v38 }
 0x2d6   : > { %v1367_v6 = vpop.f32.mrf.mxu0  ;;  %4961 = vmatmul.msk.f32.gmra.mxu2 %vm904_vm0, %v7056_v8 }
 0x2d7   : > { %v5444_v50 = vpack.i.bf16 %v1364_v60, %v1367_v6  ;;  %v2885_v60 = vld [vmem:[#allocation16 + $0x30] sm:$0xff]  ;;  %v9227_v6 = vpack.i.bf16 %v6875_v55, %v6901_v51  ;;  %v2880_v51 = vld [vmem:[#allocation16 + $0x8] sm:$0xff] }
 0x2d8   : > { %2906 = vmatpush.msra.mxu2 %v2885_v60  ;;  %v2881_v55 = vld [vmem:[#allocation16 + $0x10] sm:$0xff] }
 0x2d9   : > { %5445 = vrot.lane.b32.xlu0 %v5444_v50, %s6197_s24  ;;  %5490 = vrot.lane.b32.xlu2 %v9226_v46, %s6197_s24  ;;  %v2882_v46 = vld [vmem:[#allocation16 + $0x18] sm:$0xff]  ;;  %v9228_v50 = vpack.i.bf16 %v6916_v47, %v6921_v45 }
 0x2da   : > { %2907 = vmatpush.msra.mxu2 %v2884_v57 }
 0x2dc   : > { %2908 = vmatpush.msra.mxu2 %v2883_v48 }
 0x2de   : > { %v1370_v10 = vpop.f32.mrf.mxu0  ;;  %4962 = vmatmul.msk.f32.gmra.mxu2 %vm904_vm0, %v7063_v0  ;;  %v7125_v47 = vpop.f32.mrf.mxu2 }
 0x2df   : > { %2909 = vmatpush.msra.mxu2 %v2882_v46 }
 0x2e1   : > { %5465 = vrot.lane.b32.xlu0 %v9227_v6, %s6196_s17  ;;  %2910 = vmatpush.msra.mxu2 %v2881_v55 }
 0x2e3   : > { %2911 = vmatpush.msra.mxu2 %v2880_v51 }
 0x2e5   : > { %2912 = vmatpush.msra.mxu2 %v2879_v11 }
 0x2e6   : > { %v1373_v28 = vpop.f32.mrf.mxu0  ;;  %4963 = vmatmul.msk.f32.gmra.mxu2 %vm904_vm0, %v7069_v9  ;;  %v7129_v45 = vpop.f32.mrf.mxu2 }
 0x2e7   : > { %v5449_v1 = vpack.i.bf16 %v1370_v10, %v1373_v28 }
 0x2e9   : > { %5480 = vrot.lane.b32.xlu0 %v5479_v5, %s6197_s24  ;;  %5450 = vrot.lane.b32.xlu1 %v5449_v1, %s6197_s24 }
 0x2ee   : > { %4964 = vmatmul.msk.f32.gmra.mxu2 %vm904_vm0, %v7076_v61  ;;  %v7135_v56 = vpop.f32.mrf.mxu2 }
 0x2f1   : > { %5455 = vrot.lane.b32.xlu1 %v9228_v50, %s6196_s17 }
 0x2f6   : > { %4965 = vmatmul.msk.f32.gmra.mxu2 %vm904_vm0, %v6927_v36 }
 0x2f9   : > { %5470 = vrot.lane.b32.xlu1 %v5469_v52, %s6197_s24 }
 0x2fe   : > { %4966 = vmatmul.msk.f32.gmra.mxu2 %vm904_vm0, %v6931_v34 }
 0x301   : > { %5485 = vrot.lane.b32.xlu1 %v9229_v49, %s6196_s17 }
 0x306   : > { %4967 = vmatmul.msk.f32.gmra.mxu2 %vm904_vm0, %v6938_v30 }
 0x30e   : > { %4990 = vmatmul.msk.f32.vlgmr.msra.gmra.mxu2 %vm904_vm0, %v6567_v12 }
 0x316   : > { %4991 = vmatmul.msk.f32.gmra.mxu2 %vm904_vm0, %v6572_v13 }
 0x31e   : > { %4992 = vmatmul.msk.f32.gmra.mxu2 %vm904_vm0, %v6577_v14 }
 0x326   : > { %4993 = vmatmul.msk.f32.gmra.mxu2 %vm904_vm0, %v6582_v15  ;;  %v5441_v15 = vpop.permute.xlu0 %5440 }
 0x327   : > { %v5442_v58 = vunpack.i.l.bf16 %v5441_v15  ;;  %v5443_v5 = vunpack.i.h.bf16 %v5441_v15 }
 0x329   : > { %v1605_v48 = vsel %vm1594_vm3, %v5408_v32, %v5443_v5  ;;  %v9233_v5 = vunpack.i.l.bf16 %v6966_v3 }
 0x32e   : > { %4994 = vmatmul.msk.f32.gmra.mxu2 %vm904_vm0, %v6587_v16 }
 0x336   : > { %4995 = vmatmul.msk.f32.gmra.mxu2 %vm904_vm0, %v6592_v17  ;;  %v5436_v17 = vpop.permute.xlu2 %5435 }
 0x337   : > { %v5437_v10 = vunpack.i.l.bf16 %v5436_v17  ;;  %v5438_v6 = vunpack.i.h.bf16 %v5436_v17 }
 0x339   : > { %v7139_v12 = vpop.f32.mrf.mxu2  ;;  %v1603_v32 = vsel %vm1594_vm3, %v9232_v4, %v5438_v6 }
 0x33e   : > { %4996 = vmatmul.msk.f32.gmra.mxu2 %vm904_vm0, %v6597_v18  ;;  %v5461_v57 = vpop.permute.xlu2 %5460 }
 0x33f   : > { %v5462_v50 = vunpack.i.l.bf16 %v5461_v57 }
 0x341   : > { %v7143_v13 = vpop.f32.mrf.mxu2 }
 0x346   : > { %4997 = vmatmul.msk.f32.gmra.mxu2 %vm904_vm0, %v6602_v19 }
 0x349   : > { %v7147_v14 = vpop.f32.mrf.mxu2 }
 0x34b   : > { %v5446_v59 = vpop.permute.xlu0 %5445 }
 0x34c   : > { %v5447_v60 = vunpack.i.l.bf16 %v5446_v59  ;;  %v5448_v28 = vunpack.i.h.bf16 %v5446_v59 }
 0x34e   : > { %4998 = vmatmul.msk.f32.gmra.mxu2 %vm904_vm0, %v6607_v20  ;;  %v1606_v20 = vsel %vm1594_vm3, %v9230_v62, %v5442_v58  ;;  %v1616_v59 = vsel %vm1607_vm4, %v1603_v32, %v5448_v28  ;;  %v5463_v58 = vunpack.i.h.bf16 %v5461_v57 }
 0x351   : > { %v7151_v16 = vpop.f32.mrf.mxu2 }
 0x353   : > { %v5466_v46 = vpop.permute.xlu0 %5465 }
 0x354   : > { %v5467_v62 = vunpack.i.l.bf16 %v5466_v46 }
 0x356   : > { %4999 = vmatmul.msk.f32.gmra.mxu2 %vm904_vm0, %v6612_v21 }
 0x359   : > { %v7155_v18 = vpop.f32.mrf.mxu2 }
 0x35b   : > { %v5451_v52 = vpop.permute.xlu1 %5450 }
 0x35c   : > { %v5453_v2 = vunpack.i.h.bf16 %v5451_v52  ;;  %v5452_v19 = vunpack.i.l.bf16 %v5451_v52 }
 0x35e   : > { %5000 = vmatmul.msk.f32.gmra.mxu2 %vm904_vm0, %v6617_v22  ;;  %v1619_v21 = vsel %vm1607_vm4, %v1606_v20, %v5452_v19  ;;  %1807 = vmatpush.msrb.mxu1 %v5452_v19  ;;  %v1618_v1 = vsel %vm1607_vm4, %v1605_v48, %v5453_v2  ;;  %v9231_v22 = vunpack.i.l.bf16 %v6950_v38 }
 0x35f   : > { %1757 = vmatpush.msra.mxu3 %v1619_v21  ;;  %v5481_v21 = vpop.permute.xlu0 %5480 }
 0x360   : > { %1808 = vmatpush.msrb.mxu1 %v5453_v2  ;;  %v1604_v51 = vsel %vm1594_vm3, %v9231_v22, %v5437_v10  ;;  %v9234_v2 = vunpack.i.h.bf16 %v6966_v3  ;;  %v5476_v10 = vpop.permute.xlu2 %5475  ;;  %v5483_v4 = vunpack.i.h.bf16 %v5481_v21 }
 0x361   : > { %v7167_v55 = vpop.f32.mrf.mxu2  ;;  %1758 = vmatpush.msra.mxu3 %v1618_v1  ;;  %v1617_v11 = vsel %vm1607_vm4, %v1604_v51, %v5447_v60  ;;  %v5477_v3 = vunpack.i.l.bf16 %v5476_v10  ;;  %v5482_v51 = vunpack.i.l.bf16 %v5481_v21 }
 0x362   : > { %1809 = vmatpush.msrb.mxu1 %v5447_v60 }
 0x363   : > { %v5456_v49 = vpop.permute.xlu1 %5455  ;;  %1759 = vmatpush.msra.mxu3 %v1617_v11  ;;  %v5478_v11 = vunpack.i.h.bf16 %v5476_v10  ;;  %v9239_v10 = vunpack.i.l.bf16 %v7018_v54 }
 0x364   : > { %v5458_v15 = vunpack.i.h.bf16 %v5456_v49  ;;  %v5457_v17 = vunpack.i.l.bf16 %v5456_v49  ;;  %1810 = vmatpush.msrb.mxu1 %v5448_v28  ;;  %v9235_v28 = vunpack.i.l.bf16 %v6982_v40 }
 0x365   : > { %1760 = vmatpush.msra.mxu3 %v1616_v59 }
 0x366   : > { %5001 = vmatmul.msk.f32.gmra.mxu2 %vm904_vm0, %v6622_v23  ;;  %v1602_v52 = vsel %vm1594_vm3, %v9233_v5, %v5457_v17  ;;  %v1601_v38 = vsel %vm1594_vm3, %v9234_v2, %v5458_v15  ;;  %1811 = vmatpush.msrb.mxu1 %v5462_v50  ;;  %v5468_v23 = vunpack.i.h.bf16 %v5466_v46  ;;  %v1600_v1 = vsel %vm1594_vm3, %v9235_v28, %v5467_v62  ;;  %v2894_v28 = vld [vmem:[#allocation18 + $0x18] sm:$0xff] }
 0x367   : > { %v1615_v19 = vsel %vm1607_vm4, %v1602_v52, %v5462_v50  ;;  %v1614_v60 = vsel %vm1607_vm4, %v1601_v38, %v5463_v58  ;;  %v9236_v46 = vunpack.i.h.bf16 %v6982_v40  ;;  %v9237_v17 = vunpack.i.l.bf16 %v7000_v53 }
 0x368   : > { %1761 = vmatpush.msra.mxu3 %v1615_v19  ;;  %1812 = vmatpush.msrb.mxu1 %v5463_v58  ;;  %v5491_v32 = vpop.permute.xlu2 %5490  ;;  %v9238_v40 = vunpack.i.h.bf16 %v7000_v53  ;;  %v9240_v53 = vunpack.i.h.bf16 %v7018_v54 }
 0x369   : > { %v7186_v20 = vpop.f32.mrf.mxu2  ;;  %v1599_v50 = vsel %vm1594_vm3, %v9236_v46, %v5468_v23  ;;  %v5492_v19 = vunpack.i.l.bf16 %v5491_v32 }
 0x36a   : > { %1762 = vmatpush.msra.mxu3 %v1614_v60  ;;  %v1597_v5 = vsel %vm1594_vm3, %v9238_v40, %v5478_v11  ;;  %v5493_v60 = vunpack.i.h.bf16 %v5491_v32  ;;  %v3079_v40 = vld [vmem:[#allocation9 + $0x28] sm:$0xff] }
 0x36b   : > { %v5471_v6 = vpop.permute.xlu1 %5470  ;;  %v1610_v38 = vsel %vm1607_vm4, %v1597_v5, %v5483_v4 }
 0x36c   : > { %v5472_v57 = vunpack.i.l.bf16 %v5471_v6  ;;  %v5473_v48 = vunpack.i.h.bf16 %v5471_v6 }
 0x36e   : > { %1813 = vmatpush.msrb.mxu1 %v5472_v57  ;;  %5002 = vmatmul.msk.f32.gmra.mxu2 %vm904_vm0, %v6627_v24  ;;  %v1613_v22 = vsel %vm1607_vm4, %v1600_v1, %v5472_v57  ;;  %v1612_v49 = vsel %vm1607_vm4, %v1599_v50, %v5473_v48  ;;  %v1598_v24 = vsel %vm1594_vm3, %v9237_v17, %v5477_v3  ;;  %v2895_v1 = vld [vmem:[#allocation18 + $0x20] sm:$0xff] }
 0x36f   : > { %1763 = vmatpush.msra.mxu3 %v1613_v22  ;;  %v1611_v59 = vsel %vm1607_vm4, %v1598_v24, %v5482_v51 }
 0x370   : > { %1814 = vmatpush.msrb.mxu1 %v5473_v48  ;;  %v2893_v48 = vld [vmem:[#allocation18 + $0x10] sm:$0xff] }
 0x371   : > { %v7199_v15 = vpop.f32.mrf.mxu2  ;;  %1764 = vmatpush.msra.mxu3 %v1612_v49 }
 0x372   : > { %1815 = vmatpush.msrb.mxu1 %v5482_v51  ;;  %v2896_v51 = vld [vmem:[#allocation18 + $0x28] sm:$0xff] }
 0x373   : > { %v5486_v58 = vpop.permute.xlu1 %5485  ;;  %1765 = vmatpush.msra.mxu3 %v1611_v59 }
 0x374   : > { %v5488_v52 = vunpack.i.h.bf16 %v5486_v58  ;;  %v5487_v2 = vunpack.i.l.bf16 %v5486_v58  ;;  %1816 = vmatpush.msrb.mxu1 %v5483_v4  ;;  %v7309_v58 = vpop.f32.mrf.mxu1 }
 0x375   : > { %1766 = vmatpush.msra.mxu3 %v1610_v38  ;;  %v3076_v38 = vld [vmem:[#allocation9 + $0x10] sm:$0xff] }
 0x376   : > { %1817 = vmatpush.msrb.mxu1 %v5492_v19  ;;  %5003 = vmatmul.msk.f32.gmra.mxu2 %vm904_vm0, %v6632_v25  ;;  %v1596_v62 = vsel %vm1594_vm3, %v9239_v10, %v5487_v2  ;;  %v1595_v23 = vsel %vm1594_vm3, %v9240_v53, %v5488_v52  ;;  %v3078_v52 = vld [vmem:[#allocation9 + $0x20] sm:$0xff]  ;;  %v3077_v2 = vld [vmem:[#allocation9 + $0x18] sm:$0xff] }
 0x377   : > { %v1609_v21 = vsel %vm1607_vm4, %v1596_v62, %v5492_v19  ;;  %v1608_v57 = vsel %vm1607_vm4, %v1595_v23, %v5493_v60  ;;  %v3075_v19 = vld [vmem:[#allocation9 + $0x8] sm:$0xff]  ;;  %vm4464_vm4 = vcmask 31744  }
 0x378   : > { %1767 = vmatpush.msra.mxu3 %v1609_v21  ;;  %1818 = vmatpush.msrb.mxu1 %v5493_v60  ;;  %v3074_v60 = vld [vmem:[#allocation9] sm:$0xff] }
 0x379   : > { %v7218_v6 = vpop.f32.mrf.mxu2  ;;  %4979 = vmatmul.msk.f32.vlgmr.msrb.gmra.mxu1 %vm904_vm0, %v6944_v42 }
 0x37a   : > { %1768 = vmatpush.msra.mxu3 %v1608_v57  ;;  %3204 = vmatpush.msra.mxu1 %v3079_v40 }
 0x37b   : > { %4968 = vmatmul.msk.f32.vlgmr.msra.gmra.mxu3 %vm904_vm0, %v6944_v42 }
 0x37c   : > { %3205 = vmatpush.msra.mxu1 %v3078_v52  ;;  %v7316_v62 = vpop.f32.mrf.mxu1 }
 0x37e   : > { %5004 = vmatmul.msk.f32.gmra.mxu2 %vm904_vm0, %v6637_v26  ;;  %3206 = vmatpush.msra.mxu1 %v3077_v2 }
 0x380   : > { %3207 = vmatpush.msra.mxu1 %v3076_v38 }
 0x381   : > { %v7227_v25 = vpop.f32.mrf.mxu2  ;;  %4980 = vmatmul.msk.f32.gmra.mxu1 %vm904_vm0, %v6964_v44 }
 0x382   : > { %9241 = vst [vmem:[#allocation37_spill] sm:$0xff] %v7227_v25  ;;  %3208 = vmatpush.msra.mxu1 %v3075_v19 }
 0x383   : > { %4969 = vmatmul.msk.f32.gmra.mxu3 %vm904_vm0, %v6964_v44 }
 0x384   : > { %3209 = vmatpush.msra.mxu1 %v3074_v60  ;;  %v7321_v23 = vpop.f32.mrf.mxu1 }
 0x386   : > { %5005 = vmatmul.msk.f32.gmra.mxu2 %vm904_vm0, %v6642_v27 }
 0x389   : > { %v7235_v54 = vpop.f32.mrf.mxu2  ;;  %4981 = vmatmul.msk.f32.gmra.mxu1 %vm904_vm0, %v6998_v63 }
 0x38b   : > { %4970 = vmatmul.msk.f32.gmra.mxu3 %vm904_vm0, %v6998_v63 }
 0x38c   : > { %v7326_v57 = vpop.f32.mrf.mxu1 }
 0x38e   : > { %5006 = vmatmul.msk.f32.gmra.mxu2 %vm904_vm0, %v6649_v29 }
 0x391   : > { %v2914_v26 = vpop.f32.mrf.mxu2  ;;  %4982 = vmatmul.msk.f32.gmra.mxu1 %vm904_vm0, %v7034_v7 }
 0x393   : > { %4971 = vmatmul.msk.f32.gmra.mxu3 %vm904_vm0, %v7034_v7 }
 0x396   : > { %5007 = vmatmul.msk.f32.gmra.mxu2 %vm904_vm0, %v6656_v31 }
 0x399   : > { %v2917_v27 = vpop.f32.mrf.mxu2  ;;  %4983 = vmatmul.msk.f32.gmra.mxu1 %vm904_vm0, %v7056_v8 }
 0x39b   : > { %4972 = vmatmul.msk.f32.gmra.mxu3 %vm904_vm0, %v7056_v8  ;;  %v2891_v8 = vld [vmem:[#allocation18] sm:$0xff] }
 0x39e   : > { %5008 = vmatmul.msk.f32.gmra.mxu2 %vm904_vm0, %v6663_v33 }
 0x3a1   : > { %v2920_v29 = vpop.f32.mrf.mxu2  ;;  %4984 = vmatmul.msk.f32.gmra.mxu1 %vm904_vm0, %v7063_v0 }
 0x3a3   : > { %4973 = vmatmul.msk.f32.gmra.mxu3 %vm904_vm0, %v7063_v0 }
 0x3a6   : > { %5009 = vmatmul.msk.f32.gmra.mxu2 %vm904_vm0, %v6670_v35 }
 0x3a9   : > { %v2923_v31 = vpop.f32.mrf.mxu2  ;;  %4985 = vmatmul.msk.f32.gmra.mxu1 %vm904_vm0, %v7069_v9 }
 0x3ab   : > { %4974 = vmatmul.msk.f32.gmra.mxu3 %vm904_vm0, %v7069_v9  ;;  %v2892_v9 = vld [vmem:[#allocation18 + $0x8] sm:$0xff] }
 0x3ae   : > { %5010 = vmatmul.msk.f32.gmra.mxu2 %vm904_vm0, %v6677_v37 }
 0x3b1   : > { %v2926_v33 = vpop.f32.mrf.mxu2  ;;  %4986 = vmatmul.msk.f32.gmra.mxu1 %vm904_vm0, %v7076_v61 }
 0x3b3   : > { %4975 = vmatmul.msk.f32.gmra.mxu3 %vm904_vm0, %v7076_v61 }
 0x3b6   : > { %5011 = vmatmul.msk.f32.gmra.mxu2 %vm904_vm0, %v6684_v39 }
 0x3b9   : > { %v2929_v35 = vpop.f32.mrf.mxu2  ;;  %4987 = vmatmul.msk.f32.gmra.mxu1 %vm904_vm0, %v6927_v36 }
 0x3bb   : > { %4976 = vmatmul.msk.f32.gmra.mxu3 %vm904_vm0, %v6927_v36 }
 0x3be   : > { %5012 = vmatmul.msk.f32.gmra.mxu2 %vm904_vm0, %v6691_v41 }
 0x3c1   : > { %v2932_v37 = vpop.f32.mrf.mxu2  ;;  %4988 = vmatmul.msk.f32.gmra.mxu1 %vm904_vm0, %v6931_v34 }
 0x3c3   : > { %4977 = vmatmul.msk.f32.gmra.mxu3 %vm904_vm0, %v6931_v34 }
 0x3c6   : > { %5013 = vmatmul.msk.f32.gmra.mxu2 %vm904_vm0, %v6698_v43 }
 0x3c9   : > { %v2935_v39 = vpop.f32.mrf.mxu2  ;;  %4989 = vmatmul.msk.f32.gmra.mxu1 %vm904_vm0, %v6938_v30 }
 0x3cb   : > { %4978 = vmatmul.msk.f32.gmra.mxu3 %vm904_vm0, %v6938_v30 }
 0x3d1   : > { %v2938_v44 = vpop.f32.mrf.mxu2 }
 0x3d9   : > { %v2941_v36 = vpop.f32.mrf.mxu2 }
 0x3e1   : > { %v2944_v41 = vpop.f32.mrf.mxu2 }
 0x3e9   : > { %v2947_v42 = vpop.f32.mrf.mxu2 }
 0x3ea   : > { %3008 = vmatpush.msrb.mxu3 %v2947_v42 }
 0x3ec   : > { %3009 = vmatpush.msrb.mxu3 %v2944_v41 }
 0x3ee   : > { %3010 = vmatpush.msrb.mxu3 %v2941_v36 }
 0x3f0   : > { %3011 = vmatpush.msrb.mxu3 %v2938_v44 }
 0x3f1   : > { %v2950_v63 = vpop.f32.mrf.mxu2 }
 0x3f2   : > { %3012 = vmatpush.msrb.mxu3 %v2935_v39 }
 0x3f4   : > { %3013 = vmatpush.msrb.mxu3 %v2932_v37 }
 0x3f6   : > { %3014 = vmatpush.msrb.mxu3 %v2929_v35 }
 0x3f8   : > { %3015 = vmatpush.msrb.mxu3 %v2926_v33 }
 0x3f9   : > { %v2953_v43 = vpop.f32.mrf.mxu2 }
 0x3fa   : > { %3016 = vmatpush.msrb.mxu3 %v2923_v31 }
 0x3fc   : > { %3017 = vmatpush.msrb.mxu3 %v2920_v29 }
 0x3fe   : > { %3018 = vmatpush.msrb.mxu3 %v2917_v27  ;;  %v7295_v46 = vpop.f32.mrf.mxu3  ;;  %v7331_v27 = vpop.f32.mrf.mxu1 }
 0x3ff   : > { %9242 = vst [vmem:[#allocation38_spill] sm:$0xff] %v7295_v46 }
 0x400   : > { %3019 = vmatpush.msrb.mxu3 %v2914_v26 }
 0x401   : > { %v2956_v34 = vpop.f32.mrf.mxu2  ;;  %5014 = vmatmul.msk.f32.vlgmr.msrb.gmra.mxu3 %vm904_vm0, %v2891_v8 }
 0x406   : > { %v7297_v49 = vpop.f32.mrf.mxu3  ;;  %v7337_v31 = vpop.f32.mrf.mxu1 }
 0x407   : > { %9243 = vst [vmem:[#allocation39_spill] sm:$0xff] %v7297_v49 }
 0x409   : > { %v2959_v30 = vpop.f32.mrf.mxu2  ;;  %5015 = vmatmul.msk.f32.gmra.mxu3 %vm904_vm0, %v2892_v9 }
 0x40e   : > { %v7299_v32 = vpop.f32.mrf.mxu3  ;;  %v7343_v35 = vpop.f32.mrf.mxu1 }
 0x411   : > { %v2962_v7 = vpop.f32.mrf.mxu2  ;;  %5016 = vmatmul.msk.f32.gmra.mxu3 %vm904_vm0, %v2893_v48 }
 0x416   : > { %v7301_v17 = vpop.f32.mrf.mxu3  ;;  %v7353_v44 = vpop.f32.mrf.mxu1 }
 0x417   : > { %9244 = vst [vmem:[#allocation40_spill] sm:$0xff] %v7301_v17 }
 0x419   : > { %v2965_v0 = vpop.f32.mrf.mxu2  ;;  %5017 = vmatmul.msk.f32.gmra.mxu3 %vm904_vm0, %v2894_v28 }
 0x41e   : > { %v7303_v24 = vpop.f32.mrf.mxu3  ;;  %v7359_v41 = vpop.f32.mrf.mxu1 }
 0x41f   : > { %9245 = vst [vmem:[#allocation41_spill] sm:$0xff] %v7303_v24 }
 0x420   : > { %9252 = vst [vmem:[#allocation48_spill] sm:$0xff] %v7359_v41 }
 0x421   : > { %v2968_v61 = vpop.f32.mrf.mxu2  ;;  %5018 = vmatmul.msk.f32.gmra.mxu3 %vm904_vm0, %v2895_v1 }
 0x426   : > { %v7306_v59 = vpop.f32.mrf.mxu3 }
 0x427   : > { %9246 = vst [vmem:[#allocation42_spill] sm:$0xff] %v7306_v59 }
 0x429   : > { %v2971_v3 = vpop.f32.mrf.mxu2  ;;  %5019 = vmatmul.msk.f32.gmra.mxu3 %vm904_vm0, %v2896_v51 }
 0x42e   : > { %v7311_v5 = vpop.f32.mrf.mxu3 }
 0x42f   : > { %9247 = vst [vmem:[#allocation43_spill] sm:$0xff] %v7311_v5 }
 0x431   : > { %v2974_v22 = vpop.f32.mrf.mxu2 }
 0x436   : > { %v7314_v10 = vpop.f32.mrf.mxu3 }
 0x437   : > { %9248 = vst [vmem:[#allocation44_spill] sm:$0xff] %v7314_v10 }
 0x439   : > { %v2977_v11 = vpop.f32.mrf.mxu2 }
 0x43e   : > { %v7319_v53 = vpop.f32.mrf.mxu3 }
 0x43f   : > { %9249 = vst [vmem:[#allocation45_spill] sm:$0xff] %v7319_v53 }
 0x441   : > { %v2980_v50 = vpop.f32.mrf.mxu2 }
 0x446   : > { %v7324_v21 = vpop.f32.mrf.mxu3 }
 0x447   : > { %9250 = vst [vmem:[#allocation46_spill] sm:$0xff] %v7324_v21 }
 0x449   : > { %v2983_v4 = vpop.f32.mrf.mxu2 }
 0x44a   : > { %3043 = vmatpush.msra.mxu3 %v2983_v4 }
 0x44c   : > { %3044 = vmatpush.msra.mxu3 %v2980_v50 }
 0x44e   : > { %3045 = vmatpush.msra.mxu3 %v2977_v11  ;;  %v7329_v26 = vpop.f32.mrf.mxu3 }
 0x44f   : > { %9251 = vst [vmem:[#allocation47_spill] sm:$0xff] %v7329_v26 }
 0x450   : > { %3046 = vmatpush.msra.mxu3 %v2974_v22 }
 0x452   : > { %3047 = vmatpush.msra.mxu3 %v2971_v3 }
 0x454   : > { %3048 = vmatpush.msra.mxu3 %v2968_v61 }
 0x456   : > { %3049 = vmatpush.msra.mxu3 %v2965_v0 }
 0x458   : > { %3050 = vmatpush.msra.mxu3 %v2962_v7 }
 0x45a   : > { %3051 = vmatpush.msra.mxu3 %v2959_v30 }
 0x45c   : > { %3052 = vmatpush.msra.mxu3 %v2956_v34 }
 0x45e   : > { %3053 = vmatpush.msra.mxu3 %v2953_v43 }
 0x460   : > { %3054 = vmatpush.msra.mxu3 %v2950_v63  ;;  %v7365_v63 = vpop.f32.mrf.mxu1 }
 0x461   : > { %5020 = vmatmul.msk.f32.vlgmr.msra.gmra.mxu3 %vm904_vm0, %v2891_v8  ;;  %9253 = vst [vmem:[#allocation49_spill] sm:$0xff] %v7365_v63 }
 0x468   : > { %v7367_v43 = vpop.f32.mrf.mxu1 }
 0x469   : > { %5021 = vmatmul.msk.f32.gmra.mxu3 %vm904_vm0, %v2892_v9  ;;  %9254 = vst [vmem:[#allocation50_spill] sm:$0xff] %v7367_v43 }
 0x470   : > { %v7369_v34 = vpop.f32.mrf.mxu1 }
 0x471   : > { %5022 = vmatmul.msk.f32.gmra.mxu3 %vm904_vm0, %v2893_v48  ;;  %9255 = vst [vmem:[#allocation51_spill] sm:$0xff] %v7369_v34 }
 0x478   : > { %v7371_v30 = vpop.f32.mrf.mxu1 }
 0x479   : > { %5023 = vmatmul.msk.f32.gmra.mxu3 %vm904_vm0, %v2894_v28  ;;  %9256 = vst [vmem:[#allocation52_spill] sm:$0xff] %v7371_v30 }
 0x480   : > { %v7377_v8 = vpop.f32.mrf.mxu1 }
 0x481   : > { %5024 = vmatmul.msk.f32.gmra.mxu3 %vm904_vm0, %v2895_v1  ;;  %9257 = vst [vmem:[#allocation53_spill] sm:$0xff] %v7377_v8 }
 0x484   : > { %v7333_v29 = vpop.f32.mrf.mxu3 }
 0x485   : > { %5026 = vmatmul.msk.f32.vlgmr.msra.gmra.mxu1 %vm3103_vm5, %v7333_v29  ;;  %v3085_v11 = vmul.f32 %v7333_v29, %v7333_v29 }
 0x488   : > { %v7385_v61 = vpop.f32.mrf.mxu1 }
 0x489   : > { %5025 = vmatmul.msk.f32.gmra.mxu3 %vm904_vm0, %v2896_v51  ;;  %9258 = vst [vmem:[#allocation54_spill] sm:$0xff] %v7385_v61 }
 0x48c   : > { %v7339_v33 = vpop.f32.mrf.mxu3 }
 0x48d   : > { %5027 = vmatmul.msk.f32.gmra.mxu1 %vm3103_vm5, %v7339_v33  ;;  %v3086_v50 = vmul.f32 %v7339_v33, %v7339_v33 }
 0x490   : > { %v7393_v3 = vpop.f32.mrf.mxu1 }
 0x491   : > { %9259 = vst [vmem:[#allocation55_spill] sm:$0xff] %v7393_v3 }
 0x494   : > { %v7345_v37 = vpop.f32.mrf.mxu3 }
 0x495   : > { %5028 = vmatmul.msk.f32.gmra.mxu1 %vm3103_vm5, %v7345_v37  ;;  %v3087_v40 = vmul.f32 %v7345_v37, %v7345_v37 }
 0x498   : > { %v7399_v1 = vpop.f32.mrf.mxu1 }
 0x499   : > { %9260 = vst [vmem:[#allocation56_spill] sm:$0xff] %v7399_v1 }
 0x49c   : > { %v7349_v39 = vpop.f32.mrf.mxu3 }
 0x49d   : > { %5029 = vmatmul.msk.f32.gmra.mxu1 %vm3103_vm5, %v7349_v39  ;;  %v3088_v2 = vmul.f32 %v7349_v39, %v7349_v39 }
 0x4a0   : > { %v7405_v51 = vpop.f32.mrf.mxu1 }
 0x4a1   : > { %9261 = vst [vmem:[#allocation57_spill] sm:$0xff] %v7405_v51 }
 0x4a4   : > { %v7355_v36 = vpop.f32.mrf.mxu3 }
 0x4a5   : > { %5030 = vmatmul.msk.f32.gmra.mxu1 %vm3103_vm5, %v7355_v36  ;;  %v3089_v19 = vmul.f32 %v7355_v36, %v7355_v36 }
 0x4a8   : > { %v7412_v4 = vpop.f32.mrf.mxu1 }
 0x4a9   : > { %9262 = vst [vmem:[#allocation58_spill] sm:$0xff] %v7412_v4 }
 0x4ac   : > { %v7361_v42 = vpop.f32.mrf.mxu3 }
 0x4ad   : > { %5031 = vmatmul.msk.f32.gmra.mxu1 %vm3103_vm5, %v7361_v42 }
 0x4e4   : > { %v7373_v7 = vpop.f32.mrf.mxu3 }
 0x4e5   : > { %5032 = vmatmul.msk.f32.gmra.mxu1 %vm3103_vm5, %v7373_v7  ;;  %v3097_v8 = vmul.f32 %v7373_v7, %v7333_v29 }
 0x4ec   : > { %v7379_v0 = vpop.f32.mrf.mxu3 }
 0x4ed   : > { %5033 = vmatmul.msk.f32.gmra.mxu1 %vm3103_vm5, %v7379_v0  ;;  %v3098_v61 = vmul.f32 %v7379_v0, %v7339_v33 }
 0x4f4   : > { %v7383_v9 = vpop.f32.mrf.mxu3 }
 0x4f5   : > { %5034 = vmatmul.msk.f32.gmra.mxu1 %vm3103_vm5, %v7383_v9  ;;  %v3093_v4 = vmul.f32 %v7383_v9, %v7383_v9  ;;  %v3099_v43 = vmul.f32 %v7383_v9, %v7345_v37 }
 0x4fc   : > { %v7389_v48 = vpop.f32.mrf.mxu3 }
 0x4fd   : > { %5035 = vmatmul.msk.f32.gmra.mxu1 %vm3103_vm5, %v7389_v48  ;;  %v3094_v51 = vmul.f32 %v7389_v48, %v7389_v48 }
 0x502   : > { %v7418_v52 = vpop.f32.mrf.mxu1 }
 0x504   : > { %v7395_v28 = vpop.f32.mrf.mxu3 }
 0x505   : > { %5036 = vmatmul.msk.f32.gmra.mxu1 %vm3103_vm5, %v7395_v28  ;;  %v3095_v1 = vmul.f32 %v7395_v28, %v7395_v28 }
 0x50a   : > { %v7423_v38 = vpop.f32.mrf.mxu1 }
 0x50c   : > { %v7401_v22 = vpop.f32.mrf.mxu3 }
 0x50d   : > { %5037 = vmatmul.msk.f32.gmra.mxu1 %vm3103_vm5, %v7401_v22  ;;  %v3096_v3 = vmul.f32 %v7401_v22, %v7401_v22 }
 0x512   : > { %v7428_v60 = vpop.f32.mrf.mxu1 }
 0x515   : > { %5038 = vmatmul.msk.f32.gmra.mxu1 %vm3103_vm5, %v3085_v11  ;;  %v3090_v11 = vmul.f32 %v7361_v42, %v7361_v42 }
 0x51d   : > { %5039 = vmatmul.msk.f32.gmra.mxu1 %vm3103_vm5, %v3086_v50  ;;  %v3091_v50 = vmul.f32 %v7373_v7, %v7373_v7 }
 0x525   : > { %5040 = vmatmul.msk.f32.gmra.mxu1 %vm3103_vm5, %v3087_v40  ;;  %v7435_v40 = vpop.f32.mrf.mxu1 }
 0x52d   : > { %5041 = vmatmul.msk.f32.gmra.mxu1 %vm3103_vm5, %v3088_v2  ;;  %v3092_v2 = vmul.f32 %v7379_v0, %v7379_v0 }
 0x535   : > { %5042 = vmatmul.msk.f32.gmra.mxu1 %vm3103_vm5, %v3089_v19  ;;  %v7441_v19 = vpop.f32.mrf.mxu1 }
 0x53d   : > { %5043 = vmatmul.msk.f32.gmra.mxu1 %vm3103_vm5, %v3090_v11  ;;  %v7446_v11 = vpop.f32.mrf.mxu1 }
 0x545   : > { %5044 = vmatmul.msk.f32.gmra.mxu1 %vm3103_vm5, %v3091_v50 }
 0x54d   : > { %5045 = vmatmul.msk.f32.gmra.mxu1 %vm3103_vm5, %v3092_v2 }
 0x555   : > { %5046 = vmatmul.msk.f32.gmra.mxu1 %vm3103_vm5, %v3093_v4 }
 0x55d   : > { %5047 = vmatmul.msk.f32.gmra.mxu1 %vm3103_vm5, %v3094_v51 }
 0x562   : > { %v3229_v50 = vpop.f32.mrf.mxu1 }
 0x565   : > { %5048 = vmatmul.msk.f32.gmra.mxu1 %vm3103_vm5, %v3095_v1 }
 0x56a   : > { %v3232_v2 = vpop.f32.mrf.mxu1 }
 0x56d   : > { %5049 = vmatmul.msk.f32.gmra.mxu1 %vm3103_vm5, %v3096_v3 }
 0x572   : > { %v3235_v4 = vpop.f32.mrf.mxu1 }
 0x575   : > { %5050 = vmatmul.msk.f32.gmra.mxu1 %vm3103_vm5, %v3097_v8  ;;  %v3100_v8 = vmul.f32 %v7389_v48, %v7349_v39 }
 0x57a   : > { %v3238_v30 = vpop.f32.mrf.mxu1 }
 0x57b   : > { %v5494_v51 = vpack.i.bf16 %v3235_v4, %v3238_v30  ;;  %v5504_v4 = vpack.i.bf16 %v3229_v50, %v3232_v2 }
 0x57d   : > { %5495 = vrot.lane.b32.xlu0 %v5494_v51, %s6198_s1  ;;  %5051 = vmatmul.msk.f32.gmra.mxu1 %vm3103_vm5, %v3098_v61  ;;  %v3101_v51 = vmul.f32 %v7395_v28, %v7355_v36 }
 0x582   : > { %v3241_v1 = vpop.f32.mrf.mxu1 }
 0x585   : > { %5052 = vmatmul.msk.f32.gmra.mxu1 %vm3103_vm5, %v3099_v43  ;;  %v3102_v43 = vmul.f32 %v7401_v22, %v7361_v42 }
 0x58a   : > { %v3244_v3 = vpop.f32.mrf.mxu1 }
 0x58b   : > { %v5499_v34 = vpack.i.bf16 %v3241_v1, %v3244_v3 }
 0x58d   : > { %5500 = vrot.lane.b32.xlu0 %v5499_v34, %s6198_s1  ;;  %5053 = vmatmul.msk.f32.gmra.mxu1 %vm3103_vm5, %v3100_v8 }
 0x592   : > { %v3247_v30 = vpop.f32.mrf.mxu1 }
 0x595   : > { %5505 = vrot.lane.b32.xlu0 %v5504_v4, %s6198_s1  ;;  %5054 = vmatmul.msk.f32.gmra.mxu1 %vm3103_vm5, %v3101_v51 }
 0x59a   : > { %v3250_v61 = vpop.f32.mrf.mxu1 }
 0x59b   : > { %v5519_v4 = vpack.i.bf16 %v3247_v30, %v3250_v61 }
 0x59d   : > { %5055 = vmatmul.msk.f32.gmra.mxu1 %vm3103_vm5, %v3102_v43 }
 0x5a2   : > { %v3253_v1 = vpop.f32.mrf.mxu1 }
 0x5aa   : > { %v3256_v3 = vpop.f32.mrf.mxu1 }
 0x5ab   : > { %v5509_v41 = vpack.i.bf16 %v3253_v1, %v3256_v3 }
 0x5ad   : > { %5510 = vrot.lane.b32.xlu1 %v5509_v41, %s6199_s3 }
 0x5b2   : > { %v3259_v34 = vpop.f32.mrf.mxu1 }
 0x5ba   : > { %v3262_v50 = vpop.f32.mrf.mxu1 }
 0x5bb   : > { %v5514_v2 = vpack.i.bf16 %v3259_v34, %v3262_v50 }
 0x5bd   : > { %5515 = vrot.lane.b32.xlu1 %v5514_v2, %s6199_s3 }
 0x5c2   : > { %v3265_v8 = vpop.f32.mrf.mxu1 }
 0x5c5   : > { %5520 = vrot.lane.b32.xlu1 %v5519_v4, %s6199_s3 }
 0x5ca   : > { %v3268_v51 = vpop.f32.mrf.mxu1 }
 0x5cb   : > { %v5534_v34 = vpack.i.bf16 %v3265_v8, %v3268_v51 }
 0x5d2   : > { %v3271_v63 = vpop.f32.mrf.mxu1 }
 0x5da   : > { %v3274_v26 = vpop.f32.mrf.mxu1 }
 0x5db   : > { %v5524_v21 = vpack.i.bf16 %v3271_v63, %v3274_v26 }
 0x5dd   : > { %5525 = vrot.lane.b32.xlu2 %v5524_v21, %s6200_s4 }
 0x5e2   : > { %v3277_v43 = vpop.f32.mrf.mxu1 }
 0x5ea   : > { %v3280_v1 = vpop.f32.mrf.mxu1 }
 0x5eb   : > { %v5529_v3 = vpack.i.bf16 %v3277_v43, %v3280_v1 }
 0x5ed   : > { %5530 = vrot.lane.b32.xlu2 %v5529_v3, %s6200_s4 }
 0x5ef   : > { %v5496_v43 = vpop.permute.xlu0 %5495 }
 0x5f0   : > { %v5498_v53 = vunpack.i.h.bf16 %v5496_v43 }
 0x5f2   : > { %v3283_v41 = vpop.f32.mrf.mxu1 }
 0x5f5   : > { %5535 = vrot.lane.b32.xlu2 %v5534_v34, %s6200_s4 }
 0x5fa   : > { %v3286_v50 = vpop.f32.mrf.mxu1 }
 0x5fb   : > { %v5549_v30 = vpack.i.bf16 %v3283_v41, %v3286_v50 }
 0x5fd   : > { %5550 = vrot.lane.b32.xlu2 %v5549_v30, %s6201_s18  ;;  %v5497_v30 = vunpack.i.l.bf16 %v5496_v43 }
 0x5ff   : > { %v5501_v8 = vpop.permute.xlu0 %5500  ;;  %v3401_v43 = vsel %vm3397_vm6, %v7435_v40, %v5497_v30 }
 0x600   : > { %v5502_v41 = vunpack.i.l.bf16 %v5501_v8  ;;  %v5503_v50 = vunpack.i.h.bf16 %v5501_v8 }
 0x602   : > { %v3289_v61 = vpop.f32.mrf.mxu1 }
 0x60a   : > { %v3292_v2 = vpop.f32.mrf.mxu1 }
 0x60b   : > { %v5544_v26 = vpack.i.bf16 %v3289_v61, %v3292_v2  ;;  %v3402_v61 = vsel %vm3397_vm6, %v7441_v19, %v5503_v50 }
 0x60d   : > { %5545 = vrot.lane.b32.xlu1 %v5544_v26, %s6201_s18  ;;  %v3403_v26 = vsel %vm3397_vm6, %v7446_v11, %v5502_v41 }
 0x612   : > { %v3295_v21 = vpop.f32.mrf.mxu1 }
 0x61a   : > { %v3298_v63 = vpop.f32.mrf.mxu1 }
 0x61b   : > { %v5539_v4 = vpack.i.bf16 %v3295_v21, %v3298_v63  ;;  %v5506_v21 = vpop.permute.xlu0 %5505 }
 0x61c   : > { %v5507_v11 = vunpack.i.l.bf16 %v5506_v21  ;;  %v5508_v49 = vunpack.i.h.bf16 %v5506_v21  ;;  %v3080_v21 = vld [vmem:[#allocation10] sm:$0xff] }
 0x61d   : > { %5540 = vrot.lane.b32.xlu0 %v5539_v4, %s6201_s18 }
 0x61e   : > { %v3399_v40 = vsel %vm3397_vm6, %v7423_v38, %v5507_v11  ;;  %v3082_v38 = vld [vmem:[#allocation10 + $0x10] sm:$0xff]  ;;  %v3084_v11 = vld [vmem:[#allocation10 + $0x20] sm:$0x3f] }
 0x61f   : > { %v5511_v1 = vpop.permute.xlu1 %5510 }
 0x620   : > { %v5512_v63 = vunpack.i.l.bf16 %v5511_v1  ;;  %v5513_v24 = vunpack.i.h.bf16 %v5511_v1 }
 0x62f   : > { %v5516_v3 = vpop.permute.xlu1 %5515 }
 0x630   : > { %v5517_v34 = vunpack.i.l.bf16 %v5516_v3  ;;  %v5518_v5 = vunpack.i.h.bf16 %v5516_v3 }
 0x632   : > { %v3410_v4 = vsel %vm3404_vm7, %v3403_v26, %v5517_v34  ;;  %v3409_v59 = vsel %vm3404_vm7, %v3402_v61, %v5518_v5 }
 0x637   : > { %v7484_v51 = vpop.permute.xlu2 %5525  ;;  %v5521_v8 = vpop.permute.xlu1 %5520 }
 0x638   : > { %v5527_v3 = vunpack.i.l.bf16 %v7484_v51  ;;  %v5528_v41 = vunpack.i.h.bf16 %v7484_v51  ;;  %v5522_v26 = vunpack.i.l.bf16 %v5521_v8  ;;  %v5523_v5 = vunpack.i.h.bf16 %v5521_v8  ;;  %v3083_v8 = vld [vmem:[#allocation10 + $0x18] sm:$0xff] }
 0x63a   : > { %v3406_v30 = vsel %vm3404_vm7, %v3399_v40, %v5522_v26 }
 0x647   : > { %v7486_v10 = vpop.permute.xlu2 %5530 }
 0x648   : > { %v5532_v2 = vunpack.i.l.bf16 %v7486_v10  ;;  %v9263_v46 = vunpack.i.h.bf16 %v7486_v10 }
 0x64a   : > { %v3417_v17 = vsel %vm3411_vm8, %v3410_v4, %v5532_v2  ;;  %v3416_v34 = vsel %vm3411_vm8, %v3409_v59, %v9263_v46  ;;  %v3408_v4 = vsel %vm3404_vm7, %v3401_v43, %v5512_v63  ;;  %v3081_v63 = vld [vmem:[#allocation10 + $0x8] sm:$0xff] }
 0x64b   : > { %3450 = vmatpush.msrb.mxu3 %v3417_v17  ;;  %v3415_v19 = vsel %vm3411_vm8, %v3408_v4, %v5527_v3  ;;  %v3400_v17 = vsel %vm3397_vm6, %v7428_v60, %v5498_v53  ;;  %v3398_v53 = vsel %vm3397_vm6, %v7418_v52, %v5508_v49 }
 0x64c   : > { %v3407_v51 = vsel %vm3404_vm7, %v3400_v17, %v5513_v24  ;;  %v3405_v60 = vsel %vm3404_vm7, %v3398_v53, %v5523_v5  ;;  %v9264_v5 = vunpack.i.h.bf16 %v7486_v10  ;;  %v3798_v53 = vld [vmem:[#allocation19 + $0x28] sm:$0xff]  ;;  %v3797_v10 = vld [vmem:[#allocation19 + $0x20] sm:$0xff]  ;;  %vm4470_vm7 = vcmask 64512  }
 0x64d   : > { %3451 = vmatpush.msrb.mxu3 %v3416_v34  ;;  %v3414_v59 = vsel %vm3411_vm8, %v3407_v51, %v5528_v41 }
 0x64f   : > { %v5536_v1 = vpop.permute.xlu2 %5535  ;;  %3452 = vmatpush.msrb.mxu3 %v3415_v19 }
 0x650   : > { %v5538_v50 = vunpack.i.h.bf16 %v5536_v1  ;;  %v5537_v46 = vunpack.i.l.bf16 %v5536_v1 }
 0x651   : > { %3453 = vmatpush.msrb.mxu3 %v3414_v59 }
 0x652   : > { %v3413_v61 = vsel %vm3411_vm8, %v3406_v30, %v5537_v46  ;;  %v3412_v24 = vsel %vm3411_vm8, %v3405_v60, %v5538_v50  ;;  %v3796_v60 = vld [vmem:[#allocation19 + $0x18] sm:$0xff] }
 0x653   : > { %3454 = vmatpush.msrb.mxu3 %v3413_v61 }
 0x655   : > { %3455 = vmatpush.msrb.mxu3 %v3412_v24  ;;  %v3795_v24 = vld [vmem:[#allocation19 + $0x10] sm:$0xff] }
 0x656   : > { %5056 = vmatmul.msk.f32.vlgmr.msrb.gmra.mxu3 %vm3103_vm5, %v3080_v21 }
 0x657   : > { %v5551_v19 = vpop.permute.xlu2 %5550 }
 0x658   : > { %v5552_v51 = vunpack.i.l.bf16 %v5551_v19  ;;  %v5553_v40 = vunpack.i.h.bf16 %v5551_v19  ;;  %v3918_v19 = vld [vmem:[#allocation12 + $0x10] sm:$0xff] }
 0x65a   : > { %v3420_v61 = vsel %vm3418_vm9, %v5537_v46, %v5552_v51 }
 0x65e   : > { %5057 = vmatmul.msk.f32.gmra.mxu3 %vm3103_vm5, %v3081_v63 }
 0x666   : > { %5058 = vmatmul.msk.f32.gmra.mxu3 %vm3103_vm5, %v3082_v38 }
 0x66e   : > { %5059 = vmatmul.msk.f32.gmra.mxu3 %vm3103_vm5, %v3083_v8 }
 0x676   : > { %5060 = vmatmul.msk.f32.gmra.mxu3 %vm3103_vm5, %v3084_v11 }
 0x67f   : > { %v5546_v49 = vpop.permute.xlu1 %5545 }
 0x680   : > { %v5547_v26 = vunpack.i.l.bf16 %v5546_v49  ;;  %v5548_v17 = vunpack.i.h.bf16 %v5546_v49  ;;  %v3800_v49 = vld [vmem:[#allocation21 + $0x8] sm:$0xff] }
 0x682   : > { %v3422_v59 = vsel %vm3418_vm9, %v5527_v3, %v5547_v26  ;;  %v3421_v30 = vsel %vm3418_vm9, %v5528_v41, %v5548_v17  ;;  %v3794_v3 = vld [vmem:[#allocation19 + $0x8] sm:$0xff]  ;;  %v3793_v41 = vld [vmem:[#allocation19] sm:$0xff] }
 0x683   : > { %v3917_v17 = vld [vmem:[#allocation12 + $0x8] sm:$0xff] }
 0x68f   : > { %v5541_v52 = vpop.permute.xlu0 %5540 }
 0x690   : > { %v5543_v34 = vunpack.i.h.bf16 %v5541_v52  ;;  %v5542_v43 = vunpack.i.l.bf16 %v5541_v52 }
 0x692   : > { %v3424_v4 = vsel %vm3418_vm9, %v5532_v2, %v5542_v43  ;;  %v3423_v1 = vsel %vm3418_vm9, %v9264_v5, %v5543_v34  ;;  %v3419_v2 = vsel %vm3418_vm9, %v5538_v50, %v5553_v40  ;;  %v3801_v34 = vld [vmem:[#allocation21 + $0x10] sm:$0xff]  ;;  %v3916_v5 = vld [vmem:[#allocation12] sm:$0xff] }
 0x693   : > { %3482 = vmatpush.msra.mxu3 %v3424_v4 }
 0x695   : > { %3483 = vmatpush.msra.mxu3 %v3423_v1 }
 0x697   : > { %3484 = vmatpush.msra.mxu3 %v3422_v59 }
 0x699   : > { %3485 = vmatpush.msra.mxu3 %v3421_v30 }
 0x69b   : > { %3486 = vmatpush.msra.mxu3 %v3420_v61 }
 0x69d   : > { %3487 = vmatpush.msra.mxu3 %v3419_v2 }
 0x69e   : > { %5061 = vmatmul.msk.f32.vlgmr.msra.gmra.mxu3 %vm3103_vm5, %v3080_v21 }
 0x69f   : > { %3812 = vmatpush.msrb.mxu3 %v3798_v53 }
 0x6a1   : > { %3813 = vmatpush.msrb.mxu3 %v3797_v10 }
 0x6a3   : > { %3814 = vmatpush.msrb.mxu3 %v3796_v60 }
 0x6a5   : > { %3815 = vmatpush.msrb.mxu3 %v3795_v24 }
 0x6a6   : > { %5062 = vmatmul.msk.f32.gmra.mxu3 %vm3103_vm5, %v3081_v63 }
 0x6a7   : > { %3816 = vmatpush.msrb.mxu3 %v3794_v3 }
 0x6a9   : > { %3817 = vmatpush.msrb.mxu3 %v3793_v41 }
 0x6ae   : > { %5063 = vmatmul.msk.f32.gmra.mxu3 %vm3103_vm5, %v3082_v38 }
 0x6b6   : > { %5064 = vmatmul.msk.f32.gmra.mxu3 %vm3103_vm5, %v3083_v8  ;;  %v3799_v8 = vld [vmem:[#allocation21] sm:$0xff] }
 0x6be   : > { %5065 = vmatmul.msk.f32.gmra.mxu3 %vm3103_vm5, %v3084_v11 }
 0x6c6   : > { %5066 = vmatmul.msk.f32.vlgmr.msrb.gmra.mxu3 %vm3103_vm5, %v7333_v29 }
 0x6ce   : > { %5067 = vmatmul.msk.f32.gmra.mxu3 %vm3103_vm5, %v7339_v33 }
 0x6d6   : > { %5068 = vmatmul.msk.f32.gmra.mxu3 %vm3103_vm5, %v7345_v37 }
 0x6d9   : > { %v7548_v50 = vpop.f32.mrf.mxu3 }
 0x6de   : > { %5069 = vmatmul.msk.f32.gmra.mxu3 %vm3103_vm5, %v7349_v39 }
 0x6e1   : > { %v7552_v29 = vpop.f32.mrf.mxu3 }
 0x6e2   : > { %9265 = vst [vmem:[#allocation59_spill] sm:$0xff] %v7552_v29 }
 0x6e6   : > { %5070 = vmatmul.msk.f32.gmra.mxu3 %vm3103_vm5, %v7355_v36 }
 0x6e9   : > { %v7556_v33 = vpop.f32.mrf.mxu3 }
 0x6ee   : > { %5071 = vmatmul.msk.f32.gmra.mxu3 %vm3103_vm5, %v7361_v42 }
 0x6f1   : > { %v7560_v37 = vpop.f32.mrf.mxu3 }
 0x6f6   : > { %5072 = vmatmul.msk.f32.gmra.mxu3 %vm3103_vm5, %v7373_v7 }
 0x6f9   : > { %v7566_v39 = vpop.f32.mrf.mxu3 }
 0x6fa   : > { %9266 = vst [vmem:[#allocation60_spill] sm:$0xff] %v7566_v39 }
 0x6fe   : > { %5073 = vmatmul.msk.f32.gmra.mxu3 %vm3103_vm5, %v7379_v0 }
 0x706   : > { %5074 = vmatmul.msk.f32.gmra.mxu3 %vm3103_vm5, %v7383_v9 }
 0x70e   : > { %5075 = vmatmul.msk.f32.gmra.mxu3 %vm3103_vm5, %v7389_v48 }
 0x716   : > { %5076 = vmatmul.msk.f32.gmra.mxu3 %vm3103_vm5, %v7395_v28 }
 0x71e   : > { %5077 = vmatmul.msk.f32.gmra.mxu3 %vm3103_vm5, %v7401_v22 }
 0x721   : > { %v7570_v36 = vpop.f32.mrf.mxu3 }
 0x722   : > { %9267 = vst [vmem:[#allocation61_spill] sm:$0xff] %v7570_v36 }
 0x729   : > { %v7572_v42 = vpop.f32.mrf.mxu3 }
 0x72a   : > { %9268 = vst [vmem:[#allocation62_spill] sm:$0xff] %v7572_v42 }
 0x731   : > { %v7574_v7 = vpop.f32.mrf.mxu3 }
 0x732   : > { %9269 = vst [vmem:[#allocation63_spill] sm:$0xff] %v7574_v7 }
 0x739   : > { %v7576_v0 = vpop.f32.mrf.mxu3 }
 0x73a   : > { %9270 = vst [vmem:[#allocation64_spill] sm:$0xff] %v7576_v0 }
 0x741   : > { %v7578_v9 = vpop.f32.mrf.mxu3 }
 0x742   : > { %9271 = vst [vmem:[#allocation65_spill] sm:$0xff] %v7578_v9 }
 0x749   : > { %v3819_v46 = vpop.f32.mrf.mxu3 }
 0x751   : > { %v3822_v48 = vpop.f32.mrf.mxu3 }
 0x759   : > { %v3825_v21 = vpop.f32.mrf.mxu3 }
 0x761   : > { %v3828_v63 = vpop.f32.mrf.mxu3 }
 0x769   : > { %v3831_v28 = vpop.f32.mrf.mxu3 }
 0x771   : > { %v3834_v38 = vpop.f32.mrf.mxu3 }
 0x772   : > { %3874 = vmatpush.msrb.mxu2 %v3834_v38 }
 0x774   : > { %3875 = vmatpush.msrb.mxu2 %v3831_v28 }
 0x776   : > { %3876 = vmatpush.msrb.mxu2 %v3828_v63 }
 0x778   : > { %3877 = vmatpush.msrb.mxu2 %v3825_v21 }
 0x779   : > { %v3837_v22 = vpop.f32.mrf.mxu3 }
 0x77a   : > { %3878 = vmatpush.msrb.mxu2 %v3822_v48 }
 0x77c   : > { %3879 = vmatpush.msrb.mxu2 %v3819_v46 }
 0x77d   : > { %5078 = vmatmul.msk.f32.vlgmr.msrb.gmra.mxu2 %vm3103_vm5, %v3799_v8 }
 0x781   : > { %v3840_v11 = vpop.f32.mrf.mxu3 }
 0x785   : > { %5079 = vmatmul.msk.f32.gmra.mxu2 %vm3103_vm5, %v3800_v49 }
 0x789   : > { %v3843_v52 = vpop.f32.mrf.mxu3 }
 0x78d   : > { %5080 = vmatmul.msk.f32.gmra.mxu2 %vm3103_vm5, %v3801_v34 }
 0x791   : > { %v3846_v43 = vpop.f32.mrf.mxu3 }
 0x799   : > { %v3849_v26 = vpop.f32.mrf.mxu3 }
 0x7a1   : > { %v3852_v4 = vpop.f32.mrf.mxu3 }
 0x7a2   : > { %3900 = vmatpush.msra.mxu2 %v3852_v4 }
 0x7a4   : > { %3901 = vmatpush.msra.mxu2 %v3849_v26 }
 0x7a6   : > { %3902 = vmatpush.msra.mxu2 %v3846_v43 }
 0x7a8   : > { %3903 = vmatpush.msra.mxu2 %v3843_v52 }
 0x7aa   : > { %3904 = vmatpush.msra.mxu2 %v3840_v11 }
 0x7ac   : > { %3905 = vmatpush.msra.mxu2 %v3837_v22 }
 0x7ad   : > { %5081 = vmatmul.msk.f32.vlgmr.msra.gmra.mxu2 %vm3103_vm5, %v3799_v8 }
 0x7ae   : > { %3988 = vmatpush.msrb.mxu2 %v3918_v19  ;;  %v5636_v19 = vld [vmem:[%s6524_s10] sm:$0xff] }
 0x7b0   : > { %3989 = vmatpush.msrb.mxu2 %v3917_v17  ;;  %v5637_v17 = vld [vmem:[%s6532_s28] sm:$0xff] }
 0x7b2   : > { %3990 = vmatpush.msrb.mxu2 %v3916_v5  ;;  %v880_v5 = vsub.f32 %v5636_v19, %v5637_v17 }
 0x7b5   : > { %5082 = vmatmul.msk.f32.gmra.mxu2 %vm3103_vm5, %v3800_v49 }
 0x7bd   : > { %5083 = vmatmul.msk.f32.gmra.mxu2 %vm3103_vm5, %v3801_v34  ;;  %vm4467_vm5 = vcmask 48128  }
 0x800   : > { %v7586_v1 = vpop.f32.mrf.mxu2 }
 0x801   : > { %5084 = vmatmul.msk.f32.vlgmr.msrb.gmra.mxu2 %vm3418_vm9, %v7586_v1  ;;  %v3921_v2 = vmul.f32 %v7586_v1, %v7586_v1 }
 0x808   : > { %v7590_v51 = vpop.f32.mrf.mxu2 }
 0x809   : > { %5085 = vmatmul.msk.f32.gmra.mxu2 %vm3418_vm9, %v7590_v51  ;;  %v3922_v53 = vmul.f32 %v7590_v51, %v7590_v51 }
 0x810   : > { %v7594_v59 = vpop.f32.mrf.mxu2 }
 0x811   : > { %5086 = vmatmul.msk.f32.gmra.mxu2 %vm3418_vm9, %v7594_v59  ;;  %v3923_v10 = vmul.f32 %v7594_v59, %v7594_v59 }
 0x830   : > { %v7598_v40 = vpop.f32.mrf.mxu2 }
 0x831   : > { %5087 = vmatmul.msk.f32.gmra.mxu2 %vm3418_vm9, %v7598_v40  ;;  %v3924_v60 = vmul.f32 %v7598_v40, %v7598_v40  ;;  %v3927_v41 = vmul.f32 %v7598_v40, %v7586_v1 }
 0x838   : > { %v7602_v30 = vpop.f32.mrf.mxu2 }
 0x839   : > { %5088 = vmatmul.msk.f32.gmra.mxu2 %vm3418_vm9, %v7602_v30  ;;  %v3925_v24 = vmul.f32 %v7602_v30, %v7602_v30  ;;  %v3928_v46 = vmul.f32 %v7602_v30, %v7590_v51 }
 0x840   : > { %v7606_v61 = vpop.f32.mrf.mxu2 }
 0x841   : > { %5089 = vmatmul.msk.f32.gmra.mxu2 %vm3418_vm9, %v7606_v61  ;;  %v3926_v3 = vmul.f32 %v7606_v61, %v7606_v61  ;;  %v3929_v48 = vmul.f32 %v7606_v61, %v7594_v59 }
 0x849   : > { %5090 = vmatmul.msk.f32.gmra.mxu2 %vm3418_vm9, %v3921_v2  ;;  %v5638_v2 = vld [vmem:[%s6524_s10 + $0x8] sm:$0xff] }
 0x851   : > { %5091 = vmatmul.msk.f32.gmra.mxu2 %vm3418_vm9, %v3922_v53  ;;  %v5639_v53 = vld [vmem:[%s6532_s28 + $0x8] sm:$0xff] }
 0x859   : > { %5092 = vmatmul.msk.f32.gmra.mxu2 %vm3418_vm9, %v3923_v10  ;;  %v881_v10 = vsub.f32 %v5638_v2, %v5639_v53  ;;  %v5644_v53 = vld [vmem:[%s6524_s10 + $0x20] sm:$0xff] }
 0x861   : > { %5093 = vmatmul.msk.f32.gmra.mxu2 %vm3418_vm9, %v3924_v60 }
 0x869   : > { %5094 = vmatmul.msk.f32.gmra.mxu2 %vm3418_vm9, %v3925_v24  ;;  %v892_v24 = vmul.f32 %v880_v5, %v880_v5 }
 0x871   : > { %5095 = vmatmul.msk.f32.gmra.mxu2 %vm3418_vm9, %v3926_v3  ;;  %v893_v3 = vmul.f32 %v881_v10, %v881_v10 }
 0x879   : > { %5096 = vmatmul.msk.f32.gmra.mxu2 %vm3418_vm9, %v3927_v41  ;;  %v5640_v41 = vld [vmem:[%s6524_s10 + $0x10] sm:$0xff] }
 0x881   : > { %5097 = vmatmul.msk.f32.gmra.mxu2 %vm3418_vm9, %v3928_v46  ;;  %v5641_v46 = vld [vmem:[%s6532_s28 + $0x10] sm:$0xff] }
 0x884   : > { %v7637_v21 = vpop.f32.mrf.mxu2 }
 0x889   : > { %5098 = vmatmul.msk.f32.gmra.mxu2 %vm3418_vm9, %v3929_v48  ;;  %v882_v48 = vsub.f32 %v5640_v41, %v5641_v46  ;;  %v5646_v41 = vld [vmem:[%s6524_s10 + $0x28] sm:$0xff] }
 0x88a   : > { %v5647_v46 = vld [vmem:[%s6532_s28 + $0x28] sm:$0xff] }
 0x88c   : > { %v7639_v63 = vpop.f32.mrf.mxu2 }
 0x894   : > { %v7641_v28 = vpop.f32.mrf.mxu2 }
 0x8b4   : > { %v4001_v38 = vpop.f32.mrf.mxu2 }
 0x8b5   : > { %4040 = vrot.lane.b32.xlu1 %v4001_v38, %s6202_s19 }
 0x8bc   : > { %v4004_v22 = vpop.f32.mrf.mxu2 }
 0x8c4   : > { %v4007_v8 = vpop.f32.mrf.mxu2 }
 0x8c5   : > { %v5554_v11 = vpack.i.bf16 %v4004_v22, %v4007_v8  ;;  %v905_v22 = vsel %vm904_vm0, %v892_v24, 0.0  ;;  %v906_v8 = vsel %vm904_vm0, %v893_v3, 0.0 }
 0x8c6   : > { %v907_v19 = vadd.f32 %v906_v8, %v905_v22 }
 0x8c7   : > { %5555 = vrot.lane.b32.xlu0 %v5554_v11, %s6202_s19  ;;  %v894_v11 = vmul.f32 %v882_v48, %v882_v48  ;;  %v885_v48 = vsub.f32 %v5646_v41, %v5647_v46 }
 0x8c9   : > { %v908_v5 = vsel %vm904_vm0, %v894_v11, 0.0  ;;  %v897_v11 = vmul.f32 %v885_v48, %v885_v48 }
 0x8cc   : > { %v4010_v49 = vpop.f32.mrf.mxu2 }
 0x8d4   : > { %v4013_v52 = vpop.f32.mrf.mxu2 }
 0x8dc   : > { %v4016_v34 = vpop.f32.mrf.mxu2 }
 0x8dd   : > { %v5559_v43 = vpack.i.bf16 %v4013_v52, %v4016_v34  ;;  %v5642_v52 = vld [vmem:[%s6524_s10 + $0x18] sm:$0xff] }
 0x8de   : > { %v5643_v34 = vld [vmem:[%s6532_s28 + $0x18] sm:$0xff] }
 0x8df   : > { %5560 = vrot.lane.b32.xlu1 %v5559_v43, %s6203_s6  ;;  %v883_v43 = vsub.f32 %v5642_v52, %v5643_v34  ;;  %v5648_v52 = vld [vmem:[%s6524_s10 + $0x30] sm:$0xff] }
 0x8e0   : > { %v5649_v34 = vld [vmem:[%s6532_s28 + $0x30] sm:$0xff] }
 0x8e1   : > { %v895_v2 = vmul.f32 %v883_v43, %v883_v43  ;;  %v886_v43 = vsub.f32 %v5648_v52, %v5649_v34 }
 0x8e3   : > { %v910_v24 = vsel %vm904_vm0, %v895_v2, 0.0 }
 0x8e4   : > { %v7644_v26 = vpop.f32.mrf.mxu2 }
 0x8ec   : > { %v4022_v4 = vpop.f32.mrf.mxu2 }
 0x8f4   : > { %v4025_v60 = vpop.f32.mrf.mxu2 }
 0x8f5   : > { %v5564_v38 = vpack.i.bf16 %v4022_v4, %v4025_v60  ;;  %v5645_v4 = vld [vmem:[%s6532_s28 + $0x20] sm:$0xff]  ;;  %v909_v60 = vadd.f32 %v908_v5, %v907_v19  ;;  %v898_v19 = vmul.f32 %v886_v43, %v886_v43  ;;  %v5651_v5 = vld [vmem:[%s6532_s28 + $0x38] sm:$0xff] }
 0x8f6   : > { %v884_v10 = vsub.f32 %v5644_v53, %v5645_v4  ;;  %v914_v53 = vsel %vm904_vm0, %v897_v11, 0.0  ;;  %v5655_v11 = vld [vmem:[%s6532_s28 + $0x48] sm:$0xff] }
 0x8f7   : > { %5565 = vrot.lane.b32.xlu2 %v5564_v38, %s6204_s7  ;;  %v911_v38 = vadd.f32 %v910_v24, %v909_v60  ;;  %v5652_v24 = vld [vmem:[%s6524_s10 + $0x40] sm:$0xff]  ;;  %v916_v48 = vsel %vm904_vm0, %v898_v19, 0.0 }
 0x8f8   : > { %v896_v3 = vmul.f32 %v884_v10, %v884_v10 }
 0x8fa   : > { %v912_v8 = vsel %vm904_vm0, %v896_v3, 0.0  ;;  %v5653_v3 = vld [vmem:[%s6532_s28 + $0x40] sm:$0xff] }
 0x8fb   : > { %v888_v41 = vsub.f32 %v5652_v24, %v5653_v3 }
 0x8fc   : > { %v4028_v17 = vpop.f32.mrf.mxu2 }
 0x8fd   : > { %4076 = vrot.lane.b32.xlu1 %v4028_v17, %s6205_s5  ;;  %v5650_v17 = vld [vmem:[%s6524_s10 + $0x38] sm:$0xff] }
 0x8fe   : > { %v887_v2 = vsub.f32 %v5650_v17, %v5651_v5  ;;  %v5657_v17 = vld [vmem:[%s6532_s28 + $0x50] sm:$0xff] }
 0x8ff   : > { %4052 = vrot.lane.b32.xlu2 %v4010_v49, %s6203_s6  ;;  %v913_v49 = vadd.f32 %v912_v8, %v911_v38  ;;  %v5654_v8 = vld [vmem:[%s6524_s10 + $0x48] sm:$0xff] }
 0x900   : > { %v899_v46 = vmul.f32 %v887_v2, %v887_v2  ;;  %v889_v52 = vsub.f32 %v5654_v8, %v5655_v11  ;;  %v1853_v11 = vmul.f32 %v7309_v58, %v7309_v58 }
 0x901   : > { %v915_v10 = vadd.f32 %v914_v53, %v913_v49  ;;  %v5656_v49 = vld [vmem:[%s6524_s10 + $0x50] sm:$0xff] }
 0x902   : > { %v918_v34 = vsel %vm904_vm0, %v899_v46, 0.0  ;;  %v890_v5 = vsub.f32 %v5656_v49, %v5657_v17  ;;  %v901_v2 = vmul.f32 %v889_v52, %v889_v52  ;;  %v1856_v52 = vmul.f32 %v7326_v57, %v7326_v57 }
 0x903   : > { %v917_v38 = vadd.f32 %v916_v48, %v915_v10  ;;  %v5659_v10 = vld [vmem:[%s6532_s28 + $0x58] sm:$0xff]  ;;  %v1862_v49 = vmul.f32 %v7129_v45, %v7129_v45  ;;  %v1860_v17 = vmul.f32 %v7353_v44, %v7353_v44  ;;  %s6207_s28 = smov 6  }
 0x904   : > { %v4031_v22 = vpop.f32.mrf.mxu2  ;;  %v902_v24 = vmul.f32 %v890_v5, %v890_v5  ;;  %v922_v3 = vsel %vm904_vm0, %v901_v2, 0.0  ;;  %v1866_v5 = vmul.f32 %v7147_v14, %v7147_v14  ;;  %v1855_v2 = vmul.f32 %v7321_v23, %v7321_v23 }
 0x905   : > { %1899 = vrot.lane.b32.xlu1 %v7139_v12, %s6204_s7  ;;  %v919_v43 = vadd.f32 %v918_v34, %v917_v38  ;;  %v1859_v34 = vmul.f32 %v7343_v35, %v7343_v35 }
 0x906   : > { %v924_v48 = vsel %vm904_vm0, %v902_v24, 0.0 }
 0x90c   : > { %v4034_v4 = vpop.f32.mrf.mxu2 }
 0x90d   : > { %v5569_v60 = vpack.i.bf16 %v4031_v22, %v4034_v4  ;;  %1903 = vrot.lane.b32.xlu1 %v7143_v13, %s6204_s7  ;;  %v900_v22 = vmul.f32 %v888_v41, %v888_v41  ;;  %v5658_v4 = vld [vmem:[%s6524_s10 + $0x58] sm:$0xff] }
 0x90f   : > { %5570 = vrot.lane.b32.xlu0 %v5569_v60, %s6205_s5  ;;  %v920_v19 = vsel %vm904_vm0, %v900_v22, 0.0  ;;  %v891_v60 = vsub.f32 %v5658_v4, %v5659_v10  ;;  %v1854_v22 = vmul.f32 %v7316_v62, %v7316_v62  ;;  %v1869_v4 = vmul.f32 %v7167_v55, %v7167_v55 }
 0x910   : > { %v921_v53 = vadd.f32 %v920_v19, %v919_v43  ;;  %v1857_v43 = vmul.f32 %v7331_v27, %v7331_v27  ;;  %v1863_v19 = vmul.f32 %v7135_v56, %v7135_v56  ;;  %v1858_v10 = vmul.f32 %v7337_v31, %v7337_v31 }
 0x911   : > { %v903_v46 = vmul.f32 %v891_v60, %v891_v60  ;;  %v1867_v60 = vmul.f32 %v7151_v16, %v7151_v16 }
 0x912   : > { %v923_v41 = vadd.f32 %v922_v3, %v921_v53 }
 0x914   : > { %v925_v38 = vadd.f32 %v924_v48, %v923_v41 }
 0x915   : > { %1907 = vrot.lane.b32.xlu1 %v7147_v14, %s6204_s7 }
 0x917   : > { %4064 = vrot.lane.b32.xlu0 %v7644_v26, %s6204_s7  ;;  %v926_v26 = vsel %vm904_vm0, %v903_v46, 0.0  ;;  %v1872_v46 = vmul.f32 %v7218_v6, %v7218_v6  ;;  %vm9176_vm0 = vcmask 0  }
 0x918   : > { %v927_v8 = vadd.f32 %v926_v26, %v925_v38 }
 0x91d   : > { %1911 = vrot.lane.b32.xlu1 %v7151_v16, %s6204_s7 }
 0x91f   : > { %1897 = vrot.lane.b32.xlu0 %v7309_v58, %s6204_s7 }
 0x925   : > { %1915 = vrot.lane.b32.xlu1 %v7155_v18, %s6204_s7 }
 0x927   : > { %1901 = vrot.lane.b32.xlu0 %v7316_v62, %s6204_s7  ;;  %v4041_v53 = vpop.permute.xlu1 %4040 }
 0x928   : > { %928 = vadd.xlane.f32.xlu2 %v927_v8  ;;  %v1861_v8 = vmul.f32 %v7125_v47, %v7125_v47 }
 0x92d   : > { %1921 = vrot.lane.b32.xlu1 %v7343_v35, %s6204_s7 }
 0x92f   : > { %1905 = vrot.lane.b32.xlu0 %v7321_v23, %s6204_s7 }
 0x935   : > { %1925 = vrot.lane.b32.xlu1 %v7353_v44, %s6204_s7 }
 0x937   : > { %1909 = vrot.lane.b32.xlu0 %v7326_v57, %s6204_s7 }
 0x939   : > { %v5556_v24 = vpop.permute.xlu0 %5555 }
 0x93a   : > { %v5557_v41 = vunpack.i.l.bf16 %v5556_v24  ;;  %v5558_v26 = vunpack.i.h.bf16 %v5556_v24 }
 0x93d   : > { %1929 = vrot.lane.b32.xlu1 %v7125_v47, %s6204_s7 }
 0x93f   : > { %1913 = vrot.lane.b32.xlu0 %v7331_v27, %s6204_s7 }
 0x940   : > { %1917 = vrot.lane.b32.xlu2 %v7337_v31, %s6204_s7 }
 0x945   : > { %1935 = vrot.lane.b32.xlu1 %v7227_v25, %s6204_s7 }
 0x947   : > { %1919 = vrot.lane.b32.xlu0 %v7167_v55, %s6204_s7 }
 0x948   : > { %1931 = vrot.lane.b32.xlu2 %v7218_v6, %s6204_s7 }
 0x94d   : > { %1986 = vrot.lane.b32.xlu1 %v1853_v11, %s6195_s15 }
 0x94f   : > { %1923 = vrot.lane.b32.xlu0 %v7186_v20, %s6204_s7 }
 0x950   : > { %1937 = vrot.lane.b32.xlu2 %v7135_v56, %s6204_s7 }
 0x951   : > { %v5561_v3 = vpop.permute.xlu1 %5560  ;;  %v5566_v38 = vpop.permute.xlu2 %5565 }
 0x952   : > { %v5562_v48 = vunpack.i.l.bf16 %v5561_v3  ;;  %v5563_v11 = vunpack.i.h.bf16 %v5561_v3 }
 0x955   : > { %1992 = vrot.lane.b32.xlu1 %v1856_v52, %s6195_s15  ;;  %v1870_v52 = vmul.f32 %v7186_v20, %v7186_v20 }
 0x957   : > { %1927 = vrot.lane.b32.xlu0 %v7199_v15, %s6204_s7 }
 0x958   : > { %1988 = vrot.lane.b32.xlu2 %v1854_v22, %s6195_s15  ;;  %v4088_v22 = vsel %vm4085_vm11, %v7641_v28, %v5557_v41  ;;  %v1873_v41 = vmul.f32 %v7227_v25, %v7227_v25 }
 0x959   : > { %v4053_v3 = vpop.permute.xlu2 %4052 }
 0x95d   : > { %1998 = vrot.lane.b32.xlu1 %v1859_v34, %s6195_s15  ;;  %v5567_v34 = vunpack.i.l.bf16 %v5566_v38 }
 0x95f   : > { %1933 = vrot.lane.b32.xlu0 %v7129_v45, %s6204_s7 }
 0x960   : > { %1994 = vrot.lane.b32.xlu2 %v1857_v43, %s6195_s15  ;;  %v4092_v43 = vsel %vm4089_vm10, %v4088_v22, %v5562_v48  ;;  %v4244_v22 = vld [vmem:[#allocation22 + $0x10] sm:$0xff] }
 0x961   : > { %v4095_v28 = vsel %vm1941_vm12, %v4092_v43, %v5567_v34  ;;  %v1865_v34 = vmul.f32 %v7143_v13, %v7143_v13  ;;  %v4243_v43 = vld [vmem:[#allocation22 + $0x8] sm:$0xff] }
 0x965   : > { %2004 = vrot.lane.b32.xlu1 %v1862_v49, %s6195_s15  ;;  %v4087_v49 = vsel %vm4085_vm11, %v7639_v63, %v5558_v26 }
 0x967   : > { %1939 = vrot.lane.b32.xlu0 %v7235_v54, %s6204_s7 }
 0x968   : > { %2000 = vrot.lane.b32.xlu2 %v1860_v17, %s6195_s15  ;;  %v5568_v17 = vunpack.i.h.bf16 %v5566_v38 }
 0x96d   : > { %2056 = vrot.lane.b32.xlu1 %v1866_v5, %s6195_s15 }
 0x96f   : > { %1990 = vrot.lane.b32.xlu0 %v1855_v2, %s6195_s15  ;;  %v4077_v26 = vpop.permute.xlu1 %4076 }
 0x970   : > { %2006 = vrot.lane.b32.xlu2 %v1863_v19, %s6195_s15 }
 0x975   : > { %2062 = vrot.lane.b32.xlu1 %v1869_v4, %s6195_s15  ;;  %v4091_v4 = vsel %vm4089_vm10, %v4087_v49, %v5563_v11  ;;  %v3919_v11 = vld [vmem:[#allocation13] sm:$0xff]  ;;  %v1868_v49 = vmul.f32 %v7155_v18, %v7155_v18 }
 0x976   : > { %v4094_v24 = vsel %vm1941_vm12, %v4091_v4, %v5568_v17  ;;  %v1871_v17 = vmul.f32 %v7199_v15, %v7199_v15 }
 0x977   : > { %1996 = vrot.lane.b32.xlu0 %v1858_v10, %s6195_s15 }
 0x978   : > { %2058 = vrot.lane.b32.xlu2 %v1867_v60, %s6195_s15  ;;  %v1864_v60 = vmul.f32 %v7139_v12, %v7139_v12 }
 0x97d   : > { %2068 = vrot.lane.b32.xlu1 %v1872_v46, %s6195_s15  ;;  %v4086_v46 = vsel %vm4085_vm11, %v7637_v21, %v4041_v53  ;;  %v4242_v21 = vld [vmem:[#allocation22] sm:$0xff]  ;;  %v3920_v53 = vld [vmem:[#allocation13 + $0x8] sm:$0x3f] }
 0x97e   : > { %v4090_v48 = vsel %vm4089_vm10, %v4086_v46, %v4053_v3 }
 0x97f   : > { %2002 = vrot.lane.b32.xlu0 %v1861_v8, %s6195_s15 }
 0x980   : > { %2064 = vrot.lane.b32.xlu2 %v1870_v52, %s6195_s15 }
 0x981   : > { %v5571_v5 = vpop.permute.xlu0 %5570 }
 0x982   : > { %v5573_v2 = vunpack.i.h.bf16 %v5571_v5  ;;  %v5572_v19 = vunpack.i.l.bf16 %v5571_v5 }
 0x984   : > { %v4099_v10 = vsel %vm4096_vm13, %v4095_v28, %v5572_v19  ;;  %v4098_v63 = vsel %vm4096_vm13, %v4094_v24, %v5573_v2 }
 0x985   : > { %4119 = vmatpush.msra.mxu3 %v4099_v10  ;;  %v4334_v10 = vld [vmem:[#allocation15] sm:$0xff] }
 0x987   : > { %2052 = vrot.lane.b32.xlu0 %v1864_v60, %s6195_s15  ;;  %4120 = vmatpush.msra.mxu3 %v4098_v63 }
 0x988   : > { %2070 = vrot.lane.b32.xlu2 %v1873_v41, %s6195_s15 }
 0x989   : > { %v4065_v38 = vpop.permute.xlu0 %4064 }
 0x98a   : > { %v4093_v8 = vsel %vm1941_vm12, %v4090_v48, %v4065_v38 }
 0x98b   : > { %v4097_v52 = vsel %vm4096_vm13, %v4093_v8, %v4077_v26 }
 0x98c   : > { %4121 = vmatpush.msra.mxu3 %v4097_v52 }
 0x98d   : > { %5099 = vmatmul.msk.f32.vlgmr.msra.gmra.mxu3 %vm3418_vm9, %v3919_v11 }
 0x98e   : > { %4260 = vmatpush.msrb.mxu3 %v4244_v22 }
 0x98f   : > { %2054 = vrot.lane.b32.xlu0 %v1865_v34, %s6195_s15 }
 0x990   : > { %4261 = vmatpush.msrb.mxu3 %v4243_v43 }
 0x992   : > { %4262 = vmatpush.msrb.mxu3 %v4242_v21 }
 0x995   : > { %5100 = vmatmul.msk.f32.gmra.mxu3 %vm3418_vm9, %v3920_v53 }
 0x997   : > { %2060 = vrot.lane.b32.xlu0 %v1868_v49, %s6195_s15 }
 0x99d   : > { %5101 = vmatmul.msk.f32.vlgmr.msrb.gmra.mxu3 %vm3418_vm9, %v7586_v1 }
 0x99f   : > { %2066 = vrot.lane.b32.xlu0 %v1871_v17, %s6195_s15  ;;  %v1898_v17 = vpop.permute.xlu0 %1897 }
 0x9a5   : > { %5102 = vmatmul.msk.f32.gmra.mxu3 %vm3418_vm9, %v7590_v51  ;;  %v4245_v51 = vld [vmem:[%s9274_s16] sm:$0xff] }
 0x9ad   : > { %5103 = vmatmul.msk.f32.gmra.mxu3 %vm3418_vm9, %v7594_v59  ;;  %v4335_v59 = vld [vmem:[#allocation15 + $0x8] sm:$0xf] }
 0x9b5   : > { %5104 = vmatmul.msk.f32.gmra.mxu3 %vm3418_vm9, %v7598_v40 }
 0x9bd   : > { %5105 = vmatmul.msk.f32.gmra.mxu3 %vm3418_vm9, %v7602_v30  ;;  %v4246_v30 = vld [vmem:[%s9274_s16 + $0x8] sm:$0xf] }
 0x9c5   : > { %5106 = vmatmul.msk.f32.gmra.mxu3 %vm3418_vm9, %v7606_v61 }
 0xa10   : > { %v7824_v1 = vpop.f32.mrf.mxu3 }
 0xa11   : > { %9272 = vst [vmem:[#allocation66_spill] sm:$0xff] %v7824_v1 }
 0xa18   : > { %v7826_v5 = vpop.f32.mrf.mxu3 }
 0xa19   : > { %9273 = vst [vmem:[#allocation67_spill] sm:$0xff] %v7826_v5 }
 0xa20   : > { %v4264_v2 = vpop.f32.mrf.mxu3 }
 0xa28   : > { %v4267_v19 = vpop.f32.mrf.mxu3 }
 0xa30   : > { %v4270_v4 = vpop.f32.mrf.mxu3 }
 0xa31   : > { %4301 = vmatpush.msrb.mxu1 %v4270_v4 }
 0xa33   : > { %4302 = vmatpush.msrb.mxu1 %v4267_v19  ;;  %v1902_v19 = vpop.permute.xlu0 %1901 }
 0xa35   : > { %4303 = vmatpush.msrb.mxu1 %v4264_v2  ;;  %v1900_v2 = vpop.permute.xlu1 %1899 }
 0xa36   : > { %5107 = vmatmul.msk.f32.vlgmr.msrb.gmra.mxu1 %vm3418_vm9, %v4245_v51 }
 0xa37   : > { %5111 = vmatpush.msk.msra.mxu1 %vm4345_vm14, %v4335_v59 }
 0xa38   : > { %v4273_v40 = vpop.f32.mrf.mxu3 }
 0xa39   : > { %4399 = vmatpush.msra.mxu1 %v4334_v10 }
 0xa3d   : > { %v1904_v4 = vpop.permute.xlu1 %1903 }
 0xa3e   : > { %5108 = vmatmul.msk.f32.gmra.mxu1 %vm3418_vm9, %v4246_v30  ;;  %v1943_v1 = vsel %vm1941_vm12, %v1902_v19, %v1904_v4 }
 0xa3f   : > { %v1965_v39 = vmul.f32 %v1943_v1, %v7316_v62 }
 0xa40   : > { %v4276_v61 = vpop.f32.mrf.mxu3 }
 0xa45   : > { %v7853_v59 = vpop.permute.xlu1 %1907 }
 0xa48   : > { %v4279_v28 = vpop.f32.mrf.mxu3 }
 0xa49   : > { %4324 = vmatpush.msra.mxu3 %v4279_v28 }
 0xa4b   : > { %4325 = vmatpush.msra.mxu3 %v4276_v61 }
 0xa4d   : > { %4326 = vmatpush.msra.mxu3 %v4273_v40 }
 0xa4e   : > { %5109 = vmatmul.msk.f32.vlgmr.msra.gmra.mxu3 %vm3418_vm9, %v4245_v51  ;;  %v7851_v51 = vpop.permute.xlu0 %1905 }
 0xa56   : > { %5110 = vmatmul.msk.f32.gmra.mxu3 %vm3418_vm9, %v4246_v30  ;;  %v7855_v40 = vpop.permute.xlu0 %1909  ;;  %v7857_v30 = vpop.permute.xlu1 %1911 }
 0xa5e   : > { %v7859_v61 = vpop.permute.xlu0 %1913  ;;  %v7861_v28 = vpop.permute.xlu1 %1915 }
 0xa66   : > { %v7863_v10 = vpop.permute.xlu0 %1919 }
 0xab3   : > { %v4305_v60 = vpop.f32.mrf.mxu1 }
 0xab4   : > { %5112 = vmatmul.msk.f32.vlgmr.msra.gmra.mxu1 %vm4358_vm15, %v4305_v60  ;;  %v4337_v26 = vmul.f32 %v4305_v60, %v4305_v60 }
 0xabb   : > { %v4308_v3 = vpop.f32.mrf.mxu1 }
 0xabc   : > { %v4338_v52 = vmul.f32 %v4308_v3, %v4308_v3 }
 0xad1   : > { %v4328_v24 = vpop.f32.mrf.mxu3 }
 0xad2   : > { %v4346_v63 = vrot.slane %v4328_v24, 4  ;;  %v4339_v8 = vmul.f32 %v4328_v24, %v4328_v24  ;;  %v4341_v53 = vmul.f32 %v4328_v24, %v4305_v60  ;;  %v7867_v24 = vpop.permute.xlu1 %1921 }
 0xad4   : > { %v4356_v41 = vsel %vm4345_vm14, %v4308_v3, %v4346_v63  ;;  %v4352_v11 = vrot.slane %v4339_v8, 4 }
 0xad5   : > { %5113 = vmatmul.msk.f32.gmra.mxu1 %vm4358_vm15, %v4356_v41 }
 0xad6   : > { %v4357_v34 = vsel %vm4345_vm14, %v4338_v52, %v4352_v11 }
 0xad9   : > { %v4331_v46 = vpop.f32.mrf.mxu3 }
 0xada   : > { %v4347_v48 = vrot.slane %v4331_v46, 4  ;;  %v4340_v22 = vmul.f32 %v4331_v46, %v4331_v46  ;;  %v4342_v49 = vmul.f32 %v4331_v46, %v4308_v3  ;;  %v7869_v3 = vpop.permute.xlu0 %1923 }
 0xadb   : > { %v1948_v4 = vsel %vm1941_vm12, %v7867_v24, %v7869_v3 }
 0xadc   : > { %v4348_v38 = vsel %vm4345_vm14, %v4346_v63, %v4347_v48  ;;  %v4353_v43 = vrot.slane %v4340_v22, 4  ;;  %v929_v63 = vpop.xlane.xlu2 %928 }
 0xadd   : > { %5114 = vmatmul.msk.f32.gmra.mxu1 %vm4358_vm15, %v4348_v38  ;;  %v930_v41 = vrot.slane %v929_v63, 4  ;;  %v7873_v38 = vpop.permute.xlu1 %1925 }
 0xade   : > { %v4354_v21 = vsel %vm4345_vm14, %v4352_v11, %v4353_v43 }
 0xadf   : > { %v931_v48 = vadd.f32 %v930_v41, %v929_v63 }
 0xae1   : > { %v932_v8 = vrot.slane %v931_v48, 2 }
 0xae3   : > { %v933_v11 = vadd.f32 %v932_v8, %v931_v48 }
 0xae4   : > { %v7885_v41 = vpop.permute.xlu2 %1917 }
 0xae5   : > { %5115 = vmatmul.msk.f32.gmra.mxu1 %vm4358_vm15, %v4337_v26  ;;  %v7875_v26 = vpop.permute.xlu0 %1927  ;;  %v934_v43 = vrot.slane %v933_v11, 1 }
 0xae7   : > { %v935_v63 = vadd.f32 %v934_v43, %v933_v11 }
 0xae9   : > { %5144 = vpush %v935_v63 }
 0xaec   : > { %v7892_v0 = vpop.permute.xlu2 %1931 }
 0xaed   : > { %5116 = vmatmul.msk.f32.gmra.mxu1 %vm4358_vm15, %v4357_v34 }
 0xaf5   : > { %5117 = vmatmul.msk.f32.gmra.mxu1 %vm4358_vm15, %v4354_v21  ;;  %v7878_v21 = vpop.permute.xlu1 %1929 }
 0xafd   : > { %5118 = vmatmul.msk.f32.gmra.mxu1 %vm4358_vm15, %v4341_v53  ;;  %v7880_v53 = vpop.permute.xlu0 %1933  ;;  %v7888_v8 = vpop.permute.xlu1 %1935 }
 0xb05   : > { %5119 = vmatmul.msk.f32.gmra.mxu1 %vm4358_vm15, %v4342_v49 }
 0xb1a   : > { %s5145_s11 = spop %5144 }
 0xb31   : > { %v7865_v60 = vpop.f32.mrf.mxu1 }
 0xb52   : > { %v7871_v46 = vpop.f32.mrf.mxu1 }
 0xb53   : > { %v4427_v22 = vrot.slane %v7871_v46, 4 }
 0xb5a   : > { %v4407_v52 = vpop.f32.mrf.mxu1 }
 0xb5b   : > { %v4428_v34 = vrot.slane %v4407_v52, 4  ;;  %v7890_v52 = vpop.permute.xlu0 %1939 }
 0xb5d   : > { %4432 = vrot.lane.b32.xlu1 %v4428_v34, %s6196_s17  ;;  %v4429_v49 = vsel %vm4345_vm14, %v4427_v22, %v4428_v34  ;;  %v7895_v22 = vpop.permute.xlu1 %1986 }
 0xb5e   : > { %4430 = vrot.lane.b32.xlu0 %v4429_v49, %s6196_s17  ;;  %v1938_v49 = vpop.permute.xlu2 %1937  ;;  %s5143_s17 = smul.u32 3, %s9401_s20  ;;  %s9292_s20 = sld [smem:[#allocation77_spill]] }
 0xb60   : > { %s7936_s1 = sadd.s32 %s5143_s17, %s9403_s27  ;;  %s6211_s27 = smov 126  }
 0xb61   : > { %s855_s10 = scalar_lea.vmem %s9277_s23, %s7936_s1 }
 0xb62   : > { %v4410_v48 = vpop.f32.mrf.mxu1 }
 0xb63   : > { %4438 = vrot.lane.b32.xlu2 %v4410_v48, %s6206_s12  ;;  %v7897_v11 = vpop.permute.xlu0 %1990 }
 0xb65   : > { %v7899_v7 = vpop.permute.xlu1 %1992 }
 0xb6a   : > { %v4413_v9 = vpop.f32.mrf.mxu1 }
 0xb6b   : > { %4440 = vrot.lane.b32.xlu2 %v4413_v9, %s6206_s12  ;;  %v4445_v63 = vrot.slane %v4413_v9, 4  ;;  %v7901_v36 = vpop.permute.xlu0 %1996  ;;  %v1942_v9 = vsel %vm1941_vm12, %v1898_v17, %v1900_v2  ;;  %v1946_v17 = vsel %vm1941_vm12, %v7859_v61, %v7861_v28  ;;  %v1951_v28 = vsel %vm1941_vm12, %v7880_v53, %v7888_v8 }
 0xb6c   : > { %v1964_v5 = vmul.f32 %v1942_v9, %v7309_v58  ;;  %v1945_v58 = vsel %vm1941_vm12, %v7855_v40, %v7857_v30  ;;  %v1970_v30 = vmul.f32 %v1948_v4, %v7343_v35  ;;  %v1950_v53 = vsel %vm1941_vm12, %v7878_v21, %v7892_v0 }
 0xb6d   : > { %v1967_v1 = vmul.f32 %v1945_v58, %v7326_v57 }
 0xb72   : > { %v4416_v34 = vpop.f32.mrf.mxu1 }
 0xb73   : > { %v4446_v43 = vrot.slane %v4416_v34, 4  ;;  %v7906_v34 = vpop.permute.xlu2 %1988  ;;  %v7918_v19 = vpop.permute.xlu0 %2002 }
 0xb75   : > { %4450 = vrot.lane.b32.xlu1 %v4446_v43, %s6207_s28  ;;  %v4447_v42 = vsel %vm4345_vm14, %v4445_v63, %v4446_v43 }
 0xb7a   : > { %v4419_v48 = vpop.f32.mrf.mxu1 }
 0xb7b   : > { %4456 = vrot.lane.b32.xlu2 %v4419_v48, %s6208_s9  ;;  %v7929_v62 = vpop.permute.xlu2 %1994  ;;  %v2053_v57 = vpop.permute.xlu0 %2052  ;;  %v9279_v48 = vld [vmem:[#allocation38_spill] sm:$0xff] }
 0xb7c   : > { %v2074_v0 = vsel %vm1581_vm2, %v7895_v22, %v2053_v57 }
 0xb7d   : > { %4448 = vrot.lane.b32.xlu1 %v4447_v42, %s6207_s28  ;;  %v7916_v42 = vpop.permute.xlu1 %1998  ;;  %v2096_v9 = vsub.f32 %v9279_v48, %v2074_v0  ;;  %s6210_s28 = smov 90  }
 0xb82   : > { %v4422_v25 = vpop.f32.mrf.mxu1 }
 0xb83   : > { %4458 = vrot.lane.b32.xlu0 %v4422_v25, %s6208_s9  ;;  %2120 = vrot.lane.b32.xlu2 %v1965_v39, %s6197_s24  ;;  %v1968_v25 = vmul.f32 %v1946_v17, %v7331_v27  ;;  %v1874_v39 = vmul.f32 %v7235_v54, %v7235_v54  ;;  %v1944_v27 = vsel %vm1941_vm12, %v7851_v51, %v7853_v59  ;;  %v937_v59 = vstv %s5145_s11  ;;  %v7958_v61 = vpop.permute.xlu2 %2000  ;;  %v9280_v17 = vld [vmem:[#allocation42_spill] sm:$0xff] }
 0xb84   : > { %v1966_v40 = vmul.f32 %v1944_v27, %v7321_v23  ;;  %939 = vst.msk [vmem:[%s855_s10] sm:$0x1] %vm9176_vm0, %v937_v59  ;;  %v1947_v23 = vsel %vm1941_vm12, %v7885_v41, %v7863_v10 }
 0xb85   : > { %2118 = vrot.lane.b32.xlu1 %v1964_v5, %s6197_s24  ;;  %v1949_v5 = vsel %vm1941_vm12, %v7873_v38, %v7875_v26  ;;  %v7945_v2 = vpop.permute.xlu1 %2004  ;;  %v1969_v35 = vmul.f32 %v1947_v23, %v7337_v31  ;;  %v2055_v38 = vpop.permute.xlu0 %2054  ;;  %v1973_v26 = vmul.f32 %v1951_v28, %v7129_v45  ;;  %v1972_v45 = vmul.f32 %v1950_v53, %v7125_v47  ;;  %v9286_v53 = vld [vmem:[#allocation46_spill] sm:$0xff] }
 0xb86   : > { %v1971_v51 = vmul.f32 %v1949_v5, %v7353_v44  ;;  %v1952_v44 = vsel %vm1941_vm12, %v1938_v49, %v7890_v52  ;;  %v9278_v52 = vld [vmem:[#allocation39_spill] sm:$0xff] }
 0xb87   : > { %v1974_v24 = vmul.f32 %v1952_v44, %v7135_v56  ;;  %v2075_v56 = vsel %vm1581_vm2, %v7906_v34, %v2055_v38  ;;  %v9284_v44 = vld [vmem:[#allocation44_spill] sm:$0xff] }
 0xb88   : > { %v2097_v43 = vsub.f32 %v9278_v52, %v2075_v56 }
 0xb8b   : > { %2072 = vrot.lane.b32.xlu0 %v1874_v39, %s6195_s15  ;;  %2126 = vrot.lane.b32.xlu2 %v1968_v25, %s6197_s24  ;;  %v7976_v10 = vpop.permute.xlu2 %2006  ;;  %v9281_v25 = vld [vmem:[#allocation41_spill] sm:$0xff] }
 0xb8d   : > { %2124 = vrot.lane.b32.xlu1 %v1967_v1, %s6197_s24  ;;  %v2057_v3 = vpop.permute.xlu1 %2056  ;;  %v2061_v49 = vpop.permute.xlu0 %2060 }
 0xb8e   : > { %v2076_v31 = vsel %vm1581_vm2, %v7897_v11, %v2057_v3  ;;  %v2078_v47 = vsel %vm1581_vm2, %v7929_v62, %v2061_v49 }
 0xb8f   : > { %v2098_v41 = vsub.f32 %v7299_v32, %v2076_v31  ;;  %v2100_v39 = vsub.f32 %v9281_v25, %v2078_v47 }
 0xb93   : > { %2122 = vrot.lane.b32.xlu0 %v1966_v40, %s6197_s24  ;;  %2132 = vrot.lane.b32.xlu2 %v1971_v51, %s6197_s24  ;;  %v2059_v63 = vpop.permute.xlu2 %2058  ;;  %v9282_v40 = vld [vmem:[#allocation40_spill] sm:$0xff] }
 0xb94   : > { %v2077_v5 = vsel %vm1581_vm2, %v7899_v7, %v2059_v63 }
 0xb95   : > { %2130 = vrot.lane.b32.xlu1 %v1970_v30, %s6197_s24  ;;  %v2063_v8 = vpop.permute.xlu1 %2062  ;;  %v2067_v27 = vpop.permute.xlu0 %2066  ;;  %v2099_v51 = vsub.f32 %v9282_v40, %v2077_v5  ;;  %v9283_v30 = vld [vmem:[#allocation45_spill] sm:$0xff] }
 0xb96   : > { %v2079_v21 = vsel %vm1581_vm2, %v7901_v36, %v2063_v8  ;;  %v2081_v4 = vsel %vm1581_vm2, %v7958_v61, %v2067_v27 }
 0xb97   : > { %v2101_v58 = vsub.f32 %v9280_v17, %v2079_v21  ;;  %v2103_v28 = vsub.f32 %v9284_v44, %v2081_v4 }
 0xb9b   : > { %2128 = vrot.lane.b32.xlu0 %v1969_v35, %s6197_s24  ;;  %2138 = vrot.lane.b32.xlu2 %v1974_v24, %s6197_s24  ;;  %v2065_v59 = vpop.permute.xlu2 %2064  ;;  %v9285_v24 = vld [vmem:[#allocation43_spill] sm:$0xff] }
 0xb9c   : > { %v2080_v35 = vsel %vm1581_vm2, %v7916_v42, %v2065_v59  ;;  %v9287_v59 = vld [vmem:[#allocation47_spill] sm:$0xff] }
 0xb9d   : > { %2136 = vrot.lane.b32.xlu1 %v1973_v26, %s6197_s24  ;;  %v2069_v1 = vpop.permute.xlu1 %2068  ;;  %v2102_v3 = vsub.f32 %v9285_v24, %v2080_v35 }
 0xb9e   : > { %v2082_v57 = vsel %vm1581_vm2, %v7918_v19, %v2069_v1 }
 0xb9f   : > { %v2104_v23 = vsub.f32 %v9283_v30, %v2082_v57 }
 0xba3   : > { %2134 = vrot.lane.b32.xlu0 %v1972_v45, %s6197_s24  ;;  %2232 = vrot.lane.b32.xlu2 %v2098_v41, %s6204_s7  ;;  %v2071_v38 = vpop.permute.xlu2 %2070 }
 0xba4   : > { %v2083_v26 = vsel %vm1581_vm2, %v7945_v2, %v2071_v38 }
 0xba5   : > { %2230 = vrot.lane.b32.xlu1 %v2097_v43, %s6204_s7  ;;  %v2105_v31 = vsub.f32 %v9286_v53, %v2083_v26 }
 0xbab   : > { %2228 = vrot.lane.b32.xlu0 %v2096_v9, %s6204_s7  ;;  %2238 = vrot.lane.b32.xlu2 %v2101_v58, %s6204_s7 }
 0xbad   : > { %2236 = vrot.lane.b32.xlu1 %v2100_v39, %s6204_s7 }
 0xbb3   : > { %2244 = vrot.lane.b32.xlu2 %v2104_v23, %s6204_s7  ;;  %2234 = vrot.lane.b32.xlu0 %v2099_v51, %s6204_s7 }
 0xbb5   : > { %2242 = vrot.lane.b32.xlu1 %v2103_v28, %s6204_s7 }
 0xbbb   : > { %2240 = vrot.lane.b32.xlu0 %v2102_v3, %s6204_s7 }
 0xbbd   : > { %v4439_v56 = vpop.permute.xlu2 %4438 }
 0xbc3   : > { %2246 = vrot.lane.b32.xlu0 %v2105_v31, %s6204_s7 }
 0xbc5   : > { %v4441_v41 = vpop.permute.xlu2 %4440 }
 0xbcf   : > { %v4433_v45 = vpop.permute.xlu1 %4432 }
 0xbd0   : > { %v4431_v49 = vpop.permute.xlu0 %4430  ;;  %v4463_v21 = vsel %vm1594_vm3, %v7871_v46, %v4433_v45 }
 0xbd1   : > { %v4462_v63 = vsel %vm1594_vm3, %v7865_v60, %v4431_v49  ;;  %v4466_v9 = vsel %vm4464_vm4, %v4463_v21, %v4441_v41  ;;  %v2021_v41 = vsub.f32 %v7143_v13, %v7906_v34  ;;  %v2024_v21 = vsub.f32 %v7299_v32, %v7897_v11 }
 0xbd2   : > { %v4465_v58 = vsel %vm4464_vm4, %v4462_v63, %v4439_v56  ;;  %v2019_v63 = vsub.f32 %v7139_v12, %v7895_v22 }
 0xbd5   : > { %v4457_v43 = vpop.permute.xlu2 %4456 }
 0xbdd   : > { %v8028_v47 = vpop.permute.xlu2 %2120 }
 0xbe5   : > { %v8033_v46 = vpop.permute.xlu2 %2126 }
 0xbe7   : > { %v4451_v8 = vpop.permute.xlu1 %4450 }
 0xbe8   : > { %v4469_v39 = vsel %vm4467_vm5, %v4466_v9, %v4451_v8  ;;  %v2020_v9 = vsub.f32 %v9279_v48, %v7895_v22 }
 0xbed   : > { %v8043_v3 = vpop.permute.xlu2 %2132 }
 0xbee   : > { %9288 = vst [vmem:[#allocation39_spill] sm:$0xff] %v8043_v3 }
 0xbef   : > { %v4449_v0 = vpop.permute.xlu1 %4448 }
 0xbf0   : > { %v4468_v1 = vsel %vm4467_vm5, %v4465_v58, %v4449_v0 }
 0xbf1   : > { %v4471_v4 = vsel %vm4470_vm7, %v4468_v1, %v4457_v43 }
 0xbf5   : > { %v4459_v27 = vpop.permute.xlu0 %4458  ;;  %v8051_v56 = vpop.permute.xlu2 %2138 }
 0xbf6   : > { %v4472_v5 = vsel %vm4470_vm7, %v4469_v39, %v4459_v27  ;;  %9290 = vst [vmem:[#allocation42_spill] sm:$0xff] %v8051_v56 }
 0xbf7   : > { %v8030_v57 = vpop.permute.xlu1 %2118  ;;  %5120 = vmatpush.msk.msrb.mxu3 %vm4345_vm14, %v4472_v5 }
 0xbf9   : > { %4494 = vmatpush.msrb.mxu3 %v4471_v4  ;;  %v2023_v4 = vsub.f32 %v7147_v14, %v7897_v11 }
 0xbfd   : > { %v2073_v51 = vpop.permute.xlu0 %2072  ;;  %v2233_v0 = vpop.permute.xlu2 %2232 }
 0xbfe   : > { %v2084_v60 = vsel %vm1581_vm2, %v7976_v10, %v2073_v51  ;;  %v2266_v39 = vadd.f32 %v2233_v0, %v2024_v21 }
 0xbff   : > { %v2106_v23 = vsub.f32 %v9287_v59, %v2084_v60  ;;  %v8038_v28 = vpop.permute.xlu1 %2124  ;;  %v2022_v60 = vsub.f32 %v9278_v52, %v7906_v34  ;;  %v2025_v34 = vsub.f32 %v7151_v16, %v7899_v7  ;;  %v2029_v16 = vsub.f32 %v7167_v55, %v7901_v36  ;;  %v4336_v55 = vld [vmem:[%s9292_s20] sm:$0x3] }
 0xc00   : > { %v2288_v51 = vadd.f32 0.0009, %v2266_v39  ;;  %5121 = vmatmul.msk.f32.vlgmr.msrb.gmra.mxu3 %vm4358_vm15, %v4336_v55  ;;  %v2036_v55 = vsub.f32 %v9283_v30, %v7918_v19 }
 0xc01   : > { %2248 = vrot.lane.b32.xlu1 %v2106_v23, %s6204_s7  ;;  %v2265_v23 = vadd.f32 %v2233_v0, %v2023_v4 }
 0xc05   : > { %v8041_v35 = vpop.permute.xlu0 %2122 }
 0xc07   : > { %v8045_v38 = vpop.permute.xlu1 %2130 }
 0xc0d   : > { %v8047_v26 = vpop.permute.xlu0 %2128 }
 0xc0f   : > { %v8049_v31 = vpop.permute.xlu1 %2136 }
 0xc10   : > { %9289 = vst [vmem:[#allocation38_spill] sm:$0xff] %v8049_v31 }
 0xc15   : > { %v8053_v45 = vpop.permute.xlu0 %2134 }
 0xc16   : > { %9291 = vst [vmem:[#allocation41_spill] sm:$0xff] %v8053_v45 }
 0xc17   : > { %v2231_v8 = vpop.permute.xlu1 %2230 }
 0xc18   : > { %v2263_v43 = vadd.f32 %v2231_v8, %v2021_v41  ;;  %v2264_v22 = vadd.f32 %v2231_v8, %v2022_v60  ;;  %v2027_v41 = vsub.f32 %v7155_v18, %v7929_v62  ;;  %v2239_v8 = vpop.permute.xlu2 %2238  ;;  %v2030_v18 = vsub.f32 %v9280_v17, %v7901_v36 }
 0xc19   : > { %v2271_v4 = vadd.f32 %v2239_v8, %v2029_v16 }
 0xc1a   : > { %v2285_v49 = vadd.f32 0.0009, %v2263_v43  ;;  %v2286_v21 = vadd.f32 0.0009, %v2264_v22 }
 0xc1c   : > { %2331 = vrot.lane.b32.xlu1 %v2285_v49, %s6195_s15  ;;  %v2287_v49 = vadd.f32 0.0009, %v2265_v23 }
 0xc1d   : > { %v2229_v58 = vpop.permute.xlu0 %2228 }
 0xc1e   : > { %v2261_v1 = vadd.f32 %v2229_v58, %v2019_v63  ;;  %v2262_v27 = vadd.f32 %v2229_v58, %v2020_v9  ;;  %v2026_v63 = vsub.f32 %v9282_v40, %v7899_v7  ;;  %v2272_v58 = vadd.f32 %v2239_v8, %v2030_v18 }
 0xc1f   : > { %v2237_v12 = vpop.permute.xlu1 %2236  ;;  %v2028_v7 = vsub.f32 %v9281_v25, %v7929_v62  ;;  %v2293_v62 = vadd.f32 0.0009, %v2271_v4 }
 0xc20   : > { %v2283_v13 = vadd.f32 0.0009, %v2261_v1  ;;  %v2284_v5 = vadd.f32 0.0009, %v2262_v27  ;;  %v2269_v43 = vadd.f32 %v2237_v12, %v2027_v41  ;;  %v2294_v27 = vadd.f32 0.0009, %v2272_v58 }
 0xc21   : > { %v2031_v41 = vsub.f32 %v7186_v20, %v7916_v42  ;;  %v2035_v20 = vsub.f32 %v7218_v6, %v7918_v19  ;;  %v3507_v6 = vmul.f32 %v7560_v37, %v7560_v37  ;;  %v2040_v19 = vsub.f32 %v9287_v59, %v7976_v10 }
 0xc22   : > { %2327 = vrot.lane.b32.xlu2 %v2283_v13, %s6195_s15  ;;  %2329 = vrot.lane.b32.xlu0 %v2284_v5, %s6195_s15  ;;  %v2291_v11 = vadd.f32 0.0009, %v2269_v43  ;;  %v2033_v5 = vsub.f32 %v7199_v15, %v7958_v61  ;;  %v2032_v15 = vsub.f32 %v9285_v24, %v7916_v42  ;;  %v3504_v42 = vmul.f32 %v7548_v50, %v7548_v50 }
 0xc24   : > { %2337 = vrot.lane.b32.xlu1 %v2288_v51, %s6195_s15  ;;  %v2270_v51 = vadd.f32 %v2237_v12, %v2028_v7  ;;  %v9295_v7 = vld [vmem:[#allocation60_spill] sm:$0xff] }
 0xc25   : > { %v2235_v14 = vpop.permute.xlu0 %2234 }
 0xc26   : > { %v2267_v0 = vadd.f32 %v2235_v14, %v2025_v34  ;;  %v2268_v9 = vadd.f32 %v2235_v14, %v2026_v63  ;;  %v2292_v60 = vadd.f32 0.0009, %v2270_v51  ;;  %v2245_v14 = vpop.permute.xlu2 %2244  ;;  %v2038_v51 = vsub.f32 %v9286_v53, %v7945_v2 }
 0xc27   : > { %v2243_v13 = vpop.permute.xlu1 %2242  ;;  %v2277_v34 = vadd.f32 %v2245_v14, %v2035_v20 }
 0xc28   : > { %v2289_v39 = vadd.f32 0.0009, %v2267_v0  ;;  %v2290_v1 = vadd.f32 0.0009, %v2268_v9  ;;  %v2275_v36 = vadd.f32 %v2243_v13, %v2033_v5  ;;  %v3506_v0 = vmul.f32 %v7556_v33, %v7556_v33  ;;  %v9293_v9 = vld [vmem:[#allocation67_spill] sm:$0xff]  ;;  %v9296_v5 = vld [vmem:[#allocation66_spill] sm:$0xff] }
 0xc29   : > { %v2299_v8 = vadd.f32 0.0009, %v2277_v34  ;;  %v4130_v58 = vmul.f32 %v9293_v9, %v9293_v9  ;;  %v4129_v4 = vmul.f32 %v9296_v5, %v9296_v5 }
 0xc2a   : > { %2333 = vrot.lane.b32.xlu2 %v2286_v21, %s6195_s15  ;;  %2335 = vrot.lane.b32.xlu0 %v2287_v49, %s6195_s15  ;;  %v2297_v22 = vadd.f32 0.0009, %v2275_v36 }
 0xc2c   : > { %2343 = vrot.lane.b32.xlu1 %v2291_v11, %s6195_s15  ;;  %v2034_v11 = vsub.f32 %v9284_v44, %v7958_v61  ;;  %v3505_v61 = vmul.f32 %v7552_v29, %v7552_v29 }
 0xc2d   : > { %v2241_v23 = vpop.permute.xlu0 %2240 }
 0xc2e   : > { %v2273_v12 = vadd.f32 %v2241_v23, %v2031_v41  ;;  %v2274_v43 = vadd.f32 %v2241_v23, %v2032_v15  ;;  %v2276_v63 = vadd.f32 %v2243_v13, %v2034_v11  ;;  %v3508_v13 = vmul.f32 %v9295_v7, %v9295_v7 }
 0xc2f   : > { %v2151_v11 = vsub.f32 %v9279_v48, %v8030_v57  ;;  %v2165_v48 = vsub.f32 %v9284_v44, %v8043_v3  ;;  %v9327_v3 = vld [vmem:[#allocation61_spill] sm:$0xff] }
 0xc30   : > { %v2295_v49 = vadd.f32 0.0009, %v2273_v12  ;;  %v2296_v21 = vadd.f32 0.0009, %v2274_v43  ;;  %v2298_v18 = vadd.f32 0.0009, %v2276_v63 }
 0xc32   : > { %2339 = vrot.lane.b32.xlu2 %v2289_v39, %s6195_s15  ;;  %2341 = vrot.lane.b32.xlu0 %v2290_v1, %s6195_s15  ;;  %v9294_v1 = vld [vmem:[#allocation37_spill] sm:$0xff] }
 0xc33   : > { %v2037_v16 = vsub.f32 %v9294_v1, %v7945_v2  ;;  %v2039_v2 = vsub.f32 %v7235_v54, %v7976_v10  ;;  %v2173_v10 = vmul.f32 2.0, %v2151_v11 }
 0xc34   : > { %2349 = vrot.lane.b32.xlu1 %v2294_v27, %s6195_s15 }
 0xc35   : > { %v2247_v39 = vpop.permute.xlu0 %2246  ;;  %v2195_v1 = vadd.f32 0.0009, %v2173_v10 }
 0xc36   : > { %v2279_v27 = vadd.f32 %v2247_v39, %v2037_v16 }
 0xc38   : > { %v2301_v36 = vadd.f32 0.0009, %v2279_v27 }
 0xc3a   : > { %2345 = vrot.lane.b32.xlu2 %v2292_v60, %s6195_s15  ;;  %2347 = vrot.lane.b32.xlu0 %v2293_v62, %s6195_s15  ;;  %v2278_v62 = vadd.f32 %v2245_v14, %v2036_v55  ;;  %v2280_v60 = vadd.f32 %v2247_v39, %v2038_v51 }
 0xc3c   : > { %2355 = vrot.lane.b32.xlu1 %v2297_v22, %s6195_s15  ;;  %v2300_v23 = vadd.f32 0.0009, %v2278_v62  ;;  %v2302_v22 = vadd.f32 0.0009, %v2280_v60  ;;  %v2157_v60 = vsub.f32 %v9282_v40, %v8038_v28  ;;  %v2161_v40 = vsub.f32 %v9280_v17, %v8047_v26 }
 0xc42   : > { %2351 = vrot.lane.b32.xlu2 %v2295_v49, %s6195_s15  ;;  %2353 = vrot.lane.b32.xlu0 %v2296_v21, %s6195_s15 }
 0xc44   : > { %3539 = vrot.lane.b32.xlu1 %v3504_v42, %s6199_s3 }
 0xc4a   : > { %2357 = vrot.lane.b32.xlu2 %v2298_v18, %s6195_s15  ;;  %2359 = vrot.lane.b32.xlu0 %v2299_v8, %s6195_s15  ;;  %v2153_v18 = vsub.f32 %v9278_v52, %v8028_v47 }
 0xc4c   : > { %3545 = vrot.lane.b32.xlu1 %v3507_v6, %s6199_s3  ;;  %v9297_v6 = vld [vmem:[#allocation49_spill] sm:$0xff]  ;;  %v2175_v52 = vmul.f32 2.0, %v2153_v18 }
 0xc52   : > { %3541 = vrot.lane.b32.xlu2 %v3505_v61, %s6199_s3  ;;  %3543 = vrot.lane.b32.xlu0 %v3506_v0, %s6199_s3  ;;  %v2154_v61 = vsub.f32 %v9297_v6, %v8028_v47 }
 0xc54   : > { %4145 = vrot.lane.b32.xlu1 %v4130_v58, %s6203_s6  ;;  %v2159_v58 = vsub.f32 %v9281_v25, %v8033_v46  ;;  %v2187_v25 = vmul.f32 2.0, %v2165_v48 }
 0xc56   : > { %v2181_v55 = vmul.f32 2.0, %v2159_v58 }
 0xc5a   : > { %3547 = vrot.lane.b32.xlu2 %v3508_v13, %s6199_s3  ;;  %4143 = vrot.lane.b32.xlu0 %v4129_v4, %s6203_s6  ;;  %v2176_v4 = vmul.f32 2.0, %v2154_v61 }
 0xc5c   : > { %2363 = vrot.lane.b32.xlu1 %v2301_v36, %s6195_s15  ;;  %v9298_v36 = vld [vmem:[#allocation48_spill] sm:$0xff] }
 0xc5d   : > { %v2152_v62 = vsub.f32 %v9298_v36, %v8030_v57 }
 0xc5f   : > { %v2174_v17 = vmul.f32 2.0, %v2152_v62 }
 0xc62   : > { %2365 = vrot.lane.b32.xlu2 %v2302_v22, %s6195_s15  ;;  %2361 = vrot.lane.b32.xlu0 %v2300_v23, %s6195_s15  ;;  %v9299_v22 = vld [vmem:[#allocation51_spill] sm:$0xff] }
 0xc73   : > { %v2249_v41 = vpop.permute.xlu1 %2248 }
 0xc74   : > { %v2281_v15 = vadd.f32 %v2249_v41, %v2039_v2  ;;  %v2282_v12 = vadd.f32 %v2249_v41, %v2040_v19  ;;  %v2158_v2 = vsub.f32 %v9299_v22, %v8038_v28  ;;  %v2155_v19 = vsub.f32 %v7299_v32, %v8041_v35  ;;  %v9300_v41 = vld [vmem:[#allocation50_spill] sm:$0xff]  ;;  %v9302_v28 = vld [vmem:[#allocation52_spill] sm:$0xff]  ;;  %v9303_v32 = vld [vmem:[#allocation53_spill] sm:$0xff] }
 0xc75   : > { %v2162_v11 = vsub.f32 %v9303_v32, %v8047_v26 }
 0xc76   : > { %v2303_v43 = vadd.f32 0.0009, %v2281_v15  ;;  %v2304_v49 = vadd.f32 0.0009, %v2282_v12  ;;  %v2156_v15 = vsub.f32 %v9300_v41, %v8041_v35  ;;  %v8177_v12 = vadd.f32 0.0009, %v2175_v52 }
 0xc77   : > { %v2167_v35 = vsub.f32 %v9283_v30, %v8053_v45  ;;  %v2180_v18 = vmul.f32 2.0, %v2158_v2 }
 0xc78   : > { %2369 = vrot.lane.b32.xlu1 %v2304_v49, %s6195_s15  ;;  %2367 = vrot.lane.b32.xlu0 %v2303_v43, %s6195_s15  ;;  %v9301_v43 = vld [vmem:[#allocation54_spill] sm:$0xff]  ;;  %s6209_s15 = smov 40   ;;  %v8184_v49 = vadd.f32 0.0009, %v2176_v4  ;;  %v2178_v6 = vmul.f32 2.0, %v2156_v15 }
 0xc79   : > { %v2164_v57 = vsub.f32 %v9301_v43, %v8045_v38 }
 0xc7b   : > { %v2186_v30 = vmul.f32 2.0, %v2164_v57 }
 0xc7c   : > { %v2328_v21 = vpop.permute.xlu2 %2327 }
 0xc7d   : > { %5574 = vrcp.f32 %v2328_v21  ;;  %v2415_v34 = vand.u32 2147483648, %v2328_v21  ;;  %v2413_v8 = vand.u32 2147483647, %v2328_v21  ;;  %vm2409_vm8 = vweird.f32 %v2328_v21 }
 0xc7e   : > { %v8226_v62 = vadd.f32 0.0009, %v2186_v30 }
 0xc7f   : > { %v2416_v39 = vor.u32 1.1754944e-38, %v2415_v34  ;;  %vm2414_vm10 = vcmp.eq.f32.partialorder %v2413_v8, 8.507059e+37  ;;  %v2179_v34 = vmul.f32 2.0, %v2157_v60 }
 0xc81   : > { %v8214_v52 = vadd.f32 0.0009, %v2179_v34 }
 0xc83   : > { %v5575_v14 = vpop.eup %5574 }
 0xc84   : > { %v2405_v20 = vmul.f32 %v5575_v14, %v2328_v21  ;;  %v2334_v54 = vpop.permute.xlu2 %2333  ;;  %vm2410_vm3 = vweird.f32 %v5575_v14 }
 0xc85   : > { %vm2411_vm9 = vmor %vm2409_vm8, %vm2410_vm3 }
 0xc86   : > { %v2406_v42 = vsub.f32 1.0, %v2405_v20 }
 0xc88   : > { %v2407_v63 = vmul.f32 %v5575_v14, %v2406_v42  ;;  %v8196_v42 = vadd.f32 0.0009, %v2187_v25  ;;  %v8220_v25 = vadd.f32 0.0009, %v2180_v18 }
 0xc8a   : > { %v2408_v0 = vadd.f32 %v5575_v14, %v2407_v63 }
 0xc8c   : > { %v8156_v16 = vpop.permute.xlu2 %2339  ;;  %v2412_v27 = vsel %vm2411_vm9, %v5575_v14, %v2408_v0  ;;  %v2160_v14 = vsub.f32 %v9302_v28, %v8033_v46  ;;  %v2177_v46 = vmul.f32 2.0, %v2155_v19  ;;  %v2183_v0 = vmul.f32 2.0, %v2161_v40 }
 0xc8d   : > { %v2417_v13 = vsel %vm2414_vm10, %v2416_v39, %v2412_v27  ;;  %5576 = vrcp.f32 %v8156_v16  ;;  %v2163_v39 = vsub.f32 %v9285_v24, %v8045_v38  ;;  %v2189_v27 = vmul.f32 2.0, %v2167_v35 }
 0xc8e   : > { %v8159_v47 = vpop.permute.xlu1 %2331  ;;  %v2418_v51 = vmul.f32 %v2417_v13, %v2195_v1  ;;  %v2184_v1 = vmul.f32 2.0, %v2162_v11  ;;  %v8222_v36 = vadd.f32 0.0009, %v2177_v46  ;;  %v8224_v38 = vadd.f32 0.0009, %v2178_v6 }
 0xc8f   : > { %v8163_v44 = vsel %vm1581_vm2, %v8159_v47, %v2334_v54  ;;  %5578 = vrcp.f32 %v8159_v47  ;;  %v8194_v54 = vadd.f32 0.0009, %v2181_v55  ;;  %v8218_v55 = vmul.f32 2.0, %v2160_v14 }
 0xc90   : > { %5580 = vrcp.f32 %v8163_v44  ;;  %v2734_v23 = vmax.f32 %v2418_v51, 0.0  ;;  %v8228_v60 = vadd.f32 0.0009, %v2183_v0  ;;  %v8232_v22 = vadd.f32 0.0009, %v2184_v1 }
 0xc91   : > { %v8234_v2 = vadd.f32 0.0009, %v2189_v27  ;;  %v2505_v19 = vand.u32 2147483648, %v8156_v16  ;;  %vm2439_vm12 = vweird.f32 %v8159_v47  ;;  %v2458_v28 = vand.u32 2147483647, %v8163_v44 }
 0xc92   : > { %2778 = vrot.lane.b32.xlu2 %v2734_v23, %s6209_s15  ;;  %v8230_v23 = vmul.f32 2.0, %v2163_v39  ;;  %vm2499_vm13 = vweird.f32 %v8156_v16  ;;  %v2445_v35 = vand.u32 2147483648, %v8159_v47  ;;  %vm2454_vm14 = vweird.f32 %v8163_v44 }
 0xc93   : > { %v8192_v20 = vpop.eup %5576  ;;  %v2460_v34 = vand.u32 2147483648, %v8163_v44  ;;  %vm8269_vm5 = vcmp.eq.f32.partialorder %v2458_v28, 8.507059e+37  ;;  %v2443_v30 = vand.u32 2147483647, %v8159_v47 }
 0xc94   : > { %v2330_v10 = vpop.permute.xlu0 %2329  ;;  %v2346_v63 = vpop.permute.xlu2 %2345  ;;  %v2495_v4 = vmul.f32 %v8192_v20, %v8156_v16  ;;  %9304 = vst [vmem:[#allocation40_spill] sm:$0xff] %v8230_v23  ;;  %vm2500_vm7 = vweird.f32 %v8192_v20  ;;  %v2446_v6 = vor.u32 1.1754944e-38, %v2445_v35 }
 0xc95   : > { %v8198_v8 = vpop.eup %5578  ;;  %v8201_v26 = vsel %vm1581_vm2, %v2328_v21, %v2330_v10  ;;  %v8212_v21 = vadd.f32 0.0009, %v2174_v17 }
 0xc96   : > { %v8203_v61 = vpop.eup %5580  ;;  %v2435_v58 = vmul.f32 %v8198_v8, %v8159_v47  ;;  %5582 = vrcp.f32 %v8201_v26  ;;  %v2338_v48 = vpop.permute.xlu1 %2337  ;;  %v2496_v15 = vsub.f32 1.0, %v2495_v4  ;;  %vm2440_vm4 = vweird.f32 %v8198_v8 }
 0xc97   : > { %v2450_v13 = vmul.f32 %v8203_v61, %v8163_v44  ;;  %vm2455_vm15 = vweird.f32 %v8203_v61  ;;  %vm2424_vm3 = vweird.f32 %v8201_v26  ;;  %v2430_v27 = vand.u32 2147483648, %v8201_v26  ;;  %vm8295_vm10 = vmor %vm2439_vm12, %vm2440_vm4 }
 0xc98   : > { %v2436_v51 = vsub.f32 1.0, %v2435_v58  ;;  %v2497_v46 = vmul.f32 %v8192_v20, %v2496_v15  ;;  %vm2456_vm9 = vmor %vm2454_vm14, %vm2455_vm15  ;;  %vm2444_vm15 = vcmp.eq.f32.partialorder %v2443_v30, 8.507059e+37 }
 0xc99   : > { %v2451_v24 = vsub.f32 1.0, %v2450_v13  ;;  %vm8338_vm14 = vmor %vm2499_vm13, %vm2500_vm7  ;;  %v2431_v35 = vor.u32 1.1754944e-38, %v2430_v27 }
 0xc9a   : > { %v2437_v43 = vmul.f32 %v8198_v8, %v2436_v51  ;;  %v2428_v51 = vand.u32 2147483647, %v8201_v26  ;;  %v8305_v28 = vadd.f32 %v8192_v20, %v2497_v46 }
 0xc9b   : > { %v2452_v11 = vmul.f32 %v8203_v61, %v2451_v24 }
 0xc9c   : > { %v8237_v41 = vpop.eup %5582  ;;  %v8241_v57 = vpop.permute.xlu0 %2335  ;;  %vm2429_vm4 = vcmp.eq.f32.partialorder %v2428_v51, 8.507059e+37 }
 0xc9d   : > { %v8243_v40 = vpop.permute.xlu2 %2351  ;;  %v2420_v14 = vmul.f32 %v8237_v41, %v8201_v26  ;;  %v8250_v32 = vsel %vm1581_vm2, %v8241_v57, %v2338_v48  ;;  %5584 = vrcp.f32 %v8241_v57  ;;  %v2453_v58 = vadd.f32 %v8203_v61, %v2452_v11 }
 0xc9e   : > { %5586 = vrcp.f32 %v8250_v32  ;;  %v8257_v17 = vpop.permute.xlu1 %2343  ;;  %vm2425_vm8 = vweird.f32 %v8237_v41  ;;  %v2461_v48 = vor.u32 1.1754944e-38, %v2460_v34  ;;  %vm2469_vm13 = vweird.f32 %v8241_v57 }
 0xc9f   : > { %v2421_v10 = vsub.f32 1.0, %v2420_v14  ;;  %5588 = vrcp.f32 %v8243_v40  ;;  %v8264_v18 = vsel %vm1581_vm2, %v8257_v17, %v2346_v63  ;;  %v2438_v63 = vadd.f32 %v8198_v8, %v2437_v43  ;;  %vm8313_vm12 = vmor %vm2424_vm3, %vm2425_vm8 }
 0xca0   : > { %5590 = vrcp.f32 %v8257_v17  ;;  %v2457_v13 = vsel %vm2456_vm9, %v8203_v61, %v2453_v58  ;;  %v2475_v27 = vand.u32 2147483648, %v8241_v57  ;;  %vm2484_vm8 = vweird.f32 %v8250_v32 }
 0xca1   : > { %v2422_v0 = vmul.f32 %v8237_v41, %v2421_v10  ;;  %5592 = vrcp.f32 %v8264_v18  ;;  %v2462_v61 = vsel %vm8269_vm5, %v2461_v48, %v2457_v13  ;;  %v2442_v10 = vsel %vm8295_vm10, %v8198_v8, %v2438_v63 }
 0xca2   : > { %v8322_v34 = vmul.f32 %v2462_v61, %v8184_v49  ;;  %v8342_v8 = vor.u32 1.1754944e-38, %v2505_v19 }
 0xca3   : > { %v8283_v39 = vpop.eup %5584  ;;  %v2423_v1 = vadd.f32 %v8237_v41, %v2422_v0 }
 0xca4   : > { %v8289_v4 = vpop.eup %5586  ;;  %v2465_v24 = vmul.f32 %v8283_v39, %v8241_v57  ;;  %v2342_v15 = vpop.permute.xlu0 %2341  ;;  %9311 = vst [vmem:[#allocation45_spill] sm:$0xff] %v8322_v34  ;;  %vm2470_vm5 = vweird.f32 %v8283_v39 }
 0xca5   : > { %v2358_v43 = vpop.permute.xlu2 %2357  ;;  %v8307_v14 = vpop.eup %5588  ;;  %v8319_v11 = vsel %vm1581_vm2, %v8156_v16, %v2342_v15  ;;  %v2427_v58 = vsel %vm8313_vm12, %v8237_v41, %v2423_v1  ;;  %v2480_v63 = vmul.f32 %v8289_v4, %v8250_v32  ;;  %v2447_v1 = vsel %vm2444_vm15, %v2446_v6, %v2442_v10  ;;  %vm8407_vm7 = vmor %vm2469_vm13, %vm2470_vm5 }
 0xca6   : > { %v2466_v0 = vsub.f32 1.0, %v2465_v24  ;;  %5594 = vrcp.f32 %v8319_v11  ;;  %v2350_v26 = vpop.permute.xlu1 %2349  ;;  %v8332_v48 = vpop.eup %5590  ;;  %v2585_v41 = vmul.f32 %v8307_v14, %v8243_v40  ;;  %v2432_v24 = vsel %vm2429_vm4, %v2431_v35, %v2427_v58 }
 0xca7   : > { %v8352_v44 = vpop.eup %5592  ;;  %v2525_v51 = vmul.f32 %v8332_v48, %v8257_v17  ;;  %v2535_v15 = vand.u32 2147483648, %v8257_v17  ;;  %v8362_v61 = vmul.f32 %v2432_v24, %v8212_v21  ;;  %v2481_v47 = vsub.f32 1.0, %v2480_v63 }
 0xca8   : > { %v2467_v19 = vmul.f32 %v8283_v39, %v2466_v0  ;;  %v2473_v10 = vand.u32 2147483647, %v8241_v57  ;;  %v8366_v6 = vmul.f32 %v2447_v1, %v8177_v12  ;;  %v2488_v0 = vand.u32 2147483647, %v8250_v32 }
 0xca9   : > { %9314 = vst [vmem:[#allocation44_spill] sm:$0xff] %v8362_v61  ;;  %v2586_v58 = vsub.f32 1.0, %v2585_v41  ;;  %v8374_v35 = vmul.f32 %v8352_v44, %v8264_v18  ;;  %v2518_v21 = vand.u32 2147483647, %v8319_v11  ;;  %v2526_v30 = vsub.f32 1.0, %v2525_v51 }
 0xcaa   : > { %9315 = vst [vmem:[#allocation43_spill] sm:$0xff] %v8366_v6  ;;  %v2468_v41 = vadd.f32 %v8283_v39, %v2467_v19  ;;  %v2520_v46 = vand.u32 2147483648, %v8319_v11  ;;  %v2482_v19 = vmul.f32 %v8289_v4, %v2481_v47  ;;  %v2476_v61 = vor.u32 1.1754944e-38, %v2475_v27 }
 0xcab   : > { %v8411_v34 = vor.u32 1.1754944e-38, %v2535_v15  ;;  %vm2474_vm3 = vcmp.eq.f32.partialorder %v2473_v10, 8.507059e+37  ;;  %vm2530_vm9 = vweird.f32 %v8332_v48  ;;  %vm2514_vm10 = vweird.f32 %v8319_v11 }
 0xcac   : > { %v8369_v13 = vpop.eup %5594  ;;  %v8377_v24 = vpop.permute.xlu0 %2347  ;;  %v2472_v27 = vsel %vm8407_vm7, %v8283_v39, %v2468_v41  ;;  %v2527_v15 = vmul.f32 %v8332_v48, %v2526_v30  ;;  %vm8427_vm12 = vcmp.eq.f32.partialorder %v2518_v21, 8.507059e+37  ;;  %vm2529_vm15 = vweird.f32 %v8257_v17 }
 0xcad   : > { %v8379_v63 = vpop.permute.xlu2 %3541  ;;  %v2510_v12 = vmul.f32 %v8369_v13, %v8319_v11  ;;  %v8385_v1 = vsel %vm1581_vm2, %v8377_v24, %v2350_v26  ;;  %5596 = vrcp.f32 %v8377_v24  ;;  %v2483_v51 = vadd.f32 %v8289_v4, %v2482_v19 }
 0xcae   : > { %5598 = vrcp.f32 %v8385_v1  ;;  %v8393_v59 = vsub.f32 %v7552_v29, %v8379_v63  ;;  %v8395_v56 = vpop.permute.xlu1 %2355  ;;  %vm2485_vm4 = vweird.f32 %v8289_v4  ;;  %vm8439_vm13 = vcmp.eq.f32.partialorder %v2488_v0, 8.507059e+37 }
 0xcaf   : > { %v2511_v6 = vsub.f32 1.0, %v2510_v12  ;;  %v8399_v26 = vsel %vm1581_vm2, %v8395_v56, %v2358_v43  ;;  %5600 = vrcp.f32 %v8395_v56  ;;  %v8417_v43 = vmul.f32 %v8307_v14, %v2586_v58  ;;  %vm8466_vm7 = vmor %vm2484_vm8, %vm2485_vm4 }
 0xcb0   : > { %9316 = vst [vmem:[#allocation37_spill] sm:$0xff] %v8393_v59  ;;  %3613 = vrot.lane.b32.xlu2 %v8393_v59, %s6210_s28  ;;  %v2521_v58 = vor.u32 1.1754944e-38, %v2520_v46  ;;  %v2477_v12 = vsel %vm2474_vm3, %v2476_v61, %v2472_v27  ;;  %vm2515_vm5 = vweird.f32 %v8369_v13  ;;  %v2565_v61 = vand.u32 2147483648, %v8377_v24 }
 0xcb1   : > { %v2512_v47 = vmul.f32 %v8369_v13, %v2511_v6  ;;  %v8435_v57 = vmul.f32 %v2477_v12, %v8222_v36  ;;  %v2490_v36 = vand.u32 2147483648, %v8250_v32  ;;  %v2625_v41 = vand.u32 2147483648, %v8395_v56  ;;  %vm2516_vm8 = vmor %vm2514_vm10, %vm2515_vm5 }
 0xcb2   : > { %5602 = vrcp.f32 %v8399_v26  ;;  %v2563_v45 = vand.u32 2147483647, %v8377_v24  ;;  %vm2559_vm3 = vweird.f32 %v8377_v24  ;;  %v2566_v9 = vor.u32 1.1754944e-38, %v2565_v61 }
 0xcb3   : > { %v8431_v59 = vpop.eup %5596  ;;  %9321 = vst [vmem:[#allocation60_spill] sm:$0xff] %v8435_v57  ;;  %v2513_v27 = vadd.f32 %v8369_v13, %v2512_v47  ;;  %v2491_v31 = vor.u32 1.1754944e-38, %v2490_v36  ;;  %v2533_v39 = vand.u32 2147483647, %v8257_v17  ;;  %v2578_v61 = vand.u32 2147483647, %v8385_v1 }
 0xcb4   : > { %v8443_v30 = vpop.eup %5598  ;;  %v2555_v46 = vmul.f32 %v8431_v59, %v8377_v24  ;;  %v2354_v6 = vpop.permute.xlu0 %2353  ;;  %vm2560_vm4 = vweird.f32 %v8431_v59  ;;  %vm8499_vm10 = vcmp.eq.f32.partialorder %v2563_v45, 8.507059e+37 }
 0xcb5   : > { %v8450_v21 = vpop.eup %5600  ;;  %v2570_v0 = vmul.f32 %v8443_v30, %v8385_v1  ;;  %v8458_v19 = vsel %vm1581_vm2, %v8243_v40, %v2354_v6  ;;  %v9326_v6 = vld [vmem:[#allocation62_spill] sm:$0xff]  ;;  %v8489_v23 = vpop.permute.xlu2 %3547 }
 0xcb6   : > { %v2556_v12 = vsub.f32 1.0, %v2555_v46  ;;  %5604 = vrcp.f32 %v8458_v19  ;;  %v3540_v57 = vpop.permute.xlu1 %3539  ;;  %v3560_v5 = vsub.f32 %v9326_v6, %v8379_v63  ;;  %v2615_v47 = vmul.f32 %v8450_v21, %v8395_v56 }
 0xcb7   : > { %v2487_v46 = vsel %vm8466_vm7, %v8289_v4, %v2483_v51  ;;  %v8481_v53 = vsub.f32 %v7548_v50, %v3540_v57  ;;  %v2571_v63 = vsub.f32 1.0, %v2570_v0  ;;  %v8487_v6 = vor.u32 1.1754944e-38, %v2625_v41 }
 0xcb8   : > { %v2557_v32 = vmul.f32 %v8431_v59, %v2556_v12  ;;  %v3559_v29 = vsub.f32 %v9327_v3, %v3540_v57  ;;  %v2528_v4 = vadd.f32 %v8332_v48, %v2527_v15  ;;  %v2517_v51 = vsel %vm2516_vm8, %v8369_v13, %v2513_v27  ;;  %v8503_v36 = vpop.eup %5602 }
 0xcb9   : > { %3609 = vrot.lane.b32.xlu0 %v8481_v53, %s6210_s28  ;;  %v2492_v11 = vsel %vm8439_vm13, %v2491_v31, %v2487_v46  ;;  %v2616_v0 = vsub.f32 1.0, %v2615_v47  ;;  %v2522_v57 = vsel %vm8427_vm12, %v2521_v58, %v2517_v51  ;;  %vm8516_vm13 = vmor %vm2529_vm15, %vm2530_vm9  ;;  %v2608_v45 = vand.u32 2147483647, %v8458_v19 }
 0xcba   : > { %3611 = vrot.lane.b32.xlu1 %v3559_v29, %s6210_s28  ;;  %v8509_v15 = vmul.f32 %v2492_v11, %v8224_v38  ;;  %v2558_v13 = vadd.f32 %v8431_v59, %v2557_v32  ;;  %v8523_v10 = vsub.f32 %v9295_v7, %v8489_v23  ;;  %v8528_v38 = vmul.f32 %v2522_v57, %v8220_v25  ;;  %vm2561_vm9 = vmor %vm2559_vm3, %vm2560_vm4  ;;  %v9359_v11 = vld [vmem:[#allocation66_spill] sm:$0xff] }
 0xcbb   : > { %vm2619_vm12 = vweird.f32 %v8395_v56  ;;  %vm2620_vm15 = vweird.f32 %v8450_v21  ;;  %v2572_v12 = vmul.f32 %v8443_v30, %v2571_v63  ;;  %v8542_v25 = vmul.f32 %v8503_v36, %v8399_v26 }
 0xcbc   : > { %v5605_v41 = vpop.eup %5604  ;;  %v8525_v58 = vpop.permute.xlu0 %2359  ;;  %vm2604_vm5 = vweird.f32 %v8458_v19  ;;  %v2562_v24 = vsel %vm2561_vm9, %v8431_v59, %v2558_v13  ;;  %v2532_v47 = vsel %vm8516_vm13, %v8332_v48, %v2528_v4  ;;  %v2617_v46 = vmul.f32 %v8450_v21, %v2616_v0 }
 0xcbd   : > { %v2600_v27 = vmul.f32 %v5605_v41, %v8458_v19  ;;  %5606 = vrcp.f32 %v8525_v58  ;;  %v2610_v29 = vand.u32 2147483648, %v8458_v19  ;;  %v2567_v63 = vsel %vm8499_vm10, %v2566_v9, %v2562_v24 }
 0xcbe   : > { %v8545_v17 = vpop.permute.xlu1 %3545  ;;  %v9332_v51 = vand.u32 2147483647, %v8156_v16  ;;  %vm2605_vm3 = vweird.f32 %v5605_v41  ;;  %vm8561_vm8 = vcmp.eq.f32.partialorder %v2608_v45, 8.507059e+37  ;;  %v8566_v48 = vmul.f32 %v2567_v63, %v8228_v60 }
 0xcbf   : > { %v2601_v32 = vsub.f32 1.0, %v2600_v27  ;;  %vm2534_vm4 = vcmp.eq.f32.partialorder %v2533_v39, 8.507059e+37  ;;  %v2573_v9 = vadd.f32 %v8443_v30, %v2572_v12  ;;  %vm2575_vm10 = vweird.f32 %v8443_v30  ;;  %vm8588_vm0 = vmor %vm2604_vm5, %vm2605_vm3 }
 0xcc0   : > { %vm8557_vm7 = vcmp.eq.f32.partialorder %v9332_v51, 8.507059e+37  ;;  %v2537_v0 = vsel %vm2534_vm4, %v8411_v34, %v2532_v47  ;;  %vm2574_vm13 = vweird.f32 %v8385_v1  ;;  %v2580_v60 = vand.u32 2147483648, %v8385_v1  ;;  %v9341_v47 = vld [vmem:[#allocation63_spill] sm:$0xff]  ;;  %vm8612_vm5 = vmor %vm2619_vm12, %vm2620_vm15 }
 0xcc1   : > { %v2602_v4 = vmul.f32 %v5605_v41, %v2601_v32  ;;  %3615 = vrot.lane.b32.xlu0 %v3560_v5, %s6210_s28  ;;  %v8573_v16 = vmul.f32 %v2537_v0, %v8194_v54  ;;  %vm2590_vm9 = vweird.f32 %v8307_v14  ;;  %v2611_v34 = vor.u32 1.1754944e-38, %v2610_v29  ;;  %vm8580_vm4 = vmor %vm2574_vm13, %vm2575_vm10 }
 0xcc2   : > { %v2655_v31 = vand.u32 2147483648, %v8525_v58  ;;  %v2618_v5 = vadd.f32 %v8450_v21, %v2617_v46  ;;  %v8595_v39 = vsub.f32 %v7560_v37, %v8545_v17  ;;  %v2577_v12 = vsel %vm8580_vm4, %v8443_v30, %v2573_v9 }
 0xcc3   : > { %v5607_v57 = vpop.eup %5606  ;;  %v2603_v13 = vadd.f32 %v5605_v41, %v2602_v4  ;;  %v2653_v24 = vand.u32 2147483647, %v8525_v58  ;;  %vm2589_vm10 = vweird.f32 %v8243_v40  ;;  %v2581_v29 = vor.u32 1.1754944e-38, %v2580_v60 }
 0xcc4   : > { %v2645_v1 = vmul.f32 %v5607_v57, %v8525_v58  ;;  %v3544_v27 = vpop.permute.xlu0 %3543  ;;  %vm2650_vm3 = vweird.f32 %v5607_v57  ;;  %vm2579_vm13 = vcmp.eq.f32.partialorder %v2578_v61, 8.507059e+37  ;;  %v2622_v9 = vsel %vm8612_vm5, %v8450_v21, %v2618_v5  ;;  %vm8678_vm5 = vmor %vm2589_vm10, %vm2590_vm9 }
 0xcc5   : > { %v8603_v19 = vsub.f32 %v7556_v33, %v3544_v27  ;;  %v3561_v46 = vsub.f32 %v9341_v47, %v3544_v27  ;;  %v2607_v32 = vsel %vm8588_vm0, %v5605_v41, %v2603_v13  ;;  %v2582_v0 = vsel %vm2579_vm13, %v2581_v29, %v2577_v12 }
 0xcc6   : > { %v2646_v30 = vsub.f32 1.0, %v2645_v1  ;;  %v8616_v51 = vpop.permute.xlu1 %4145  ;;  %v2612_v4 = vsel %vm8561_vm8, %v2611_v34, %v2607_v32  ;;  %v2623_v60 = vand.u32 2147483647, %v8395_v56  ;;  %v8631_v59 = vmul.f32 %v2582_v0, %v8232_v22 }
 0xcc7   : > { %3617 = vrot.lane.b32.xlu1 %v8603_v19, %s6210_s28  ;;  %3619 = vrot.lane.b32.xlu2 %v3561_v46, %s6210_s28  ;;  %v8624_v41 = vmul.f32 %v2612_v4, %v8226_v62  ;;  %v9344_v61 = vsel %vm8338_vm14, %v8192_v20, %v8305_v28  ;;  %v9345_v34 = vsub.f32 1.0, %v8374_v35  ;;  %v2631_v21 = vsub.f32 1.0, %v8542_v25  ;;  %v9351_v46 = vld [vmem:[#allocation39_spill] sm:$0xff] }
 0xcc8   : > { %v2647_v13 = vmul.f32 %v5607_v57, %v2646_v30  ;;  %v2507_v62 = vsel %vm8557_vm7, %v8342_v8, %v9344_v61  ;;  %vm2649_vm0 = vweird.f32 %v8525_v58  ;;  %vm2624_vm12 = vcmp.eq.f32.partialorder %v2623_v60, 8.507059e+37  ;;  %v9354_v30 = vld [vmem:[#allocation65_spill] sm:$0xff] }
 0xcc9   : > { %v2542_v45 = vmul.f32 %v8352_v44, %v9345_v34  ;;  %v8647_v56 = vmul.f32 %v2507_v62, %v8214_v52  ;;  %v2656_v22 = vor.u32 1.1754944e-38, %v2655_v31  ;;  %3621 = vrot.lane.b32.xlu0 %v8595_v39, %s6210_s28  ;;  %v2627_v28 = vsel %vm2624_vm12, %v8487_v6, %v2622_v9  ;;  %vm2651_vm14 = vmor %vm2649_vm0, %vm2650_vm3  ;;  %v9355_v9 = vld [vmem:[#allocation40_spill] sm:$0xff] }
 0xcca   : > { %v2648_v20 = vadd.f32 %v5607_v57, %v2647_v13  ;;  %v8655_v8 = vmul.f32 %v2627_v28, %v8196_v42  ;;  %vm2544_vm15 = vweird.f32 %v8264_v18  ;;  %vm2545_vm7 = vweird.f32 %v8352_v44  ;;  %v9348_v42 = vld [vmem:[#allocation64_spill] sm:$0xff]  ;;  %v9356_v28 = vld [vmem:[#allocation38_spill] sm:$0xff] }
 0xccb   : > { %v2543_v49 = vadd.f32 %v8352_v44, %v2542_v45  ;;  %v2548_v52 = vand.u32 2147483647, %v8264_v18  ;;  %vm2654_vm8 = vcmp.eq.f32.partialorder %v2653_v24, 8.507059e+37  ;;  %vm8660_vm4 = vmor %vm2544_vm15, %vm2545_vm7  ;;  %v2550_v6 = vand.u32 2147483648, %v8264_v18 }
 0xccc   : > { %v4144_v35 = vpop.permute.xlu0 %4143  ;;  %v2652_v25 = vsel %vm2651_vm14, %v5607_v57, %v2648_v20  ;;  %v2588_v31 = vadd.f32 %v8307_v14, %v8417_v43  ;;  %v3562_v5 = vsub.f32 %v9348_v42, %v8545_v17  ;;  %v2593_v57 = vand.u32 2147483647, %v8243_v40  ;;  %v2366_v43 = vpop.permute.xlu2 %2365 }
 0xccd   : > { %v2657_v54 = vsel %vm2654_vm8, %v2656_v22, %v2652_v25  ;;  %v2547_v1 = vsel %vm8660_vm4, %v8352_v44, %v2543_v49  ;;  %v2204_v27 = vadd.f32 0.0009, %v8218_v55  ;;  %v2551_v24 = vor.u32 1.1754944e-38, %v2550_v6 }
 0xcce   : > { %v8682_v12 = vpop.permute.xlu1 %2363  ;;  %v8685_v17 = vmul.f32 %v2657_v54, %v8234_v2  ;;  %vm2549_vm9 = vcmp.eq.f32.partialorder %v2548_v52, 8.507059e+37  ;;  %v2592_v55 = vsel %vm8678_vm5, %v8307_v14, %v2588_v31  ;;  %v9352_v2 = vld [vmem:[#allocation55_spill] sm:$0xff]  ;;  %v9353_v29 = vand.u32 2147483648, %v8243_v40 }
 0xccf   : > { %v8689_v44 = vsel %vm1581_vm2, %v8682_v12, %v2366_v43  ;;  %5608 = vrcp.f32 %v8682_v12  ;;  %3623 = vrot.lane.b32.xlu1 %v3562_v5, %s6210_s28  ;;  %3625 = vrot.lane.b32.xlu2 %v8523_v10, %s6210_s28  ;;  %v2166_v32 = vsub.f32 %v9352_v2, %v9351_v46  ;;  %v3563_v4 = vsub.f32 %v9354_v30, %v8489_v23  ;;  %v9358_v52 = vld [vmem:[#allocation67_spill] sm:$0xff]  ;;  %v9360_v2 = vld [vmem:[#allocation41_spill] sm:$0xff] }
 0xcd0   : > { %v2596_v63 = vor.u32 1.1754944e-38, %v9353_v29  ;;  %v2552_v0 = vsel %vm2549_vm9, %v2551_v24, %v2547_v1  ;;  %v2207_v60 = vadd.f32 0.0009, %v9355_v9  ;;  %vm2594_vm10 = vcmp.eq.f32.partialorder %v2593_v57, 8.507059e+37 }
 0xcd1   : > { %v8705_v13 = vmul.f32 %v2552_v0, %v2204_v27  ;;  %v2632_v61 = vmul.f32 %v8503_v36, %v2631_v21  ;;  %3627 = vrot.lane.b32.xlu0 %v3563_v4, %s6210_s28  ;;  %vm2635_vm3 = vweird.f32 %v8503_v36  ;;  %v2188_v34 = vmul.f32 2.0, %v2166_v32  ;;  %v9357_v21 = vld [vmem:[#allocation46_spill] sm:$0xff]  ;;  %v9361_v32 = vld [vmem:[#allocation56_spill] sm:$0xff] }
 0xcd2   : > { %v2597_v14 = vsel %vm2594_vm10, %v2596_v63, %v2592_v55  ;;  %vm2634_vm13 = vweird.f32 %v8399_v26  ;;  %v2638_v23 = vand.u32 2147483647, %v8399_v26  ;;  %v2640_v22 = vand.u32 2147483648, %v8399_v26 }
 0xcd3   : > { %v8710_v62 = vmul.f32 %v2597_v14, %v2207_v60  ;;  %v2633_v40 = vadd.f32 %v8503_v36, %v2632_v61  ;;  %v2169_v49 = vsub.f32 %v9357_v21, %v9356_v28  ;;  %v8720_v25 = vsub.f32 %v9358_v52, %v8616_v51  ;;  %vm2636_vm0 = vmor %vm2634_vm13, %vm2635_vm3 }
 0xcd4   : > { %v2362_v45 = vpop.permute.xlu0 %2361  ;;  %v8723_v6 = vsub.f32 %v9359_v11, %v4144_v35  ;;  %v2641_v51 = vor.u32 1.1754944e-38, %v2640_v22  ;;  %v2210_v54 = vadd.f32 0.0009, %v2188_v34  ;;  %v8733_v35 = vpop.f32.mrf.mxu3  ;;  %vm2639_vm12 = vcmp.eq.f32.partialorder %v2638_v23, 8.507059e+37 }
 0xcd5   : > { %v5609_v20 = vpop.eup %5608  ;;  %v2379_v31 = vsel %vm1581_vm2, %v8525_v58, %v2362_v45  ;;  %v2637_v26 = vsel %vm2636_vm0, %v8503_v36, %v2633_v40  ;;  %v2191_v57 = vmul.f32 2.0, %v2169_v49  ;;  %v2685_v58 = vand.u32 2147483648, %v8682_v12 }
 0xcd6   : > { %v2675_v5 = vmul.f32 %v5609_v20, %v8682_v12  ;;  %5610 = vrcp.f32 %v2379_v31  ;;  %v2642_v27 = vsel %vm2639_vm12, %v2641_v51, %v2637_v26  ;;  %vm2680_vm14 = vweird.f32 %v5609_v20  ;;  %v9362_v51 = vld [vmem:[#allocation59_spill] sm:$0xff] }
 0xcd7   : > { %4167 = vrot.lane.b32.xlu1 %v8723_v6, %s6200_s4  ;;  %4169 = vrot.lane.b32.xlu2 %v8720_v25, %s6200_s4  ;;  %v2683_v36 = vand.u32 2147483647, %v8682_v12  ;;  %v8739_v43 = vmul.f32 %v2642_v27, %v2210_v54  ;;  %v8743_v24 = vmul.f32 %v8733_v35, %v8733_v35  ;;  %vm2679_vm15 = vweird.f32 %v8682_v12 }
 0xcd8   : > { %v2676_v1 = vsub.f32 1.0, %v2675_v5  ;;  %5612 = vrcp.f32 %v8689_v44  ;;  %v2168_v29 = vsub.f32 %v9361_v32, %v9360_v2  ;;  %vm2681_vm7 = vmor %vm2679_vm15, %vm2680_vm14  ;;  %v2686_v63 = vor.u32 1.1754944e-38, %v2685_v58 }
 0xcd9   : > { %3518 = vrot.lane.b32.xlu0 %v7556_v33, %s6210_s28  ;;  %v2213_v0 = vadd.f32 0.0009, %v2191_v57  ;;  %vm2684_vm8 = vcmp.eq.f32.partialorder %v2683_v36, 8.507059e+37  ;;  %v2670_v61 = vand.u32 2147483648, %v2379_v31  ;;  %v2668_v45 = vand.u32 2147483647, %v2379_v31 }
 0xcda   : > { %v2677_v18 = vmul.f32 %v5609_v20, %v2676_v1  ;;  %v2190_v40 = vmul.f32 2.0, %v2168_v29  ;;  %vm2664_vm5 = vweird.f32 %v2379_v31  ;;  %v9363_v1 = vld [vmem:[#allocation57_spill] sm:$0xff]  ;;  %v2700_v58 = vand.u32 2147483648, %v8689_v44 }
 0xcdb   : > { %vm2669_vm10 = vcmp.eq.f32.partialorder %v2668_v45, 8.507059e+37  ;;  %v2170_v57 = vsub.f32 %v9363_v1, %v9356_v28  ;;  %v2698_v36 = vand.u32 2147483647, %v8689_v44  ;;  %vm2694_vm13 = vweird.f32 %v8689_v44 }
 0xcdc   : > { %v5611_v55 = vpop.eup %5610  ;;  %v2678_v46 = vadd.f32 %v5609_v20, %v2677_v18  ;;  %v2212_v21 = vadd.f32 0.0009, %v2190_v40  ;;  %vm3629_vm14 = vcmask 736256  }
 0xcdd   : > { %v2660_v4 = vmul.f32 %v5611_v55, %v2379_v31  ;;  %vm2665_vm4 = vweird.f32 %v5611_v55  ;;  %v2192_v27 = vmul.f32 2.0, %v2170_v57  ;;  %vm2699_vm12 = vcmp.eq.f32.partialorder %v2698_v36, 8.507059e+37 }
 0xcde   : > { %v2682_v9 = vsel %vm2681_vm7, %v5609_v20, %v2678_v46  ;;  %v5613_v23 = vpop.eup %5612  ;;  %vm2666_vm9 = vmor %vm2664_vm5, %vm2665_vm4  ;;  %v2671_v20 = vor.u32 1.1754944e-38, %v2670_v61  ;;  %v2701_v46 = vor.u32 1.1754944e-38, %v2700_v58 }
 0xcdf   : > { %v2661_v60 = vsub.f32 1.0, %v2660_v4  ;;  %3514 = vrot.lane.b32.xlu1 %v7548_v50, %s6210_s28  ;;  %4506 = vrot.lane.b32.xlu2 %v8743_v24, %s6206_s12  ;;  %v2687_v12 = vsel %vm2684_vm8, %v2686_v63, %v2682_v9  ;;  %v2690_v49 = vmul.f32 %v5613_v23, %v8689_v44  ;;  %vm2695_vm3 = vweird.f32 %v5613_v23 }
 0xce0   : > { %v8753_v14 = vmul.f32 %v2687_v12, %v2213_v0  ;;  %vm2696_vm0 = vmor %vm2694_vm13, %vm2695_vm3  ;;  %v2214_v28 = vadd.f32 0.0009, %v2192_v27 }
 0xce1   : > { %v2662_v34 = vmul.f32 %v5611_v55, %v2661_v60  ;;  %4133 = vrot.lane.b32.xlu0 %v9359_v11, %s6200_s4  ;;  %v2691_v31 = vsub.f32 1.0, %v2690_v49 }
 0xce3   : > { %v2663_v22 = vadd.f32 %v5611_v55, %v2662_v34  ;;  %v2692_v18 = vmul.f32 %v5613_v23, %v2691_v31 }
 0xce5   : > { %v2667_v5 = vsel %vm2666_vm9, %v5611_v55, %v2663_v22  ;;  %v2693_v55 = vadd.f32 %v5613_v23, %v2692_v18  ;;  %v9364_v22 = vld [vmem:[#allocation37_spill] sm:$0xff] }
 0xce6   : > { %v2672_v26 = vsel %vm2669_vm10, %v2671_v20, %v2667_v5 }
 0xce7   : > { %3520 = vrot.lane.b32.xlu1 %v7560_v37, %s6210_s28  ;;  %3516 = vrot.lane.b32.xlu2 %v9362_v51, %s6210_s28  ;;  %v8762_v54 = vmul.f32 %v2672_v26, %v2212_v21  ;;  %v2697_v2 = vsel %vm2696_vm0, %v5613_v23, %v2693_v55 }
 0xce8   : > { %v2702_v32 = vsel %vm2699_vm12, %v2701_v46, %v2697_v2 }
 0xce9   : > { %v8773_v29 = vmul.f32 %v2702_v32, %v2214_v28 }
 0xcea   : > { %v8779_v4 = vpop.permute.xlu0 %2367  ;;  %v8781_v0 = vpop.permute.xlu1 %2369 }
 0xceb   : > { %5614 = vrcp.f32 %v8779_v4  ;;  %vm2709_vm7 = vweird.f32 %v8779_v4 }
 0xcec   : > { %v8777_v63 = vpop.permute.xlu2 %2778 }
 0xcef   : > { %4135 = vrot.lane.b32.xlu1 %v9358_v52, %s6200_s4  ;;  %3522 = vrot.lane.b32.xlu2 %v9295_v7, %s6210_s28  ;;  %s6213_s4 = smov 72  }
 0xcf7   : > { %4501 = vrot.lane.b32.xlu2 %v8733_v35, %s6211_s27 }
 0xd0a   : > { %v3614_v9 = vpop.permute.xlu2 %3613 }
 0xd21   : > { %v3620_v12 = vpop.permute.xlu2 %3619 }
 0xd29   : > { %v3626_v21 = vpop.permute.xlu2 %3625 }
 0xd2b   : > { %v3610_v44 = vpop.permute.xlu0 %3609 }
 0xd2c   : > { %v3612_v60 = vpop.permute.xlu1 %3611 }
 0xd2d   : > { %v3630_v61 = vsel %vm3629_vm14, %v3610_v44, %v3612_v60 }
 0xd2e   : > { %v3640_v40 = vadd.f32 %v3630_v61, %v8481_v53 }
 0xd30   : > { %v3645_v34 = vadd.f32 0.0009, %v3640_v40 }
 0xd31   : > { %v4170_v58 = vpop.permute.xlu2 %4169 }
 0xd32   : > { %3655 = vrot.lane.b32.xlu0 %v3645_v34, %s6199_s3 }
 0xd33   : > { %v3616_v45 = vpop.permute.xlu0 %3615 }
 0xd34   : > { %v3631_v23 = vsel %vm3629_vm14, %v3614_v9, %v3616_v45 }
 0xd35   : > { %v3641_v20 = vadd.f32 %v3631_v23, %v9364_v22 }
 0xd37   : > { %v3646_v49 = vadd.f32 0.0009, %v3641_v20 }
 0xd39   : > { %v3618_v5 = vpop.permute.xlu1 %3617  ;;  %3657 = vrot.lane.b32.xlu1 %v3646_v49, %s6199_s3  ;;  %v4507_v44 = vpop.permute.xlu2 %4506 }
 0xd3a   : > { %v3632_v26 = vsel %vm3629_vm14, %v3618_v5, %v3620_v12  ;;  %v8806_v40 = vsub.f32 %v8733_v35, %v4507_v44 }
 0xd3b   : > { %v3642_v1 = vadd.f32 %v3632_v26, %v8603_v19  ;;  %v3622_v57 = vpop.permute.xlu0 %3621  ;;  %v4174_v19 = vadd.f32 %v4170_v58, %v8720_v25  ;;  %v9366_v26 = vld [vmem:[#allocation44_spill] sm:$0xff] }
 0xd3d   : > { %v3647_v31 = vadd.f32 0.0009, %v3642_v1  ;;  %v2735_v1 = vmax.f32 %v9366_v26, 0.0 }
 0xd3f   : > { %3659 = vrot.lane.b32.xlu2 %v3647_v31, %s6199_s3 }
 0xd41   : > { %v3624_v53 = vpop.permute.xlu1 %3623  ;;  %v3517_v34 = vpop.permute.xlu2 %3516 }
 0xd42   : > { %v3633_v27 = vsel %vm3629_vm14, %v3622_v57, %v3624_v53  ;;  %v3530_v22 = vmul.f32 %v3517_v34, %v9362_v51  ;;  %v9368_v53 = vld [vmem:[#allocation43_spill] sm:$0xff] }
 0xd43   : > { %v3643_v18 = vadd.f32 %v3633_v27, %v8595_v39  ;;  %v3628_v36 = vpop.permute.xlu0 %3627  ;;  %v4176_v39 = vadd.f32 0.0009, %v4174_v19  ;;  %v2736_v58 = vmax.f32 %v9368_v53, 0.0  ;;  %v2741_v27 = vmax.f32 %v8528_v38, 0.0 }
 0xd44   : > { %v3634_v46 = vsel %vm3629_vm14, %v3626_v21, %v3628_v36  ;;  %v2744_v36 = vmax.f32 %v8566_v48, 0.0  ;;  %v2745_v38 = vmax.f32 %v8631_v59, 0.0  ;;  %v2750_v48 = vmax.f32 %v8685_v17, 0.0  ;;  %v9369_v59 = vld [vmem:[#allocation42_spill] sm:$0xff] }
 0xd45   : > { %v3648_v55 = vadd.f32 0.0009, %v3643_v18  ;;  %v3644_v28 = vadd.f32 %v3634_v46, %v8523_v10  ;;  %v2739_v18 = vmax.f32 %v8509_v15, 0.0  ;;  %v2747_v46 = vmax.f32 %v8624_v41, 0.0  ;;  %v5615_v15 = vpop.eup %5614 }
 0xd46   : > { %v2751_v41 = vmax.f32 %v8762_v54, 0.0  ;;  %vm2710_vm15 = vweird.f32 %v5615_v15 }
 0xd47   : > { %3661 = vrot.lane.b32.xlu0 %v3648_v55, %s6199_s3  ;;  %v3649_v2 = vadd.f32 0.0009, %v3644_v28  ;;  %v2742_v55 = vmax.f32 %v8573_v16, 0.0  ;;  %v2705_v28 = vmul.f32 %v5615_v15, %v8779_v4  ;;  %v2748_v16 = vmax.f32 %v8655_v8, 0.0  ;;  %vm2711_vm8 = vmor %vm2709_vm7, %vm2710_vm15 }
 0xd48   : > { %v2713_v8 = vand.u32 2147483647, %v8779_v4 }
 0xd49   : > { %v4168_v32 = vpop.permute.xlu1 %4167  ;;  %3663 = vrot.lane.b32.xlu1 %v3649_v2, %s6199_s3  ;;  %v2706_v2 = vsub.f32 1.0, %v2705_v28  ;;  %s6212_s3 = smov 104  }
 0xd4a   : > { %v4173_v9 = vadd.f32 %v4168_v32, %v8723_v6  ;;  %v9370_v32 = vld [vmem:[#allocation47_spill] sm:$0xff]  ;;  %vm2714_vm4 = vcmp.eq.f32.partialorder %v2713_v8, 8.507059e+37 }
 0xd4b   : > { %v3519_v12 = vpop.permute.xlu0 %3518  ;;  %v2707_v19 = vmul.f32 %v5615_v15, %v2706_v2 }
 0xd4c   : > { %v4175_v60 = vadd.f32 0.0009, %v4173_v9  ;;  %v3531_v10 = vmul.f32 %v3519_v12, %v7556_v33  ;;  %v2171_v9 = vsub.f32 %v9370_v32, %v9369_v59 }
 0xd4d   : > { %v2708_v44 = vadd.f32 %v5615_v15, %v2707_v19  ;;  %v9371_v19 = vld [vmem:[#allocation62_spill] sm:$0xff] }
 0xd4e   : > { %4179 = vrot.lane.b32.xlu2 %v4175_v60, %s6203_s6  ;;  %v2715_v60 = vand.u32 2147483648, %v8779_v4  ;;  %v2193_v17 = vmul.f32 2.0, %v2171_v9 }
 0xd4f   : > { %4181 = vrot.lane.b32.xlu0 %v4176_v39, %s6203_s6  ;;  %v2712_v12 = vsel %vm2711_vm8, %v5615_v15, %v2708_v44 }
 0xd50   : > { %v2716_v39 = vor.u32 1.1754944e-38, %v2715_v60  ;;  %v2740_v60 = vmax.f32 %v8647_v56, 0.0  ;;  %v8920_v56 = vsel %vm1581_vm2, %v8779_v4, %v8781_v0 }
 0xd51   : > { %v3515_v61 = vpop.permute.xlu1 %3514  ;;  %3573 = vrot.lane.b32.xlu1 %v3531_v10, %s6201_s18  ;;  %v2752_v10 = vmax.f32 %v8753_v14, 0.0 }
 0xd52   : > { %v3529_v25 = vmul.f32 %v3515_v61, %v7548_v50  ;;  %v3523_v50 = vpop.permute.xlu2 %3522  ;;  %v2717_v54 = vsel %vm2714_vm4, %v2716_v39, %v2712_v12  ;;  %v2215_v61 = vadd.f32 0.0009, %v2193_v17 }
 0xd53   : > { %v4134_v6 = vpop.permute.xlu0 %4133  ;;  %v3533_v49 = vmul.f32 %v3523_v50, %v9295_v7  ;;  %v9367_v7 = vld [vmem:[#allocation60_spill] sm:$0xff] }
 0xd54   : > { %v4139_v45 = vmul.f32 %v4134_v6, %v9359_v11  ;;  %v2738_v31 = vmax.f32 %v9367_v7, 0.0 }
 0xd56   : > { %3569 = vrot.lane.b32.xlu2 %v3529_v25, %s6201_s18  ;;  %v2718_v25 = vmul.f32 %v2717_v54, %v2215_v61 }
 0xd57   : > { %4518 = vrot.lane.b32.xlu0 %v8806_v40, %s6211_s27 }
 0xd58   : > { %v2754_v6 = vmax.f32 %v2718_v25, 0.0 }
 0xd59   : > { %v3521_v23 = vpop.permute.xlu1 %3520  ;;  %4153 = vrot.lane.b32.xlu1 %v4139_v45, %s6205_s5 }
 0xd5a   : > { %v3532_v33 = vmul.f32 %v3521_v23, %v7560_v37  ;;  %v9365_v37 = vld [vmem:[#allocation45_spill] sm:$0xff]  ;;  %v4502_v51 = vpop.permute.xlu2 %4501 }
 0xd5b   : > { %v2737_v5 = vmax.f32 %v9365_v37, 0.0  ;;  %v8827_v57 = vmul.f32 %v4502_v51, %v8733_v35 }
 0xd5e   : > { %3575 = vrot.lane.b32.xlu2 %v3532_v33, %s6201_s18 }
 0xd5f   : > { %3571 = vrot.lane.b32.xlu0 %v3530_v22, %s6201_s18 }
 0xd61   : > { %v4136_v20 = vpop.permute.xlu1 %4135  ;;  %4545 = vrot.lane.b32.xlu1 %v8743_v24, %s6211_s27 }
 0xd62   : > { %v4140_v21 = vmul.f32 %v4136_v20, %v9358_v52 }
 0xd66   : > { %4155 = vrot.lane.b32.xlu2 %v4140_v21, %s6205_s5 }
 0xd67   : > { %3577 = vrot.lane.b32.xlu0 %v3533_v49, %s6201_s18  ;;  %s6214_s18 = smov 120  }
 0xd69   : > { %2784 = vrot.lane.b32.xlu1 %v2737_v5, %s6209_s15 }
 0xd6e   : > { %2780 = vrot.lane.b32.xlu2 %v2735_v1, %s6209_s15 }
 0xd6f   : > { %4511 = vrot.lane.b32.xlu0 %v8827_v57, %s6208_s9  ;;  %s9385_s9 = sld [smem:[#allocation82_spill]] }
 0xd75   : > { %s848_s17 = scalar_lea.vmem %s9385_s9, %s7936_s1 }
 0xd76   : > { %2786 = vrot.lane.b32.xlu2 %v2738_v31, %s6209_s15 }
 0xd77   : > { %2782 = vrot.lane.b32.xlu0 %v2736_v58, %s6209_s15 }
 0xd7e   : > { %2792 = vrot.lane.b32.xlu2 %v2741_v27, %s6209_s15 }
 0xd7f   : > { %2788 = vrot.lane.b32.xlu0 %v2739_v18, %s6209_s15 }
 0xd86   : > { %2798 = vrot.lane.b32.xlu2 %v2744_v36, %s6209_s15 }
 0xd87   : > { %2794 = vrot.lane.b32.xlu0 %v2742_v55, %s6209_s15 }
 0xd8e   : > { %2804 = vrot.lane.b32.xlu2 %v2747_v46, %s6209_s15 }
 0xd8f   : > { %2800 = vrot.lane.b32.xlu0 %v2745_v38, %s6209_s15 }
 0xd96   : > { %2810 = vrot.lane.b32.xlu2 %v2750_v48, %s6209_s15 }
 0xd97   : > { %2806 = vrot.lane.b32.xlu0 %v2748_v16, %s6209_s15 }
 0xd99   : > { %v8868_v33 = vpop.permute.xlu2 %3659 }
 0xd9a   : > { %v3709_v9 = vand.u32 2147483647, %v8868_v33  ;;  %vm3705_vm0 = vweird.f32 %v8868_v33 }
 0xd9c   : > { %vm8927_vm12 = vcmp.eq.f32.partialorder %v3709_v9, 8.507059e+37 }
 0xd9f   : > { %2812 = vrot.lane.b32.xlu0 %v2751_v41, %s6209_s15 }
 0xda4   : > { %v8864_v34 = vpop.permute.xlu0 %3655 }
 0xda7   : > { %2814 = vrot.lane.b32.xlu0 %v2752_v10, %s6209_s15  ;;  %v3711_v10 = vand.u32 2147483648, %v8868_v33 }
 0xda8   : > { %v8875_v20 = vpop.permute.xlu2 %4179 }
 0xdab   : > { %v3658_v45 = vpop.permute.xlu1 %3657 }
 0xdac   : > { %5616 = vrcp.f32 %v3658_v45  ;;  %v3696_v28 = vand.u32 2147483648, %v3658_v45  ;;  %vm3690_vm9 = vweird.f32 %v3658_v45  ;;  %v3694_v2 = vand.u32 2147483647, %v3658_v45 }
 0xdad   : > { %5618 = vrcp.f32 %v8868_v33 }
 0xdae   : > { %v3697_v61 = vor.u32 1.1754944e-38, %v3696_v28  ;;  %vm3695_vm13 = vcmp.eq.f32.partialorder %v3694_v2, 8.507059e+37 }
 0xdaf   : > { %2818 = vrot.lane.b32.xlu0 %v2754_v6, %s6209_s15 }
 0xdb0   : > { %v8890_v36 = vpop.permute.xlu2 %3569 }
 0xdb2   : > { %v5617_v14 = vpop.eup %5616 }
 0xdb3   : > { %v3686_v21 = vmul.f32 %v5617_v14, %v3658_v45  ;;  %v8878_v37 = vpop.eup %5618  ;;  %vm3691_vm5 = vweird.f32 %v5617_v14 }
 0xdb4   : > { %v3701_v26 = vmul.f32 %v8878_v37, %v8868_v33  ;;  %vm8903_vm10 = vmor %vm3690_vm9, %vm3691_vm5  ;;  %vm3706_vm3 = vweird.f32 %v8878_v37 }
 0xdb5   : > { %v3687_v5 = vsub.f32 1.0, %v3686_v21  ;;  %vm8933_vm2 = vmor %vm3705_vm0, %vm3706_vm3 }
 0xdb6   : > { %v3702_v18 = vsub.f32 1.0, %v3701_v26 }
 0xdb7   : > { %v3688_v53 = vmul.f32 %v5617_v14, %v3687_v5 }
 0xdb8   : > { %v3703_v15 = vmul.f32 %v8878_v37, %v3702_v18  ;;  %v3576_v45 = vpop.permute.xlu2 %3575 }
 0xdb9   : > { %v8866_v23 = vpop.permute.xlu0 %3661  ;;  %v3689_v38 = vadd.f32 %v5617_v14, %v3688_v53 }
 0xdba   : > { %v3704_v54 = vadd.f32 %v8878_v37, %v3703_v15  ;;  %v3587_v15 = vsub.f32 %v9348_v42, %v3576_v45  ;;  %vm3720_vm4 = vweird.f32 %v8866_v23  ;;  %v3726_v42 = vand.u32 2147483648, %v8866_v23 }
 0xdbb   : > { %v8870_v22 = vpop.permute.xlu1 %3663  ;;  %v3693_v17 = vsel %vm8903_vm10, %v5617_v14, %v3689_v38  ;;  %v3584_v45 = vsub.f32 %v9327_v3, %v8890_v36 }
 0xdbc   : > { %5620 = vrcp.f32 %v8870_v22  ;;  %vm3735_vm15 = vweird.f32 %v8870_v22  ;;  %v3741_v33 = vand.u32 2147483648, %v8870_v22  ;;  %v3592_v9 = vmul.f32 2.0, %v3587_v15 }
 0xdbd   : > { %5622 = vrcp.f32 %v8866_v23 }
 0xdc1   : > { %v8873_v50 = vpop.permute.xlu0 %4181 }
 0xdc2   : > { %v8881_v51 = vpop.eup %5620  ;;  %5624 = vrcp.f32 %v8873_v50  ;;  %v4209_v3 = vand.u32 2147483647, %v8873_v50 }
 0xdc3   : > { %v3574_v49 = vpop.permute.xlu1 %3573  ;;  %v8886_v31 = vpop.eup %5622  ;;  %v3731_v58 = vmul.f32 %v8881_v51, %v8870_v22  ;;  %5626 = vrcp.f32 %v8864_v34  ;;  %vm3736_vm14 = vweird.f32 %v8881_v51 }
 0xdc4   : > { %v3716_v55 = vmul.f32 %v8886_v31, %v8866_v23  ;;  %v3586_v16 = vsub.f32 %v9341_v47, %v3574_v49  ;;  %v2743_v47 = vmax.f32 %v8705_v13, 0.0  ;;  %v3698_v49 = vsel %vm3695_vm13, %v3697_v61, %v3693_v17  ;;  %vm8953_vm8 = vmor %vm3735_vm15, %vm3736_vm14 }
 0xdc5   : > { %vm3721_vm7 = vweird.f32 %v8886_v31  ;;  %5628 = vrcp.f32 %v8920_v56  ;;  %vm4205_vm13 = vweird.f32 %v8873_v50  ;;  %vm4210_vm14 = vcmp.eq.f32.partialorder %v4209_v3, 8.507059e+37 }
 0xdc6   : > { %v3717_v32 = vsub.f32 1.0, %v3716_v55  ;;  %v3591_v25 = vmul.f32 2.0, %v3586_v16  ;;  %v3739_v55 = vand.u32 2147483647, %v8870_v22  ;;  %vm8971_vm9 = vmor %vm3720_vm4, %vm3721_vm7  ;;  %v4194_v3 = vand.u32 2147483647, %v8875_v20 }
 0xdc8   : > { %v8912_v39 = vpop.eup %5624  ;;  %v3718_v14 = vmul.f32 %v8886_v31, %v3717_v32  ;;  %vm3740_vm5 = vcmp.eq.f32.partialorder %v3739_v55, 8.507059e+37 }
 0xdc9   : > { %v4519_v1 = vpop.permute.xlu0 %4518  ;;  %v8923_v13 = vpop.eup %5626  ;;  %v4201_v4 = vmul.f32 %v8912_v39, %v8873_v50  ;;  %vm4206_vm3 = vweird.f32 %v8912_v39 }
 0xdca   : > { %v4521_v7 = vadd.f32 %v4519_v1, %v8806_v40  ;;  %v3732_v40 = vsub.f32 1.0, %v3731_v58  ;;  %v3708_v1 = vsel %vm8933_vm2, %v8878_v37, %v3704_v54  ;;  %v3671_v38 = vmul.f32 %v8923_v13, %v8864_v34 }
 0xdcb   : > { %v8896_v46 = vpop.permute.xlu1 %4153  ;;  %v3719_v28 = vadd.f32 %v8886_v31, %v3718_v14  ;;  %v3597_v14 = vadd.f32 0.0009, %v3592_v9  ;;  %vm3676_vm0 = vweird.f32 %v8923_v13  ;;  %vm3675_vm2 = vweird.f32 %v8864_v34 }
 0xdcc   : > { %v4522_v27 = vadd.f32 0.0009, %v4521_v7  ;;  %v3733_v8 = vmul.f32 %v8881_v51, %v3732_v40  ;;  %v3712_v7 = vor.u32 1.1754944e-38, %v3711_v10  ;;  %v4156_v10 = vpop.permute.xlu2 %4155  ;;  %vm3677_vm15 = vmor %vm3675_vm2, %vm3676_vm0  ;;  %vm4190_vm2 = vweird.f32 %v8875_v20 }
 0xdce   : > { %4524 = vrot.lane.b32.xlu1 %v4522_v27, %s6206_s12  ;;  %v3734_v26 = vadd.f32 %v8881_v51, %v3733_v8  ;;  %v3596_v27 = vadd.f32 0.0009, %v3591_v25  ;;  %v3713_v2 = vsel %vm8927_vm12, %v3712_v7, %v3708_v1  ;;  %v2746_v25 = vmax.f32 %v8710_v62, 0.0  ;;  %v8991_v62 = vpop.eup %5628  ;;  %vm8998_vm12 = vmor %vm4205_vm13, %vm4206_vm3 }
 0xdcf   : > { %v3681_v1 = vand.u32 2147483648, %v8864_v34  ;;  %vm2725_vm4 = vweird.f32 %v8991_v62 }
 0xdd0   : > { %v3714_v32 = vmul.f32 %v3713_v2, %v3596_v27 }
 0xdd1   : > { %v3572_v48 = vpop.permute.xlu0 %3571  ;;  %v3682_v15 = vor.u32 1.1754944e-38, %v3681_v1 }
 0xdd2   : > { %v3585_v41 = vsub.f32 %v9371_v19, %v3572_v48  ;;  %v4202_v48 = vsub.f32 1.0, %v4201_v4  ;;  %v3742_v19 = vor.u32 1.1754944e-38, %v3741_v33  ;;  %v3747_v54 = vmax.f32 %v3714_v32, 0.0 }
 0xdd3   : > { %v4546_v53 = vpop.permute.xlu1 %4545 }
 0xdd4   : > { %v3590_v12 = vmul.f32 2.0, %v3585_v41  ;;  %v4548_v22 = vadd.f32 %v4546_v53, %v8743_v24  ;;  %v3724_v41 = vand.u32 2147483647, %v8866_v23  ;;  %v4203_v8 = vmul.f32 %v8912_v39, %v4202_v48 }
 0xdd6   : > { %v3595_v6 = vadd.f32 0.0009, %v3590_v12  ;;  %2790 = vrot.lane.b32.xlu1 %v2740_v60, %s6209_s15  ;;  %v8976_v17 = vadd.f32 0.0001, %v4548_v22  ;;  %v3723_v12 = vsel %vm8971_vm9, %v8886_v31, %v3719_v28  ;;  %vm3725_vm10 = vcmp.eq.f32.partialorder %v3724_v41, 8.507059e+37 }
 0xdd7   : > { %v4204_v4 = vadd.f32 %v8912_v39, %v4203_v8  ;;  %v4211_v31 = vand.u32 2147483648, %v8873_v50  ;;  %v2720_v50 = vmul.f32 %v8991_v62, %v8920_v56  ;;  %v4543_v41 = vmul.f32 2.0, %v8827_v57 }
 0xdd8   : > { %v3699_v5 = vmul.f32 %v3698_v49, %v3595_v6  ;;  %v4160_v49 = vsub.f32 %v9358_v52, %v4156_v10  ;;  %5630 = vrcp.f32 %v8976_v17  ;;  %vm2724_vm9 = vweird.f32 %v8920_v56 }
 0xdd9   : > { %v3578_v58 = vpop.permute.xlu0 %3577  ;;  %v4208_v33 = vsel %vm8998_vm12, %v8912_v39, %v4204_v4  ;;  %v4212_v7 = vor.u32 1.1754944e-38, %v4211_v31  ;;  %5632 = vrcp.f32 %v8875_v20  ;;  %v2728_v57 = vand.u32 2147483647, %v8920_v56  ;;  %vm2726_vm3 = vmor %vm2724_vm9, %vm2725_vm4 }
 0xdda   : > { %v3746_v18 = vmax.f32 %v3699_v5, 0.0  ;;  %v3588_v40 = vsub.f32 %v9354_v30, %v3578_v58  ;;  %v3738_v30 = vsel %vm8953_vm8, %v8881_v51, %v3734_v26  ;;  %v3672_v51 = vsub.f32 1.0, %v3671_v38 }
 0xddb   : > { %v3743_v60 = vsel %vm3740_vm5, %v3742_v19, %v3738_v30  ;;  %v3589_v5 = vmul.f32 2.0, %v3584_v45  ;;  %v4162_v26 = vmul.f32 2.0, %v4160_v49  ;;  %v3679_v58 = vand.u32 2147483647, %v8864_v34 }
 0xddc   : > { %v3593_v16 = vmul.f32 2.0, %v3588_v40  ;;  %3757 = vrot.lane.b32.xlu2 %v3746_v18, %s6212_s3  ;;  %v3673_v6 = vmul.f32 %v8923_v13, %v3672_v51  ;;  %v4213_v18 = vsel %vm4210_vm14, %v4212_v7, %v4208_v33  ;;  %v2749_v38 = vmax.f32 %v8739_v43, 0.0  ;;  %v9384_v51 = vld [vmem:[#allocation58_spill] sm:$0xff]  ;;  %v2781_v33 = vpop.permute.xlu2 %2780 }
 0xddd   : > { %v3594_v55 = vadd.f32 0.0009, %v3589_v5  ;;  %v4164_v40 = vadd.f32 0.0009, %v4162_v26  ;;  %v2721_v34 = vsub.f32 1.0, %v2720_v50  ;;  %vm3680_vm7 = vcmp.eq.f32.partialorder %v3679_v58, 8.507059e+37  ;;  %v2785_v58 = vpop.permute.xlu1 %2784 }
 0xdde   : > { %v3598_v24 = vadd.f32 0.0009, %v3593_v16  ;;  %2796 = vrot.lane.b32.xlu1 %v2743_v47, %s6209_s15  ;;  %v3727_v47 = vor.u32 1.1754944e-38, %v3726_v42  ;;  %v3674_v0 = vadd.f32 %v8923_v13, %v3673_v6  ;;  %v5631_v53 = vpop.eup %5630  ;;  %v4561_v43 = vand.u32 2147483648, %v8976_v17 }
 0xddf   : > { %v4551_v28 = vmul.f32 %v5631_v53, %v8976_v17  ;;  %v4214_v37 = vmul.f32 %v4213_v18, %v4164_v40  ;;  %v5633_v30 = vpop.eup %5632  ;;  %vm4556_vm8 = vweird.f32 %v5631_v53  ;;  %v2172_v9 = vsub.f32 %v9384_v51, %v9369_v59 }
 0xde0   : > { %v3744_v23 = vmul.f32 %v3743_v60, %v3598_v24  ;;  %v3728_v21 = vsel %vm3725_vm10, %v3727_v47, %v3723_v12  ;;  %v3678_v39 = vsel %vm3677_vm15, %v8923_v13, %v3674_v0  ;;  %v2722_v13 = vmul.f32 %v8991_v62, %v2721_v34 }
 0xde1   : > { %v3729_v52 = vmul.f32 %v3728_v21, %v3597_v14  ;;  %v3683_v48 = vsel %vm3680_vm7, %v3682_v15, %v3678_v39  ;;  %v4552_v16 = vsub.f32 1.0, %v4551_v28  ;;  %v4216_v42 = vmax.f32 %v4214_v37, 0.0  ;;  %v4512_v26 = vpop.permute.xlu0 %4511 }
 0xde2   : > { %v3749_v61 = vmax.f32 %v3744_v23, 0.0  ;;  %v3684_v22 = vmul.f32 %v3683_v48, %v3594_v55  ;;  %v4186_v2 = vmul.f32 %v5633_v30, %v8875_v20  ;;  %v4559_v24 = vand.u32 2147483647, %v8976_v17 }
 0xde3   : > { %v3748_v27 = vmax.f32 %v3729_v52, 0.0  ;;  %v4553_v32 = vmul.f32 %v5631_v53, %v4552_v16  ;;  %v2723_v44 = vadd.f32 %v8991_v62, %v2722_v13  ;;  %v2730_v60 = vand.u32 2147483648, %v8920_v56 }
 0xde4   : > { %3763 = vrot.lane.b32.xlu0 %v3749_v61, %s6212_s3  ;;  %3759 = vrot.lane.b32.xlu2 %v3747_v54, %s6212_s3  ;;  %v3745_v19 = vmax.f32 %v3684_v22, 0.0  ;;  %vm4555_vm5 = vweird.f32 %v8976_v17  ;;  %v4187_v23 = vsub.f32 1.0, %v4186_v2  ;;  %v4562_v12 = vor.u32 1.1754944e-38, %v4561_v43  ;;  %v2787_v1 = vpop.permute.xlu2 %2786 }
 0xde5   : > { %v4554_v8 = vadd.f32 %v5631_v53, %v4553_v32  ;;  %vm4557_vm10 = vmor %vm4555_vm5, %vm4556_vm8  ;;  %v4544_v47 = vadd.f32 0.0001, %v4543_v41  ;;  %vm4560_vm13 = vcmp.eq.f32.partialorder %v4559_v24, 8.507059e+37  ;;  %v2194_v10 = vmul.f32 2.0, %v2172_v9 }
 0xde6   : > { %2802 = vrot.lane.b32.xlu1 %v2746_v25, %s6209_s15  ;;  %v2727_v54 = vsel %vm2726_vm3, %v8991_v62, %v2723_v44  ;;  %v2731_v25 = vor.u32 1.1754944e-38, %v2730_v60  ;;  %v4188_v45 = vmul.f32 %v5633_v30, %v4187_v23  ;;  %v4159_v17 = vsub.f32 %v9359_v11, %v8896_v46 }
 0xde7   : > { %v4558_v59 = vsel %vm4557_vm10, %v5631_v53, %v4554_v8  ;;  %v2753_v14 = vmax.f32 %v8773_v29, 0.0  ;;  %vm2729_vm0 = vcmp.eq.f32.partialorder %v2728_v57, 8.507059e+37  ;;  %v2216_v21 = vadd.f32 0.0009, %v2194_v10 }
 0xde8   : > { %v4563_v61 = vsel %vm4560_vm13, %v4562_v12, %v4558_v59  ;;  %v2732_v56 = vsel %vm2729_vm0, %v2731_v25, %v2727_v54  ;;  %v4161_v49 = vmul.f32 2.0, %v4159_v17  ;;  %v4189_v4 = vadd.f32 %v5633_v30, %v4188_v45 }
 0xde9   : > { %v9035_v6 = vmul.f32 %v4563_v61, %v4544_v47  ;;  %vm4191_vm12 = vweird.f32 %v5633_v30  ;;  %v2733_v31 = vmul.f32 %v2732_v56, %v2216_v21  ;;  %v4196_v62 = vand.u32 2147483648, %v8875_v20  ;;  %v2783_v50 = vpop.permute.xlu0 %2782 }
 0xdea   : > { %vm4192_vm14 = vmor %vm4190_vm2, %vm4191_vm12  ;;  %v4163_v52 = vadd.f32 0.0009, %v4161_v49  ;;  %vm4195_vm15 = vcmp.eq.f32.partialorder %v4194_v3, 8.507059e+37  ;;  %v4514_v15 = vsub.f32 %v8733_v35, %v4512_v26  ;;  %vm2822_vm9 = vcmask 326656  }
 0xdeb   : > { %v4193_v11 = vsel %vm4192_vm14, %v5633_v30, %v4189_v4  ;;  %v2755_v46 = vmax.f32 %v2733_v31, 0.0  ;;  %v4197_v29 = vor.u32 1.1754944e-38, %v4196_v62  ;;  %v2824_v8 = vsel %vm2822_vm9, %v2783_v50, %v2785_v58 }
 0xdec   : > { %3761 = vrot.lane.b32.xlu2 %v3748_v27, %s6212_s3  ;;  %v2793_v53 = vpop.permute.xlu2 %2792  ;;  %v4515_v22 = vmul.f32 2.0, %v4514_v15  ;;  %v2823_v12 = vsel %vm2822_vm9, %v8777_v63, %v2781_v33  ;;  %v2846_v59 = vsel %vm1568_vm1, %v2824_v8, 0.0  ;;  %vm3777_vm10 = vcmask 308224  }
 0xded   : > { %v4198_v36 = vsel %vm4195_vm15, %v4197_v29, %v4193_v11  ;;  %v2845_v54 = vsel %vm1568_vm1, %v2823_v12, 0.0  ;;  %vm4226_vm3 = vcmask 111616   ;;  %vm4570_vm13 = vcmask 9216  }
 0xdee   : > { %2808 = vrot.lane.b32.xlu1 %v2749_v38, %s6209_s15  ;;  %v4199_v0 = vmul.f32 %v4198_v36, %v4163_v52  ;;  %v2847_v45 = vadd.f32 %v2846_v59, %v2845_v54  ;;  %vm4240_vm0 = vcmask 16400   ;;  %vm4583_vm12 = vcmask 24600  }
 0xdf0   : > { %v4215_v5 = vmax.f32 %v4199_v0, 0.0 }
 0xdf1   : > { %v2789_v7 = vpop.permute.xlu0 %2788 }
 0xdf2   : > { %v2825_v47 = vsel %vm2822_vm9, %v2787_v1, %v2789_v7 }
 0xdf3   : > { %v2848_v61 = vsel %vm1568_vm1, %v2825_v47, 0.0 }
 0xdf4   : > { %4221 = vrot.lane.b32.xlu2 %v4216_v42, %s6213_s4  ;;  %v2799_v27 = vpop.permute.xlu2 %2798  ;;  %v2849_v56 = vadd.f32 %v2848_v61, %v2847_v45 }
 0xdf6   : > { %3755 = vrot.lane.b32.xlu1 %v3745_v19, %s6212_s3  ;;  %v4516_v19 = vadd.f32 0.0009, %v4515_v22 }
 0xdf9   : > { %v2795_v20 = vpop.permute.xlu0 %2794 }
 0xdfc   : > { %v2805_v55 = vpop.permute.xlu2 %2804 }
 0xdfe   : > { %2816 = vrot.lane.b32.xlu1 %v2753_v14, %s6209_s15 }
 0xe01   : > { %v2801_v18 = vpop.permute.xlu0 %2800 }
 0xe02   : > { %v2828_v52 = vsel %vm2822_vm9, %v2799_v27, %v2801_v18 }
 0xe03   : > { %v2854_v33 = vsel %vm1568_vm1, %v2828_v52, 0.0 }
 0xe04   : > { %v2811_v42 = vpop.permute.xlu2 %2810 }
 0xe06   : > { %2820 = vrot.lane.b32.xlu1 %v2755_v46, %s6209_s15 }
 0xe09   : > { %v2807_v40 = vpop.permute.xlu0 %2806 }
 0xe0e   : > { %4219 = vrot.lane.b32.xlu1 %v4215_v5, %s6213_s4 }
 0xe11   : > { %v2813_v43 = vpop.permute.xlu0 %2812 }
 0xe19   : > { %v2815_v60 = vpop.permute.xlu0 %2814 }
 0xe21   : > { %v2819_v25 = vpop.permute.xlu0 %2818 }
 0xe36   : > { %v3758_v9 = vpop.permute.xlu2 %3757 }
 0xe37   : > { %v3771_v49 = vsel %vm3397_vm6, %v3758_v9, 0.0 }
 0xe3e   : > { %v3760_v23 = vpop.permute.xlu2 %3759 }
 0xe3f   : > { %v3773_v11 = vsel %vm3397_vm6, %v3760_v23, 0.0 }
 0xe40   : > { %v4525_v39 = vpop.permute.xlu1 %4524 }
 0xe41   : > { %5634 = vrcp.f32 %v4525_v39  ;;  %v4538_v48 = vand.u32 2147483648, %v4525_v39  ;;  %v4536_v16 = vand.u32 2147483647, %v4525_v39  ;;  %vm4532_vm8 = vweird.f32 %v4525_v39 }
 0xe43   : > { %v4539_v2 = vor.u32 1.1754944e-38, %v4538_v48  ;;  %vm4537_vm5 = vcmp.eq.f32.partialorder %v4536_v16, 8.507059e+37 }
 0xe46   : > { %v3762_v62 = vpop.permute.xlu2 %3761 }
 0xe47   : > { %v5635_v38 = vpop.eup %5634  ;;  %v3775_v5 = vsel %vm3397_vm6, %v3762_v62, 0.0 }
 0xe48   : > { %v4528_v28 = vmul.f32 %v5635_v38, %v4525_v39  ;;  %v2791_v34 = vpop.permute.xlu1 %2790  ;;  %vm4533_vm7 = vweird.f32 %v5635_v38  ;;  %v2831_v39 = vsel %vm2822_vm9, %v2811_v42, %v2813_v43 }
 0xe49   : > { %vm4534_vm4 = vmor %vm4532_vm8, %vm4533_vm7  ;;  %v2826_v10 = vsel %vm2822_vm9, %v2791_v34, %v2793_v53 }
 0xe4a   : > { %v4529_v37 = vsub.f32 1.0, %v4528_v28  ;;  %v2850_v14 = vsel %vm1568_vm1, %v2826_v10, 0.0 }
 0xe4b   : > { %v2851_v4 = vadd.f32 %v2850_v14, %v2849_v56 }
 0xe4c   : > { %v4530_v30 = vmul.f32 %v5635_v38, %v4529_v37 }
 0xe4e   : > { %v4531_v13 = vadd.f32 %v5635_v38, %v4530_v30  ;;  %v4222_v16 = vpop.permute.xlu2 %4221 }
 0xe4f   : > { %v4227_v42 = vsel %vm4226_vm3, %v4222_v16, 0.0 }
 0xe50   : > { %v2797_v41 = vpop.permute.xlu1 %2796  ;;  %v4535_v32 = vsel %vm4534_vm4, %v5635_v38, %v4531_v13 }
 0xe51   : > { %v4540_v24 = vsel %vm4537_vm5, %v4539_v2, %v4535_v32  ;;  %v2827_v17 = vsel %vm2822_vm9, %v2795_v20, %v2797_v41 }
 0xe52   : > { %v4541_v35 = vmul.f32 %v4540_v24, %v4516_v19  ;;  %v2852_v21 = vsel %vm1568_vm1, %v2827_v17, 0.0 }
 0xe53   : > { %v2853_v46 = vadd.f32 %v2852_v21, %v2851_v4 }
 0xe54   : > { %v4542_v51 = vmax.f32 %v4541_v35, 0.0 }
 0xe55   : > { %v2855_v53 = vadd.f32 %v2854_v33, %v2853_v46 }
 0xe56   : > { %4566 = vrot.lane.b32.xlu0 %v4542_v51, %s6214_s18  ;;  %v3764_v36 = vpop.permute.xlu0 %3763 }
 0xe57   : > { %v3778_v7 = vsel %vm3777_vm10, %v3764_v36, 0.0 }
 0xe58   : > { %v2803_v44 = vpop.permute.xlu1 %2802 }
 0xe59   : > { %v2829_v29 = vsel %vm2822_vm9, %v2803_v44, %v2805_v55 }
 0xe5a   : > { %v2856_v50 = vsel %vm1568_vm1, %v2829_v29, 0.0 }
 0xe5b   : > { %v2857_v18 = vadd.f32 %v2856_v50, %v2855_v53 }
 0xe60   : > { %v2809_v57 = vpop.permute.xlu1 %2808 }
 0xe61   : > { %v2830_v26 = vsel %vm2822_vm9, %v2807_v40, %v2809_v57  ;;  %v2860_v40 = vsel %vm1568_vm1, %v2831_v39, 0.0 }
 0xe62   : > { %v2858_v20 = vsel %vm1568_vm1, %v2830_v26, 0.0 }
 0xe63   : > { %v2859_v55 = vadd.f32 %v2858_v20, %v2857_v18 }
 0xe65   : > { %v2861_v28 = vadd.f32 %v2860_v40, %v2859_v55 }
 0xe68   : > { %v3756_v63 = vpop.permute.xlu1 %3755 }
 0xe69   : > { %v3770_v31 = vsel %vm3397_vm6, %v3756_v63, 0.0  ;;  %vm2864_vm6 = vcmask 701440  }
 0xe6a   : > { %v3772_v3 = vadd.f32 %v3771_v49, %v3770_v31 }
 0xe6c   : > { %v3774_v0 = vadd.f32 %v3773_v11, %v3772_v3 }
 0xe6e   : > { %v3776_v1 = vadd.f32 %v3775_v5, %v3774_v0 }
 0xe70   : > { %v2817_v58 = vpop.permute.xlu1 %2816  ;;  %v3779_v27 = vadd.f32 %v3778_v7, %v3776_v1 }
 0xe71   : > { %v2832_v38 = vsel %vm2822_vm9, %v2815_v60, %v2817_v58 }
 0xe72   : > { %3780 = vadd.xlane.f32.xlu2 %v3779_v27  ;;  %v2862_v15 = vsel %vm1568_vm1, %v2832_v38, 0.0  ;;  %vm3791_vm1 = vcmask 8200  }
 0xe73   : > { %v2863_v37 = vadd.f32 %v2862_v15, %v2861_v28 }
 0xe78   : > { %v2821_v34 = vpop.permute.xlu1 %2820 }
 0xe79   : > { %v2833_v48 = vsel %vm2822_vm9, %v2819_v25, %v2821_v34 }
 0xe7a   : > { %v2865_v22 = vsel %vm2864_vm6, %v2833_v48, 0.0 }
 0xe7b   : > { %v2866_v30 = vadd.f32 %v2865_v22, %v2863_v37 }
 0xe7d   : > { %2867 = vadd.xlane.f32.xlu1 %v2866_v30 }
 0xe80   : > { %v4220_v13 = vpop.permute.xlu1 %4219 }
 0xe81   : > { %v4225_v2 = vsel %vm4085_vm11, %v4220_v13, 0.0  ;;  %vm9386_vm11 = vcmask 0  }
 0xe82   : > { %v4228_v19 = vadd.f32 %v4227_v42, %v4225_v2 }
 0xe84   : > { %4229 = vadd.xlane.f32.xlu0 %v4228_v19 }
 0xec8   : > { %v4567_v43 = vpop.permute.xlu0 %4566 }
 0xec9   : > { %v4569_v41 = vmul.f32 %v4567_v43, %v9035_v6 }
 0xecb   : > { %v4571_v32 = vsel %vm4570_vm13, %v4569_v41, 0.0 }
 0xecc   : > { %4572 = vadd.xlane.f32.xlu1 %v4571_v32 }
 0xee5   : > { %v3781_v24 = vpop.xlane.xlu2 %3780 }
 0xee6   : > { %v3782_v35 = vrot.slane %v3781_v24, 4 }
 0xee8   : > { %v3783_v51 = vadd.f32 %v3782_v35, %v3781_v24 }
 0xeea   : > { %v3784_v9 = vrot.slane %v3783_v51, 2 }
 0xeec   : > { %v3785_v23 = vadd.f32 %v3784_v9, %v3783_v51 }
 0xeee   : > { %v3786_v10 = vrot.slane %v3785_v23, 1 }
 0xef0   : > { %v2868_v44 = vpop.xlane.xlu1 %2867  ;;  %v3787_v45 = vadd.f32 %v3786_v10, %v3785_v23 }
 0xef1   : > { %v2869_v60 = vrot.slane %v2868_v44, 4 }
 0xef3   : > { %v2870_v8 = vadd.f32 %v2869_v60, %v2868_v44 }
 0xef5   : > { %v2871_v57 = vrot.slane %v2870_v8, 2 }
 0xef7   : > { %v4230_v12 = vpop.xlane.xlu0 %4229  ;;  %v2872_v47 = vadd.f32 %v2871_v57, %v2870_v8 }
 0xef8   : > { %v4231_v59 = vrot.slane %v4230_v12, 4 }
 0xef9   : > { %v2873_v54 = vrot.slane %v2872_v47, 1 }
 0xefa   : > { %v4232_v61 = vadd.f32 %v4231_v59, %v4230_v12 }
 0xefb   : > { %v2874_v25 = vadd.f32 %v2873_v54, %v2872_v47 }
 0xefc   : > { %v4233_v6 = vrot.slane %v4232_v61, 2 }
 0xefd   : > { %5146 = vpush %v2874_v25 }
 0xefe   : > { %v4234_v17 = vadd.f32 %v4233_v6, %v4232_v61  ;;  %5148 = vpush %v3787_v45 }
 0xf00   : > { %v4235_v14 = vrot.slane %v4234_v17, 1 }
 0xf02   : > { %v4236_v56 = vadd.f32 %v4235_v14, %v4234_v17 }
 0xf04   : > { %5150 = vpush %v4236_v56 }
 0xf2e   : > { %s5147_s6 = spop %5146 }
 0xf2f   : > { %v2876_v21 = vstv %s5147_s6  ;;  %s5149_s19 = spop %5148 }
 0xf30   : > { %v2877_v63 = vmul.f32 0.00013520822, %v2876_v21  ;;  %v3789_v49 = vstv %s5149_s19 }
 0xf31   : > { %v3790_v4 = vmul.f32 0.00069252076, %v3789_v49 }
 0xf32   : > { %2878 = vst.msk [vmem:[%s848_s17] sm:$0x1] %vm9386_vm11, %v2877_v63 }
 0xf33   : > { %3792 = vst.msk [vmem:[%s848_s17] sm:$0x1] %vm3791_vm1, %v3790_v4 }
 0xf35   : > { %s5151_s8 = spop %5150 }
 0xf36   : > { %v4238_v31 = vstv %s5151_s8 }
 0xf37   : > { %v4239_v62 = vmul.f32 0.0051020407, %v4238_v31 }
 0xf39   : > { %4241 = vst.msk [vmem:[%s848_s17] sm:$0x1] %vm4240_vm0, %v4239_v62 }
 0xf3f   : > { %v4573_v3 = vpop.xlane.xlu1 %4572 }
 0xf40   : > { %v4574_v52 = vrot.slane %v4573_v3, 4 }
 0xf42   : > { %v4575_v11 = vadd.f32 %v4574_v52, %v4573_v3 }
 0xf44   : > { %v4576_v46 = vrot.slane %v4575_v11, 2 }
 0xf46   : > { %v4577_v29 = vadd.f32 %v4576_v46, %v4575_v11 }
 0xf48   : > { %v4578_v36 = vrot.slane %v4577_v29, 1 }
 0xf4a   : > { %v4579_v0 = vadd.f32 %v4578_v36, %v4577_v29 }
 0xf4c   : > { %5152 = vpush %v4579_v0 }
 0xf7d   : > { %s5153_s1 = spop %5152 }
 0xf7e   : > { %v4581_v5 = vstv %s5153_s1 }
 0xf7f   : > { %v4582_v26 = vmul.f32 0.25, %v4581_v5 }
 0xf81   : > { %4584 = vst.msk [vmem:[%s848_s17] sm:$0x1] %vm4583_vm12, %v4582_v26 }
 0xf82 PF: > { %s40_s30 = sadd.s32 1, %s6178_s30   ;;  %s9387_s24 = smov %s6154_s25 }
 0xf83   : > { %p37_p4 = scmp.ge.s32.totalorder %s40_s30, 8   ;;  %s9388_s25 = smov %s6158_s26 }
 0xf84   : > { %s9389_s26 = smov %s6494_s2  ;;  %s9390_s27 = smov %s6170_s29 }
 0xf85   : > { %s9391_s28 = smov %s6174_s0  ;;  %s9392_s29 = smov %s9395_s22 }
 0xf86   : > { %s9393_s0 = smov %s9399_s21  ;;  %39 = sbr.rel (!%p37_p4) target bundleno = 30 (0x1e), region = 197 }
 0xf8b   :  { %4630 = vsyncpa [#allocation3], 1 }
 0xf8c   :  { %4632 = vsyncpa [#allocation3 + $0x1], 1 }
 0xf8d   :  { %4633 = vsyncpa [#allocation5], 1 }
 0xf8e   :  { %4635 = vsyncpa [#allocation5 + $0x1], 1 }
 0xf8f   :  { %4636 = vsyncpa [#allocation8], 1 }
 0xf90   :  { %4637 = vsyncpa [#allocation11], 1 }
 0xf91   :  { %4638 = vsyncpa [#allocation14], 1 }
 0xf92   :  { %4639 = vsyncpa [#allocation17], 1 }
 0xf93   :  { %4640 = vsyncpa [#allocation20], 1 }
 0xf94   :  { %4641 = vsyncpa [#allocation23], 1 }

</bundles_post_ra>
